<compile_context>
chip_gen: v6e
topology: v6e:2x2x1
jax: 0.10.0
libtpu: 0.0.40
codegen_flags: <defaults>
</compile_context>

<pallas_src>
import functools

import jax
import jax.numpy as jnp
from jax.experimental import pallas as pl
from jax.experimental.pallas import tpu as pltpu


# ------------------------------ helpers ----------------------------------- #

_LANE = 128
_ROW_PAD = 512          # pad node axis so 512-wide row/contraction tiles exist


def _round_up(x, m):
    return ((x + m - 1) // m) * m


def _pad2d(x, rows, cols):
    r, c = x.shape
    return jnp.pad(x, ((0, rows - r), (0, cols - c)))


def _vmem_budgets():
    """Return (tile-selection budget, vmem_limit_bytes), generation-aware."""
    cap = 64 << 20                         # conservative default (v7x: 64 MiB/TC)
    try:
        cap = int(pltpu.get_tpu_info().vmem_capacity_bytes)
    except Exception:
        pass
    if cap >= (96 << 20):                  # v5e / v6e: 128 MiB physical VMEM
        return 80 << 20, 100 << 20
    return 32 << 20, 48 << 20              # v7x: 64 MiB physical VMEM


def _choose_tiles(n_pad, f_in_pad, f_out_pad, budget):
    """Pick (tm, tk, x_resident) row/contraction tiles fitting the budget."""
    def need(tm, tk, x_resident):
        a_bytes = 2 * tm * tk              # int8 A strip, double-buffered
        a_bytes += 2 * tm * tk             # headroom: in-kernel int8->bf16 temp
        x_bytes = (2 * n_pad * f_in_pad * 2 if x_resident
                   else 2 * tk * f_in_pad * 2)          # bf16 X
        acc_bytes = tm * f_in_pad * 4 if f_in_pad != f_out_pad else 0
        return (a_bytes + x_bytes + acc_bytes
                + 2 * f_in_pad * f_out_pad * 4          # W
                + 2 * f_out_pad * 4                     # bias
                + 2 * tm * 4                            # d^-1/2 row block
                + 2 * tm * f_out_pad * 4)               # resident f32 out tile
    tms = [t for t in (512, 1024, 256, 128) if n_pad % t == 0]
    tks = [t for t in (8192, 4096, 2048, 1024, 512, 256, 128) if n_pad % t == 0]
    for x_resident in (True, False):
        for tm in tms:
            for tk in tks:
                if need(tm, tk, x_resident) <= budget:
                    return tm, tk, x_resident
    return 128, 128, False


# ----------------------------- Pallas kernel ------------------------------ #

def _gcn_layer_kernel(a_ref, x_ref, ds_ref, w_ref, b_ref, o_ref, *scratch,
                      apply_relu: bool, x_resident: bool, tk: int,
                      use_scratch: bool):
    """One GCN layer, row tile i, contraction step k:
         acc[i] += bf16(A_int8[i, k]) @ Xs[k]      (Xs = D^{-1/2} X, bf16)
         at last k:  out[i] = relu((d_i^{-1/2} * acc[i]) @ W + b)
    The f32 output tile itself is the accumulator when shapes allow.
    """
    k = pl.program_id(1)
    acc_ref = scratch[0] if use_scratch else o_ref

    @pl.when(k == 0)
    def _():
        acc_ref[...] = jnp.zeros_like(acc_ref)

    a_tile = a_ref[...].astype(jnp.bfloat16)            # int8 -> bf16 (VPU)
    if x_resident:
        start = pl.multiple_of(k * tk, tk)
        x_tile = x_ref[pl.ds(start, tk), :]              # slice resident X
    else:
        x_tile = x_ref[...]
    acc_ref[...] += jnp.dot(a_tile, x_tile,
                            preferred_element_type=jnp.float32)

    @pl.when(k == pl.num_programs(1) - 1)
    def _():
        agg = acc_ref[...] * ds_ref[...]                 # (tm,F) * (tm,1)
        out = jnp.dot(agg, w_ref[...],
                      preferred_element_type=jnp.float32)
        out = out + b_ref[...]                           # (1, F_out) broadcast
        if apply_relu:
            out = jnp.maximum(out, 0.0)
        o_ref[...] = out.astype(o_ref.dtype)


def gcn_layer(a_pad, x_pad, ds_col, w_pad, b_pad, apply_relu: bool):
    """a_pad: (Np,Np) int8   x_pad: (Np,Fi) bf16 (already D^{-1/2}-scaled)
       ds_col: (Np,1) f32    w_pad: (Fi,Fo) f32   b_pad: (1,Fo) f32."""
    n_pad = a_pad.shape[0]
    f_in_pad, f_out_pad = w_pad.shape
    tile_budget, vmem_limit = _vmem_budgets()
    tm, tk, x_resident = _choose_tiles(n_pad, f_in_pad, f_out_pad, tile_budget)
    use_scratch = (f_in_pad != f_out_pad)
    grid = (n_pad // tm, n_pad // tk)

    if x_resident:
        # Constant block index -> DMA'd once, held resident across row tiles.
        x_spec = pl.BlockSpec((n_pad, f_in_pad), lambda i, k: (0, 0))
    else:
        x_spec = pl.BlockSpec((tk, f_in_pad), lambda i, k: (k, 0))

    kernel = functools.partial(_gcn_layer_kernel, apply_relu=apply_relu,
                               x_resident=x_resident, tk=tk,
                               use_scratch=use_scratch)
    scratch_shapes = ([pltpu.VMEM((tm, f_in_pad), jnp.float32)]
                      if use_scratch else [])
    return pl.pallas_call(
        kernel,
        out_shape=jax.ShapeDtypeStruct((n_pad, f_out_pad), jnp.float32),
        grid_spec=pltpu.PrefetchScalarGridSpec(
            num_scalar_prefetch=0,
            grid=grid,
            in_specs=[
                pl.BlockSpec((tm, tk), lambda i, k: (i, k)),          # A int8
                x_spec,                                               # X bf16
                pl.BlockSpec((tm, 1), lambda i, k: (i, 0)),           # d^-1/2
                pl.BlockSpec((f_in_pad, f_out_pad), lambda i, k: (0, 0)),  # W
                pl.BlockSpec((1, f_out_pad), lambda i, k: (0, 0)),    # bias
            ],
            out_specs=pl.BlockSpec((tm, f_out_pad), lambda i, k: (i, 0)),
            scratch_shapes=scratch_shapes,
        ),
        compiler_params=pltpu.CompilerParams(
            dimension_semantics=("parallel", "arbitrary"),
            vmem_limit_bytes=vmem_limit,
        ),
    )(a_pad, x_pad, ds_col, w_pad, b_pad)


# ------------------------------- Glue (JAX) -------------------------------- #

def build_adjacency(edge_index, num_nodes):
    """Raw adjacency counts (int8) + D^{-1/2}, matching PyG gcn_norm with
    add_remaining_self_loops (fill_value=1, flow='source_to_target')."""
    src = edge_index[0]
    dst = edge_index[1]
    a = jnp.zeros((num_nodes, num_nodes), jnp.int32)
    a = a.at[dst, src].add(1)                        # message src -> dst
    diag = jnp.diagonal(a)
    a = a + jnp.diag(jnp.where(diag == 0, 1, 0))     # only missing self loops
    deg = a.sum(axis=1).astype(jnp.float32)          # in-degree incl. self loop
    d_inv_sqrt = jnp.where(deg > 0, jax.lax.rsqrt(deg), 0.0)
    return a.astype(jnp.int8), d_inv_sqrt


def init_params(dims, key):
    """dims is input->output of the encoder; decoder reverses it.
    PyG GCNConv reset_parameters: glorot(weight), zeros(bias)."""
    rdims = dims[::-1]
    params = []
    for i in range(len(rdims) - 1):
        f_in, f_out = rdims[i], rdims[i + 1]
        key, sub = jax.random.split(key)
        limit = jnp.sqrt(6.0 / (f_in + f_out))
        w = jax.random.uniform(sub, (f_in, f_out), jnp.float32, -limit, limit)
        b = jnp.zeros((f_out,), jnp.float32)
        params.append((w, b))
    return params


def gnn_attribute_decoder_forward(x, edge_index, params, act_last: bool = False):
    n, f_in = x.shape
    a_int8, d_inv_sqrt = build_adjacency(edge_index, n)

    # Pad the node axis to a multiple of 512 so large row/contraction tiles
    # are available; pad feature/lane axes to 128 (lane-dense stores).
    n_pad = _round_up(n, _ROW_PAD)
    a_pad = jnp.pad(a_int8, ((0, n_pad - n), (0, n_pad - n)))
    ds_pad = jnp.pad(d_inv_sqrt, (0, n_pad - n))     # padded rows -> scale 0
    ds_col = ds_pad.reshape(n_pad, 1)

    x_f32 = _pad2d(x, n_pad, _round_up(f_in, _LANE))
    n_layers = len(params)
    f_out = f_in
    for i, (w, b) in enumerate(params):
        f_in_l, f_out = w.shape
        f_in_pad = _round_up(f_in_l, _LANE)
        f_out_pad = _round_up(f_out, _LANE)
        w_pad = _pad2d(w, f_in_pad, f_out_pad)
        b_pad = _pad2d(b.reshape(1, -1), 1, f_out_pad)
        # Fold D^{-1/2} column scaling into X once (cheap N x F XLA work),
        # then stream it as bf16 (halves X DMA bytes, native bf16 MXU).
        x_scaled = (ds_pad[:, None] * x_f32).astype(jnp.bfloat16)
        apply_relu = act_last or (i < n_layers - 1)
        x_f32 = gcn_layer(a_pad, x_scaled, ds_col, w_pad, b_pad, apply_relu)
    return x_f32[:n, :f_out]


# ------------------------------- Reference --------------------------------- #

def _reference_forward(x, edge_index, params, act_last=False):
    a_int8, ds = build_adjacency(edge_index, x.shape[0])
    a_hat = ds[:, None] * a_int8.astype(jnp.float32) * ds[None, :]
    n_layers = len(params)
    for i, (w, b) in enumerate(params):
        x = a_hat @ (x @ w) + b[None, :]
        if act_last or (i < n_layers - 1):
            x = jnp.maximum(x, 0.0)
    return x


# --------------------------------- Main ------------------------------------ #

if __name__ == "__main__":
    key = jax.random.PRNGKey(0)

    # dims as given to the module (input -> output of the encoder); decoder
    # reverses: GCN(8 -> 16) -> ReLU -> GCN(16 -> 32).
    dims = [32, 16, 8]
    num_nodes = 300          # pads to 512 -> one 512-wide row/contraction tile
    latent_dim = dims[-1]

    key, kx = jax.random.split(key)
    x = jax.random.normal(kx, (num_nodes, latent_dim), jnp.float32)

    # Simple undirected ring graph (both directions listed, like PyG data).
    idx = jnp.arange(num_nodes)
    nxt = (idx + 1) % num_nodes
    edge_index = jnp.stack(
        [jnp.concatenate([idx, nxt]), jnp.concatenate([nxt, idx])], axis=0
    ).astype(jnp.int32)

    params = init_params(dims, key)

    fwd = jax.jit(functools.partial(gnn_attribute_decoder_forward,
                                    act_last=False))
    out = fwd(x, edge_index, params)
    out = jax.block_until_ready(out)

    ref = _reference_forward(x, edge_index, params, act_last=False)
    assert out.shape == (num_nodes, dims[0])
    # bf16 A/X streaming -> loosened tolerance vs the f32 reference.
    assert jnp.allclose(out, ref, atol=2e-2, rtol=2e-2), (
        float(jnp.max(jnp.abs(out - ref))))

    print("KERNEL_OK")
</pallas_src>

<mosaic_0001>
module attributes {stable_mosaic.version = 11 : i64} {
  func.func private @main(%arg0: i32) attributes {dimension_semantics = [#tpu.dimension_semantics<core_parallel>], iteration_bounds = array<i64: 2>, tpu.core_type = #tpu.core_type<sc_scalar_subcore>, window_params = []} {
    return
  }
}

module attributes {stable_mosaic.version = 11 : i64} {
  func.func private @main(%arg0: i32) attributes {dimension_semantics = [#tpu.dimension_semantics<core_parallel>], iteration_bounds = array<i64: 2>, tpu.core_type = #tpu.core_type<sc_scalar_subcore>, window_params = []} {
    return
  }
}

module attributes {stable_mosaic.version = 11 : i64} {
  func.func @_gcn_layer_kernel(%arg0: i32, %arg1: i32, %arg2: memref<512x512xi8, #tpu.memory_space<vmem>>, %arg3: memref<512x128xbf16, #tpu.memory_space<vmem>>, %arg4: memref<512x1xf32, #tpu.memory_space<vmem>>, %arg5: memref<128x128xf32, #tpu.memory_space<vmem>>, %arg6: memref<1x128xf32, #tpu.memory_space<vmem>>, %arg7: memref<512x128xf32, #tpu.memory_space<vmem>>) attributes {dimension_semantics = [#tpu.dimension_semantics<parallel>, #tpu.dimension_semantics<arbitrary>], iteration_bounds = array<i64: 1, 1>, scalar_prefetch = 0 : i64, scratch_operands = 0 : i64, tpu.core_type = #tpu.core_type<tc>, window_params = [{transform_indices = @transform_0, window_bounds = array<i64: 512, 512>}, {pipeline_mode = #tpu.pipeline_mode<synchronous>, transform_indices = @transform_1, window_bounds = array<i64: 512, 128>}, {transform_indices = @transform_2, window_bounds = array<i64: 512, 1>}, {pipeline_mode = #tpu.pipeline_mode<synchronous>, transform_indices = @transform_3, window_bounds = array<i64: 128, 128>}, {pipeline_mode = #tpu.pipeline_mode<synchronous>, transform_indices = @transform_4, window_bounds = array<i64: 1, 128>}, {transform_indices = @transform_5, window_bounds = array<i64: 512, 128>}]} {
    %c0_i32 = arith.constant 0 : i32
    %0 = arith.cmpi eq, %arg1, %c0_i32 : i32
    %1 = arith.extui %0 : i1 to i32
    %c0_i32_0 = arith.constant 0 : i32
    %2 = arith.cmpi ne, %1, %c0_i32_0 : i32
    scf.if %2 {
      %cst_9 = arith.constant 0.000000e+00 : f32
      %16 = vector.broadcast %cst_9 : f32 to vector<512x128xf32>
      %c0_10 = arith.constant 0 : index
      %c0_11 = arith.constant 0 : index
      %17 = vector.load %arg7[%c0_10, %c0_11] : memref<512x128xf32, #tpu.memory_space<vmem>>, vector<512x128xf32>
      tpu.vector_store %arg7[%c0_10, %c0_11], %16 {strides = array<i32>} : memref<512x128xf32, #tpu.memory_space<vmem>>, vector<512x128xf32>,
    } else {
    }
    %c0 = arith.constant 0 : index
    %c0_1 = arith.constant 0 : index
    %3 = vector.load %arg2[%c0, %c0_1] : memref<512x512xi8, #tpu.memory_space<vmem>>, vector<512x512xi8>
    %4 = arith.sitofp %3 : vector<512x512xi8> to vector<512x512xbf16>
    %c512_i32 = arith.constant 512 : i32
    %5 = arith.muli %arg1, %c512_i32 : i32
    %6 = tpu.assume_multiple %5, 512 : i32
    %7 = arith.index_cast %6 : i32 to index
    %c0_2 = arith.constant 0 : index
    %8 = vector.load %arg3[%7, %c0_2] : memref<512x128xbf16, #tpu.memory_space<vmem>>, vector<512x128xbf16>
    %c0_3 = arith.constant 0 : index
    %c0_4 = arith.constant 0 : index
    %9 = vector.load %arg7[%c0_3, %c0_4] : memref<512x128xf32, #tpu.memory_space<vmem>>, vector<512x128xf32>
    %cst = arith.constant dense<0.000000e+00> : vector<512x128xf32>
    %10 = tpu.matmul %4, %8, %cst {dimension_numbers = #tpu.dot_dimension_numbers<[1], [0], [0], [1], [0, 0, 1, 1], [], []>} : vector<512x512xbf16>, vector<512x128xbf16>, vector<512x128xf32> -> vector<512x128xf32>
    %11 = arith.addf %9, %10 : vector<512x128xf32>
    %c0_5 = arith.constant 0 : index
    %c0_6 = arith.constant 0 : index
    %12 = vector.load %arg7[%c0_5, %c0_6] : memref<512x128xf32, #tpu.memory_space<vmem>>, vector<512x128xf32>
    tpu.vector_store %arg7[%c0_5, %c0_6], %11 {strides = array<i32>} : memref<512x128xf32, #tpu.memory_space<vmem>>, vector<512x128xf32>,
    %c0_i32_7 = arith.constant 0 : i32
    %13 = arith.cmpi eq, %arg1, %c0_i32_7 : i32
    %14 = arith.extui %13 : i1 to i32
    %c0_i32_8 = arith.constant 0 : i32
    %15 = arith.cmpi ne, %14, %c0_i32_8 : i32
    scf.if %15 {
      %c0_9 = arith.constant 0 : index
      %c0_10 = arith.constant 0 : index
      %16 = vector.load %arg7[%c0_9, %c0_10] : memref<512x128xf32, #tpu.memory_space<vmem>>, vector<512x128xf32>
      %c0_11 = arith.constant 0 : index
      %c0_12 = arith.constant 0 : index
      %17 = vector.load %arg4[%c0_11, %c0_12] : memref<512x1xf32, #tpu.memory_space<vmem>>, vector<512x1xf32>
      %18 = vector.broadcast %17 : vector<512x1xf32> to vector<512x128xf32>
      %19 = arith.mulf %16, %18 : vector<512x128xf32>
      %c0_13 = arith.constant 0 : index
      %c0_14 = arith.constant 0 : index
      %20 = vector.load %arg5[%c0_13, %c0_14] : memref<128x128xf32, #tpu.memory_space<vmem>>, vector<128x128xf32>
      %cst_15 = arith.constant dense<0.000000e+00> : vector<512x128xf32>
      %21 = tpu.matmul %19, %20, %cst_15 {dimension_numbers = #tpu.dot_dimension_numbers<[1], [0], [0], [1], [0, 0, 1, 1], [], []>} : vector<512x128xf32>, vector<128x128xf32>, vector<512x128xf32> -> vector<512x128xf32>
      %c0_16 = arith.constant 0 : index
      %c0_17 = arith.constant 0 : index
      %22 = vector.load %arg6[%c0_16, %c0_17] : memref<1x128xf32, #tpu.memory_space<vmem>>, vector<1x128xf32>
      %23 = vector.broadcast %22 : vector<1x128xf32> to vector<512x128xf32>
      %24 = arith.addf %21, %23 : vector<512x128xf32>
      %cst_18 = arith.constant 0.000000e+00 : f32
      %25 = vector.broadcast %cst_18 : f32 to vector<512x128xf32>
      %26 = arith.maximumf %24, %25 : vector<512x128xf32>
      %c0_19 = arith.constant 0 : index
      %c0_20 = arith.constant 0 : index
      %27 = vector.load %arg7[%c0_19, %c0_20] : memref<512x128xf32, #tpu.memory_space<vmem>>, vector<512x128xf32>
      tpu.vector_store %arg7[%c0_19, %c0_20], %26 {strides = array<i32>} : memref<512x128xf32, #tpu.memory_space<vmem>>, vector<512x128xf32>,
    } else {
    }
    return
  }
  func.func @transform_0(%arg0: i32, %arg1: i32) -> (i32, i32) {
    %c0_i32 = arith.constant 0 : i32
    return %arg0, %arg1 : i32, i32
  }
  func.func @transform_1(%arg0: i32, %arg1: i32) -> (i32, i32) {
    %c0_i32 = arith.constant 0 : i32
    %c0_i32_0 = arith.constant 0 : i32
    %c0_i32_1 = arith.constant 0 : i32
    return %c0_i32, %c0_i32_0 : i32, i32
  }
  func.func @transform_2(%arg0: i32, %arg1: i32) -> (i32, i32) {
    %c0_i32 = arith.constant 0 : i32
    %c0_i32_0 = arith.constant 0 : i32
    return %arg0, %c0_i32 : i32, i32
  }
  func.func @transform_3(%arg0: i32, %arg1: i32) -> (i32, i32) {
    %c0_i32 = arith.constant 0 : i32
    %c0_i32_0 = arith.constant 0 : i32
    %c0_i32_1 = arith.constant 0 : i32
    return %c0_i32, %c0_i32_0 : i32, i32
  }
  func.func @transform_4(%arg0: i32, %arg1: i32) -> (i32, i32) {
    %c0_i32 = arith.constant 0 : i32
    %c0_i32_0 = arith.constant 0 : i32
    %c0_i32_1 = arith.constant 0 : i32
    return %c0_i32, %c0_i32_0 : i32, i32
  }
  func.func @transform_5(%arg0: i32, %arg1: i32) -> (i32, i32) {
    %c0_i32 = arith.constant 0 : i32
    %c0_i32_0 = arith.constant 0 : i32
    return %arg0, %c0_i32 : i32, i32
  }
}

module attributes {stable_mosaic.version = 11 : i64} {
  func.func @_gcn_layer_kernel(%arg0: i32, %arg1: i32, %arg2: memref<512x512xi8, #tpu.memory_space<vmem>>, %arg3: memref<512x128xbf16, #tpu.memory_space<vmem>>, %arg4: memref<512x1xf32, #tpu.memory_space<vmem>>, %arg5: memref<128x128xf32, #tpu.memory_space<vmem>>, %arg6: memref<1x128xf32, #tpu.memory_space<vmem>>, %arg7: memref<512x128xf32, #tpu.memory_space<vmem>>) attributes {dimension_semantics = [#tpu.dimension_semantics<parallel>, #tpu.dimension_semantics<arbitrary>], iteration_bounds = array<i64: 1, 1>, scalar_prefetch = 0 : i64, scratch_operands = 0 : i64, tpu.core_type = #tpu.core_type<tc>, window_params = [{transform_indices = @transform_0, window_bounds = array<i64: 512, 512>}, {pipeline_mode = #tpu.pipeline_mode<synchronous>, transform_indices = @transform_1, window_bounds = array<i64: 512, 128>}, {transform_indices = @transform_2, window_bounds = array<i64: 512, 1>}, {pipeline_mode = #tpu.pipeline_mode<synchronous>, transform_indices = @transform_3, window_bounds = array<i64: 128, 128>}, {pipeline_mode = #tpu.pipeline_mode<synchronous>, transform_indices = @transform_4, window_bounds = array<i64: 1, 128>}, {transform_indices = @transform_5, window_bounds = array<i64: 512, 128>}]} {
    %c0_i32 = arith.constant 0 : i32
    %0 = arith.cmpi eq, %arg1, %c0_i32 : i32
    %1 = arith.extui %0 : i1 to i32
    %c0_i32_0 = arith.constant 0 : i32
    %2 = arith.cmpi ne, %1, %c0_i32_0 : i32
    scf.if %2 {
      %cst_9 = arith.constant 0.000000e+00 : f32
      %16 = vector.broadcast %cst_9 : f32 to vector<512x128xf32>
      %c0_10 = arith.constant 0 : index
      %c0_11 = arith.constant 0 : index
      %17 = vector.load %arg7[%c0_10, %c0_11] : memref<512x128xf32, #tpu.memory_space<vmem>>, vector<512x128xf32>
      tpu.vector_store %arg7[%c0_10, %c0_11], %16 {strides = array<i32>} : memref<512x128xf32, #tpu.memory_space<vmem>>, vector<512x128xf32>,
    } else {
    }
    %c0 = arith.constant 0 : index
    %c0_1 = arith.constant 0 : index
    %3 = vector.load %arg2[%c0, %c0_1] : memref<512x512xi8, #tpu.memory_space<vmem>>, vector<512x512xi8>
    %4 = arith.sitofp %3 : vector<512x512xi8> to vector<512x512xbf16>
    %c512_i32 = arith.constant 512 : i32
    %5 = arith.muli %arg1, %c512_i32 : i32
    %6 = tpu.assume_multiple %5, 512 : i32
    %7 = arith.index_cast %6 : i32 to index
    %c0_2 = arith.constant 0 : index
    %8 = vector.load %arg3[%7, %c0_2] : memref<512x128xbf16, #tpu.memory_space<vmem>>, vector<512x128xbf16>
    %c0_3 = arith.constant 0 : index
    %c0_4 = arith.constant 0 : index
    %9 = vector.load %arg7[%c0_3, %c0_4] : memref<512x128xf32, #tpu.memory_space<vmem>>, vector<512x128xf32>
    %cst = arith.constant dense<0.000000e+00> : vector<512x128xf32>
    %10 = tpu.matmul %4, %8, %cst {dimension_numbers = #tpu.dot_dimension_numbers<[1], [0], [0], [1], [0, 0, 1, 1], [], []>} : vector<512x512xbf16>, vector<512x128xbf16>, vector<512x128xf32> -> vector<512x128xf32>
    %11 = arith.addf %9, %10 : vector<512x128xf32>
    %c0_5 = arith.constant 0 : index
    %c0_6 = arith.constant 0 : index
    %12 = vector.load %arg7[%c0_5, %c0_6] : memref<512x128xf32, #tpu.memory_space<vmem>>, vector<512x128xf32>
    tpu.vector_store %arg7[%c0_5, %c0_6], %11 {strides = array<i32>} : memref<512x128xf32, #tpu.memory_space<vmem>>, vector<512x128xf32>,
    %c0_i32_7 = arith.constant 0 : i32
    %13 = arith.cmpi eq, %arg1, %c0_i32_7 : i32
    %14 = arith.extui %13 : i1 to i32
    %c0_i32_8 = arith.constant 0 : i32
    %15 = arith.cmpi ne, %14, %c0_i32_8 : i32
    scf.if %15 {
      %c0_9 = arith.constant 0 : index
      %c0_10 = arith.constant 0 : index
      %16 = vector.load %arg7[%c0_9, %c0_10] : memref<512x128xf32, #tpu.memory_space<vmem>>, vector<512x128xf32>
      %c0_11 = arith.constant 0 : index
      %c0_12 = arith.constant 0 : index
      %17 = vector.load %arg4[%c0_11, %c0_12] : memref<512x1xf32, #tpu.memory_space<vmem>>, vector<512x1xf32>
      %18 = vector.broadcast %17 : vector<512x1xf32> to vector<512x128xf32>
      %19 = arith.mulf %16, %18 : vector<512x128xf32>
      %c0_13 = arith.constant 0 : index
      %c0_14 = arith.constant 0 : index
      %20 = vector.load %arg5[%c0_13, %c0_14] : memref<128x128xf32, #tpu.memory_space<vmem>>, vector<128x128xf32>
      %cst_15 = arith.constant dense<0.000000e+00> : vector<512x128xf32>
      %21 = tpu.matmul %19, %20, %cst_15 {dimension_numbers = #tpu.dot_dimension_numbers<[1], [0], [0], [1], [0, 0, 1, 1], [], []>} : vector<512x128xf32>, vector<128x128xf32>, vector<512x128xf32> -> vector<512x128xf32>
      %c0_16 = arith.constant 0 : index
      %c0_17 = arith.constant 0 : index
      %22 = vector.load %arg6[%c0_16, %c0_17] : memref<1x128xf32, #tpu.memory_space<vmem>>, vector<1x128xf32>
      %23 = vector.broadcast %22 : vector<1x128xf32> to vector<512x128xf32>
      %24 = arith.addf %21, %23 : vector<512x128xf32>
      %c0_18 = arith.constant 0 : index
      %c0_19 = arith.constant 0 : index
      %25 = vector.load %arg7[%c0_18, %c0_19] : memref<512x128xf32, #tpu.memory_space<vmem>>, vector<512x128xf32>
      tpu.vector_store %arg7[%c0_18, %c0_19], %24 {strides = array<i32>} : memref<512x128xf32, #tpu.memory_space<vmem>>, vector<512x128xf32>,
    } else {
    }
    return
  }
  func.func @transform_0(%arg0: i32, %arg1: i32) -> (i32, i32) {
    %c0_i32 = arith.constant 0 : i32
    return %arg0, %arg1 : i32, i32
  }
  func.func @transform_1(%arg0: i32, %arg1: i32) -> (i32, i32) {
    %c0_i32 = arith.constant 0 : i32
    %c0_i32_0 = arith.constant 0 : i32
    %c0_i32_1 = arith.constant 0 : i32
    return %c0_i32, %c0_i32_0 : i32, i32
  }
  func.func @transform_2(%arg0: i32, %arg1: i32) -> (i32, i32) {
    %c0_i32 = arith.constant 0 : i32
    %c0_i32_0 = arith.constant 0 : i32
    return %arg0, %c0_i32 : i32, i32
  }
  func.func @transform_3(%arg0: i32, %arg1: i32) -> (i32, i32) {
    %c0_i32 = arith.constant 0 : i32
    %c0_i32_0 = arith.constant 0 : i32
    %c0_i32_1 = arith.constant 0 : i32
    return %c0_i32, %c0_i32_0 : i32, i32
  }
  func.func @transform_4(%arg0: i32, %arg1: i32) -> (i32, i32) {
    %c0_i32 = arith.constant 0 : i32
    %c0_i32_0 = arith.constant 0 : i32
    %c0_i32_1 = arith.constant 0 : i32
    return %c0_i32, %c0_i32_0 : i32, i32
  }
  func.func @transform_5(%arg0: i32, %arg1: i32) -> (i32, i32) {
    %c0_i32 = arith.constant 0 : i32
    %c0_i32_0 = arith.constant 0 : i32
    return %arg0, %c0_i32 : i32, i32
  }
}

</mosaic_0001>

<bundles_post_ra>
// kernel: gnn_attribute_decoder_forward.3
= control target key start
LH: loop header
LB: loop body
LE: loop exit
PB: predicated region body
PF: predicated region fallthrough
CT: control target
= control target key end

     0   :  { %v2614_v0 = vmov 0   ;;  %s3680_s1 = inlined_call_operand.vmem [shape: bf16[512,128], index: 1, kind: input, shape index: {}]   ;;  %s3681_s0 = inlined_call_operand.vmem [shape: s8[512,512], index: 0, kind: input, shape index: {}]   ;;  %s3682_s2 = inlined_call_operand.vmem [shape: f32[512,1], index: 2, kind: input, shape index: {}]   ;;  %s3683_s3 = inlined_call_operand.vmem [shape: f32[128,128], index: 3, kind: input, shape index: {}]   ;;  %s3684_s4 = inlined_call_operand.vmem [shape: f32[1,128], index: 4, kind: input, shape index: {}]   ;;  %s3685_s5 = inlined_call_operand.vmem [shape: f32[512,128], index: 5, kind: output, shape index: {}]  }
   0x1   :  { %2546 = vmatprep.subr.bf16.mxu1 %v2614_v0  ;;  %v2582_v1 = vld [vmem:[%s3680_s1 + $0x38] sm:$0xff]   ;;  %606 = vmatprep.subr.bf16.mxu0 %v2614_v0  ;;  %v2583_v2 = vld [vmem:[%s3680_s1 + $0x30] sm:$0xff]   ;;  %v2584_v3 = vld [vmem:[%s3680_s1 + $0x28] sm:$0xff]  }
   0x2   :  { %2580 = vset.pattern.permute.xlu0 %v2614_v0  ;;  %2581 = vset.pattern.permute.xlu1 %v2614_v0  ;;  %v2585_v4 = vld [vmem:[%s3680_s1 + $0x20] sm:$0xff]   ;;  %v2586_v5 = vld [vmem:[%s3680_s1 + $0x18] sm:$0xff]   ;;  %v2675_v6 = vld [vmem:[%s3681_s0 + $0x188] sm:$0xff] }
   0x3   :  { %2562 = vmatpush1.bf16.msra.mxu1 %v2582_v1  ;;  %607 = vmatpush1.bf16.msra.mxu0 %v2582_v1  ;;  %v250_v7 = vunpack.c.l.s8.bf16 %v2675_v6  ;;  %v2587_v8 = vld [vmem:[%s3680_s1 + $0x10] sm:$0xff]   ;;  %v2588_v9 = vld [vmem:[%s3680_s1 + $0x8] sm:$0xff]   ;;  %v2589_v10 = vld [vmem:[%s3680_s1] sm:$0xff]   ;;  %v254_v25 = vunpack.c.h.s8.bf16 %v2675_v6 }
   0x4   :  { %2547 = vmatprep.subr.bf16.mxu1 %v2614_v0  ;;  %608 = vmatprep.subr.bf16.mxu0 %v2614_v0  ;;  %v2590_v11 = vld [vmem:[%s3680_s1 + $0x78] sm:$0xff]   ;;  %v2591_v12 = vld [vmem:[%s3680_s1 + $0x70] sm:$0xff]   ;;  %v90_v13 = vld [vmem:[%s3681_s0 + $0x8] sm:$0xff] }
   0x5   :  { %830 = vmatprep.mubr.bf16.mxu1 %v250_v7  ;;  %v154_v14 = vunpack.c.l.s8.bf16 %v90_v13  ;;  %v2592_v15 = vld [vmem:[%s3680_s1 + $0x68] sm:$0xff]   ;;  %v2593_v16 = vld [vmem:[%s3680_s1 + $0x60] sm:$0xff]   ;;  %v2594_v17 = vld [vmem:[%s3680_s1 + $0x58] sm:$0xff]   ;;  %v158_v27 = vunpack.c.h.s8.bf16 %v90_v13 }
   0x6   :  { %v2595_v18 = vld [vmem:[%s3680_s1 + $0x50] sm:$0xff]   ;;  %v2596_v19 = vld [vmem:[%s3680_s1 + $0x48] sm:$0xff]   ;;  %v2597_v20 = vld [vmem:[%s3680_s1 + $0x40] sm:$0xff]  }
   0x7   :  { %2563 = vmatpush1.bf16.msra.mxu1 %v2583_v2  ;;  %609 = vmatpush1.bf16.msra.mxu0 %v2583_v2  ;;  %v137_v21 = vld [vmem:[%s3681_s0 + $0x180] sm:$0xff]  ;;  %v2598_v26 = vld [vmem:[%s3680_s1 + $0xb8] sm:$0xff]   ;;  %v2599_v28 = vld [vmem:[%s3680_s1 + $0xb0] sm:$0xff]  }
   0x8   :  { %2548 = vmatprep.subr.bf16.mxu1 %v2614_v0  ;;  %610 = vmatprep.subr.bf16.mxu0 %v2614_v0  ;;  %v89_v22 = vld [vmem:[%s3681_s0] sm:$0xff]  ;;  %v249_v23 = vunpack.c.l.s8.bf16 %v137_v21  ;;  %v142_v29 = vld [vmem:[%s3681_s0 + $0x1a8] sm:$0xff]  ;;  %v253_v31 = vunpack.c.h.s8.bf16 %v137_v21  ;;  %v1381_v43 = vld [vmem:[%s3682_s2 + $0x10] sm:$0xff] }
   0x9   :  { %638 = vmatprep.mubr.bf16.mxu0 %v154_v14  ;;  %v153_v24 = vunpack.c.l.s8.bf16 %v89_v22  ;;  %v94_v30 = vld [vmem:[%s3681_s0 + $0x28] sm:$0xff]  ;;  %v157_v32 = vunpack.c.h.s8.bf16 %v89_v22  ;;  %v258_v34 = vunpack.c.l.s8.bf16 %v142_v29  ;;  %v1379_v36 = vld [vmem:[%s3682_s2] sm:$0xff]  ;;  %v2602_v44 = vld [vmem:[%s3680_s1 + $0x98] sm:$0xff]   ;;  %v262_v45 = vunpack.c.h.s8.bf16 %v142_v29  ;;  %1455 = vperm.xlu1 %2581, %v1381_v43  }
   0xa   :  { %v2600_v33 = vld [vmem:[%s3680_s1 + $0xa8] sm:$0xff]   ;;  %v162_v35 = vunpack.c.l.s8.bf16 %v94_v30  ;;  %v2601_v37 = vld [vmem:[%s3680_s1 + $0xa0] sm:$0xff]   ;;  %1445 = vperm.xlu0 %2580, %v1379_v36   ;;  %v166_v46 = vunpack.c.h.s8.bf16 %v94_v30  ;;  %v1382_v47 = vld [vmem:[%s3682_s2 + $0x18] sm:$0xff] }
   0xb   :  { %2564 = vmatpush1.bf16.msra.mxu1 %v2584_v3  ;;  %611 = vmatpush1.bf16.msra.mxu0 %v2584_v3  ;;  %v141_v38 = vld [vmem:[%s3681_s0 + $0x1a0] sm:$0xff]  ;;  %v1380_v42 = vld [vmem:[%s3682_s2 + $0x8] sm:$0xff]  ;;  %v2603_v49 = vld [vmem:[%s3680_s1 + $0x90] sm:$0xff]  }
   0xc   :  { %2549 = vmatprep.subr.bf16.mxu1 %v2614_v0  ;;  %612 = vmatprep.subr.bf16.mxu0 %v2614_v0  ;;  %v93_v39 = vld [vmem:[%s3681_s0 + $0x20] sm:$0xff]  ;;  %v257_v40 = vunpack.c.l.s8.bf16 %v141_v38  ;;  %v146_v50 = vld [vmem:[%s3681_s0 + $0x1c8] sm:$0xff]  ;;  %v261_v52 = vunpack.c.h.s8.bf16 %v141_v38  ;;  %v1385_v55 = vld [vmem:[%s3682_s2 + $0x30] sm:$0xff] }
   0xd   :  { %v161_v41 = vunpack.c.l.s8.bf16 %v93_v39  ;;  %v1383_v48 = vld [vmem:[%s3682_s2 + $0x20] sm:$0xff]  ;;  %v98_v51 = vld [vmem:[%s3681_s0 + $0x48] sm:$0xff]  ;;  %1460 = vperm.xlu1 %2581, %v1382_v47   ;;  %v165_v53 = vunpack.c.h.s8.bf16 %v93_v39  ;;  %v266_v57 = vunpack.c.l.s8.bf16 %v146_v50  ;;  %v1386_v60 = vld [vmem:[%s3682_s2 + $0x38] sm:$0xff]  ;;  %v270_v6 = vunpack.c.h.s8.bf16 %v146_v50 }
   0xe   :  { %1450 = vperm.xlu0 %2580, %v1380_v42   ;;  %v1384_v54 = vld [vmem:[%s3682_s2 + $0x28] sm:$0xff]  ;;  %v170_v58 = vunpack.c.l.s8.bf16 %v98_v51  ;;  %v2605_v59 = vld [vmem:[%s3680_s1 + $0x80] sm:$0xff]   ;;  %v174_v7 = vunpack.c.h.s8.bf16 %v98_v51  ;;  %v1394_v21 = vld [vmem:[%s3682_s2 + $0x78] sm:$0xff] }
   0xf   :  { %2565 = vmatpush1.bf16.msra.mxu1 %v2585_v4  ;;  %613 = vmatpush1.bf16.msra.mxu0 %v2585_v4  ;;  %v2604_v56 = vld [vmem:[%s3680_s1 + $0x88] sm:$0xff]   ;;  %v145_v61 = vld [vmem:[%s3681_s0 + $0x1c0] sm:$0xff]  ;;  %v1389_v4 = vld [vmem:[%s3682_s2 + $0x50] sm:$0xff] }
  0x10   :  { %2550 = vmatprep.subr.bf16.mxu1 %v2614_v0  ;;  %614 = vmatprep.subr.bf16.mxu0 %v2614_v0  ;;  %v97_v62 = vld [vmem:[%s3681_s0 + $0x40] sm:$0xff]  ;;  %v265_v1 = vunpack.c.l.s8.bf16 %v145_v61  ;;  %v1388_v3 = vld [vmem:[%s3682_s2 + $0x48] sm:$0xff]  ;;  %v269_v13 = vunpack.c.h.s8.bf16 %v145_v61  ;;  %v2610_v29 = vld [vmem:[%s3680_s1 + $0xd8] sm:$0xff]  }
  0x11   :  { %1470 = vperm.xlu1 %2581, %v1384_v54   ;;  %v1387_v63 = vld [vmem:[%s3682_s2 + $0x40] sm:$0xff]  ;;  %v169_v2 = vunpack.c.l.s8.bf16 %v97_v62  ;;  %v173_v14 = vunpack.c.h.s8.bf16 %v97_v62  ;;  %v106_v36 = vld [vmem:[%s3681_s0 + $0x88] sm:$0xff]  ;;  %v1409_v61 = vld [vmem:[%s3682_s2 + $0xf0] sm:$0xff] }
  0x12   :  { %1465 = vperm.xlu0 %2580, %v1383_v48   ;;  %v149_v22 = vld [vmem:[%s3681_s0 + $0x1e0] sm:$0xff]  ;;  %v1400_v39 = vld [vmem:[%s3682_s2 + $0xa8] sm:$0xff]  ;;  %v186_v43 = vunpack.c.l.s8.bf16 %v106_v36  ;;  %v190_v54 = vunpack.c.h.s8.bf16 %v106_v36 }
  0x13   :  { %2566 = vmatpush1.bf16.msra.mxu1 %v2586_v5  ;;  %615 = vmatpush1.bf16.msra.mxu0 %v2586_v5  ;;  %v2606_v5 = vld [vmem:[%s3680_s1 + $0xf8] sm:$0xff]   ;;  %v105_v47 = vld [vmem:[%s3681_s0 + $0x80] sm:$0xff]  ;;  %v1404_v51 = vld [vmem:[%s3682_s2 + $0xc8] sm:$0xff] }
  0x14   :  { %2551 = vmatprep.subr.bf16.mxu1 %v2614_v0  ;;  %616 = vmatprep.subr.bf16.mxu0 %v2614_v0  ;;  %v1403_v48 = vld [vmem:[%s3682_s2 + $0xc0] sm:$0xff]  ;;  %v185_v50 = vunpack.c.l.s8.bf16 %v105_v47 }
  0x15   :  { %1480 = vperm.xlu1 %2581, %v1386_v60   ;;  %v1408_v60 = vld [vmem:[%s3682_s2 + $0xe8] sm:$0xff]  ;;  %v1423_v36 = vld [vmem:[%s3682_s2 + $0x160] sm:$0xff] }
  0x16   :  { %1475 = vperm.xlu0 %2580, %v1385_v55   ;;  %v1407_v55 = vld [vmem:[%s3682_s2 + $0xe0] sm:$0xff] }
  0x17   :  { %2567 = vmatpush1.bf16.msra.mxu1 %v2587_v8  ;;  %617 = vmatpush1.bf16.msra.mxu0 %v2587_v8  ;;  %v1390_v8 = vld [vmem:[%s3682_s2 + $0x58] sm:$0xff] }
  0x18   :  { %2552 = vmatprep.subr.bf16.mxu1 %v2614_v0  ;;  %618 = vmatprep.subr.bf16.mxu0 %v2614_v0 }
  0x19   :  { %1490 = vperm.xlu1 %2581, %v1388_v3   ;;  %v95_v3 = vld [vmem:[%s3681_s0 + $0x30] sm:$0xff] }
  0x1a   :  { %1485 = vperm.xlu0 %2580, %v1387_v63  }
  0x1b   :  { %2568 = vmatpush1.bf16.msra.mxu1 %v2588_v9  ;;  %619 = vmatpush1.bf16.msra.mxu0 %v2588_v9  ;;  %v1391_v9 = vld [vmem:[%s3682_s2 + $0x60] sm:$0xff] }
  0x1c   :  { %2553 = vmatprep.subr.bf16.mxu1 %v2614_v0  ;;  %620 = vmatprep.subr.bf16.mxu0 %v2614_v0 }
  0x1d   :  { %1500 = vperm.xlu1 %2581, %v1390_v8  }
  0x1e   :  { %1495 = vperm.xlu0 %2580, %v1389_v4   ;;  %v109_v4 = vld [vmem:[%s3681_s0 + $0xa0] sm:$0xff] }
  0x1f   :  { %2569 = vmatpush1.bf16.msra.mxu1 %v2589_v10  ;;  %621 = vmatpush1.bf16.msra.mxu0 %v2589_v10  ;;  %v2607_v10 = vld [vmem:[%s3680_s1 + $0xf0] sm:$0xff]  }
  0x20   :  { %2554 = vmatprep.subr.bf16.mxu1 %v2614_v0  ;;  %622 = vmatprep.subr.bf16.mxu0 %v2614_v0 }
  0x22   :  { %1505 = vperm.xlu0 %2580, %v1391_v9  }
  0x23   :  { %2570 = vmatpush2.bf16.msra.mxu1 %v2590_v11  ;;  %623 = vmatpush2.bf16.msra.mxu0 %v2590_v11  ;;  %v150_v11 = vld [vmem:[%s3681_s0 + $0x1e8] sm:$0xff] }
  0x24   :  { %2555 = vmatprep.subr.bf16.mxu1 %v2614_v0  ;;  %624 = vmatprep.subr.bf16.mxu0 %v2614_v0  ;;  %v278_v30 = vunpack.c.h.s8.bf16 %v150_v11 }
  0x27   :  { %2571 = vmatpush2.bf16.msra.mxu1 %v2591_v12  ;;  %625 = vmatpush2.bf16.msra.mxu0 %v2591_v12  ;;  %v102_v12 = vld [vmem:[%s3681_s0 + $0x68] sm:$0xff] }
  0x28   :  { %2556 = vmatprep.subr.bf16.mxu1 %v2614_v0  ;;  %626 = vmatprep.subr.bf16.mxu0 %v2614_v0 }
  0x2b   :  { %2572 = vmatpush2.bf16.msra.mxu1 %v2592_v15  ;;  %627 = vmatpush2.bf16.msra.mxu0 %v2592_v15  ;;  %v1392_v15 = vld [vmem:[%s3682_s2 + $0x68] sm:$0xff] }
  0x2c   :  { %2557 = vmatprep.subr.bf16.mxu1 %v2614_v0  ;;  %628 = vmatprep.subr.bf16.mxu0 %v2614_v0 }
  0x2d   :  { %1510 = vperm.xlu1 %2581, %v1392_v15   ;;  %v114_v15 = vld [vmem:[%s3681_s0 + $0xc8] sm:$0xff] }
  0x2f   :  { %2573 = vmatpush2.bf16.msra.mxu1 %v2593_v16  ;;  %629 = vmatpush2.bf16.msra.mxu0 %v2593_v16  ;;  %v1393_v16 = vld [vmem:[%s3682_s2 + $0x70] sm:$0xff] }
  0x30   :  { %2558 = vmatprep.subr.bf16.mxu1 %v2614_v0  ;;  %630 = vmatprep.subr.bf16.mxu0 %v2614_v0 }
  0x31   :  { %1515 = vperm.xlu0 %2580, %v1393_v16   ;;  %1520 = vperm.xlu1 %2581, %v1394_v21   ;;  %v167_v16 = vunpack.c.h.s8.bf16 %v95_v3  ;;  %v1417_v21 = vld [vmem:[%s3682_s2 + $0x130] sm:$0xff] }
  0x33   :  { %2574 = vmatpush2.bf16.msra.mxu1 %v2594_v17  ;;  %631 = vmatpush2.bf16.msra.mxu0 %v2594_v17  ;;  %v2608_v17 = vld [vmem:[%s3680_s1 + $0xe8] sm:$0xff]  }
  0x34   :  { %2559 = vmatprep.subr.bf16.mxu1 %v2614_v0  ;;  %632 = vmatprep.subr.bf16.mxu0 %v2614_v0 }
  0x37   :  { %2575 = vmatpush2.bf16.msra.mxu1 %v2595_v18  ;;  %633 = vmatpush2.bf16.msra.mxu0 %v2595_v18  ;;  %v274_v18 = vunpack.c.l.s8.bf16 %v150_v11  ;;  %v1842_v11 = vld [vmem:[%s3683_s3 + $0x78] sm:$0xff] }
  0x38   :  { %2560 = vmatprep.subr.bf16.mxu1 %v2614_v0  ;;  %634 = vmatprep.subr.bf16.mxu0 %v2614_v0 }
  0x3b   :  { %2576 = vmatpush2.bf16.msra.mxu1 %v2596_v19  ;;  %635 = vmatpush2.bf16.msra.mxu0 %v2596_v19  ;;  %v178_v19 = vunpack.c.l.s8.bf16 %v102_v12 }
  0x3c   :  { %2561 = vmatprep.subr.bf16.mxu1 %v2614_v0  ;;  %636 = vmatprep.subr.bf16.mxu0 %v2614_v0 }
  0x3f   :  { %2577 = vmatpush2.bf16.msra.mxu1 %v2597_v20  ;;  %637 = vmatpush2.bf16.msra.mxu0 %v2597_v20  ;;  %v2609_v20 = vld [vmem:[%s3680_s1 + $0xe0] sm:$0xff]  }
  0x40   :  { %895 = vmatprep.subr.bf16.mxu1 %v2614_v0  ;;  %2418 = vmatprep.subr.mxu0 %v1842_v11 }
  0x42   :  { %831 = vmatmul.mubr.bf16.vlgmr.msra.gmra.mxu1 %v249_v23  ;;  %639 = vmatmul.mubr.bf16.vlgmr.msra.gmra.mxu0 %v153_v24  ;;  %v101_v23 = vld [vmem:[%s3681_s0 + $0x60] sm:$0xff] }
  0x43   :  { %896 = vmatpush1.bf16.msra.mxu1 %v2598_v26  ;;  %838 = vmatprep.mubr.bf16.mxu1 %v254_v25  ;;  %v1395_v24 = vld [vmem:[%s3682_s2 + $0x80] sm:$0xff]  ;;  %v273_v25 = vunpack.c.l.s8.bf16 %v149_v22  ;;  %v177_v26 = vunpack.c.l.s8.bf16 %v101_v23  ;;  %v181_v38 = vunpack.c.h.s8.bf16 %v101_v23  ;;  %v99_v23 = vld [vmem:[%s3681_s0 + $0x50] sm:$0xff] }
  0x44   :  { %897 = vmatprep.subr.bf16.mxu1 %v2614_v0  ;;  %646 = vmatprep.mubr.bf16.mxu0 %v158_v27  ;;  %v1396_v27 = vld [vmem:[%s3682_s2 + $0x88] sm:$0xff] }
  0x45   :  { %1525 = vperm.xlu0 %2580, %v1395_v24   ;;  %1530 = vperm.xlu1 %2581, %v1396_v27   ;;  %v113_v24 = vld [vmem:[%s3681_s0 + $0xc0] sm:$0xff]  ;;  %v171_v27 = vunpack.c.l.s8.bf16 %v99_v23 }
  0x46   :  { %2419 = vmatpush3.msra.mxu0 %v1842_v11 }
  0x47   :  { %898 = vmatpush1.bf16.msra.mxu1 %v2599_v28  ;;  %v1397_v28 = vld [vmem:[%s3682_s2 + $0x90] sm:$0xff] }
  0x48   :  { %899 = vmatprep.subr.bf16.mxu1 %v2614_v0 }
  0x49   :  { %1535 = vperm.xlu0 %2580, %v1397_v28   ;;  %v201_v28 = vunpack.c.l.s8.bf16 %v113_v24 }
  0x4a   :  { %839 = vmatmul.mubr.bf16.gmra.mxu1 %v253_v31  ;;  %647 = vmatmul.mubr.bf16.gmra.mxu0 %v157_v32  ;;  %v182_v31 = vunpack.c.h.s8.bf16 %v102_v12  ;;  %v1398_v32 = vld [vmem:[%s3682_s2 + $0x98] sm:$0xff] }
  0x4b   :  { %900 = vmatpush1.bf16.msra.mxu1 %v2600_v33  ;;  %846 = vmatprep.mubr.bf16.mxu1 %v258_v34  ;;  %v1399_v33 = vld [vmem:[%s3682_s2 + $0xa0] sm:$0xff]  ;;  %v2611_v34 = vld [vmem:[%s3680_s1 + $0xd0] sm:$0xff]   ;;  %v1414_v12 = vld [vmem:[%s3682_s2 + $0x118] sm:$0xff] }
  0x4c   :  { %901 = vmatprep.subr.bf16.mxu1 %v2614_v0  ;;  %654 = vmatprep.mubr.bf16.mxu0 %v162_v35  ;;  %v92_v35 = vld [vmem:[%s3681_s0 + $0x18] sm:$0xff] }
  0x4d   :  { %1540 = vperm.xlu1 %2581, %v1398_v32   ;;  %1545 = vperm.xlu0 %2580, %v1399_v33   ;;  %v156_v42 = vunpack.c.l.s8.bf16 %v92_v35  ;;  %v1421_v32 = vld [vmem:[%s3682_s2 + $0x150] sm:$0xff]  ;;  %v1422_v33 = vld [vmem:[%s3682_s2 + $0x158] sm:$0xff] }
  0x4f   :  { %902 = vmatpush1.bf16.msra.mxu1 %v2601_v37  ;;  %v277_v37 = vunpack.c.h.s8.bf16 %v149_v22  ;;  %v1418_v22 = vld [vmem:[%s3682_s2 + $0x138] sm:$0xff] }
  0x50   :  { %903 = vmatprep.subr.bf16.mxu1 %v2614_v0 }
  0x51   :  { %1550 = vperm.xlu1 %2581, %v1400_v39   ;;  %v1424_v39 = vld [vmem:[%s3682_s2 + $0x168] sm:$0xff] }
  0x52   :  { %847 = vmatmul.mubr.bf16.gmra.mxu1 %v257_v40  ;;  %655 = vmatmul.mubr.bf16.gmra.mxu0 %v161_v41  ;;  %v1401_v40 = vld [vmem:[%s3682_s2 + $0xb0] sm:$0xff]  ;;  %v2612_v41 = vld [vmem:[%s3680_s1 + $0xc8] sm:$0xff]  }
  0x53   :  { %904 = vmatpush1.bf16.msra.mxu1 %v2602_v44  ;;  %854 = vmatprep.mubr.bf16.mxu1 %v262_v45  ;;  %v2613_v44 = vld [vmem:[%s3680_s1 + $0xc0] sm:$0xff]   ;;  %v1402_v45 = vld [vmem:[%s3682_s2 + $0xb8] sm:$0xff] }
  0x54   :  { %905 = vmatprep.subr.bf16.mxu1 %v2614_v0  ;;  %662 = vmatprep.mubr.bf16.mxu0 %v166_v46  ;;  %v91_v46 = vld [vmem:[%s3681_s0 + $0x10] sm:$0xff] }
  0x55   :  { %1555 = vperm.xlu0 %2580, %v1401_v40   ;;  %1560 = vperm.xlu1 %2581, %v1402_v45   ;;  %v103_v45 = vld [vmem:[%s3681_s0 + $0x70] sm:$0xff] }
  0x57   :  { %906 = vmatpush1.bf16.msra.mxu1 %v2603_v49  ;;  %v155_v49 = vunpack.c.l.s8.bf16 %v91_v46 }
  0x58   :  { %907 = vmatprep.subr.bf16.mxu1 %v2614_v0 }
  0x59   :  { %1565 = vperm.xlu0 %2580, %v1403_v48   ;;  %1570 = vperm.xlu1 %2581, %v1404_v51   ;;  %v179_v48 = vunpack.c.l.s8.bf16 %v103_v45 }
  0x5a   :  { %855 = vmatmul.mubr.bf16.gmra.mxu1 %v261_v52  ;;  %663 = vmatmul.mubr.bf16.gmra.mxu0 %v165_v53  ;;  %v1405_v52 = vld [vmem:[%s3682_s2 + $0xd0] sm:$0xff]  ;;  %v160_v53 = vunpack.c.h.s8.bf16 %v92_v35  ;;  %v118_v35 = vld [vmem:[%s3681_s0 + $0xe8] sm:$0xff] }
  0x5b   :  { %908 = vmatpush1.bf16.msra.mxu1 %v2604_v56  ;;  %862 = vmatprep.mubr.bf16.mxu1 %v266_v57  ;;  %v96_v56 = vld [vmem:[%s3681_s0 + $0x38] sm:$0xff]  ;;  %v110_v57 = vld [vmem:[%s3681_s0 + $0xa8] sm:$0xff] }
  0x5c   :  { %909 = vmatprep.subr.bf16.mxu1 %v2614_v0  ;;  %670 = vmatprep.mubr.bf16.mxu0 %v170_v58  ;;  %v159_v58 = vunpack.c.h.s8.bf16 %v91_v46  ;;  %v164_v62 = vunpack.c.l.s8.bf16 %v96_v56  ;;  %v194_v63 = vunpack.c.l.s8.bf16 %v110_v57  ;;  %v168_v8 = vunpack.c.h.s8.bf16 %v96_v56  ;;  %v117_v46 = vld [vmem:[%s3681_s0 + $0xe0] sm:$0xff]  ;;  %v122_v56 = vld [vmem:[%s3681_s0 + $0x108] sm:$0xff] }
  0x5d   :  { %1575 = vperm.xlu0 %2580, %v1405_v52   ;;  %v198_v9 = vunpack.c.h.s8.bf16 %v110_v57  ;;  %v214_v52 = vunpack.c.h.s8.bf16 %v118_v35  ;;  %v1838_v57 = vld [vmem:[%s3683_s3 + $0x58] sm:$0xff] }
  0x5f   :  { %910 = vmatpush1.bf16.msra.mxu1 %v2605_v59  ;;  %v189_v59 = vunpack.c.h.s8.bf16 %v105_v47  ;;  %v1427_v47 = vld [vmem:[%s3682_s2 + $0x180] sm:$0xff] }
  0x60   :  { %911 = vmatprep.subr.bf16.mxu1 %v2614_v0 }
  0x61   :  { %1585 = vperm.xlu0 %2580, %v1407_v55   ;;  %v108_v55 = vld [vmem:[%s3681_s0 + $0x98] sm:$0xff] }
  0x62   :  { %863 = vmatmul.mubr.bf16.gmra.mxu1 %v265_v1  ;;  %671 = vmatmul.mubr.bf16.gmra.mxu0 %v169_v2  ;;  %v1410_v1 = vld [vmem:[%s3682_s2 + $0xf8] sm:$0xff]  ;;  %v1411_v2 = vld [vmem:[%s3682_s2 + $0x100] sm:$0xff] }
  0x63   :  { %912 = vmatpush2.bf16.msra.mxu1 %v2606_v5  ;;  %870 = vmatprep.mubr.bf16.mxu1 %v270_v6  ;;  %v163_v5 = vunpack.c.l.s8.bf16 %v95_v3  ;;  %v193_v6 = vunpack.c.l.s8.bf16 %v109_v4  ;;  %v1836_v3 = vld [vmem:[%s3683_s3 + $0x48] sm:$0xff] }
  0x64   :  { %913 = vmatprep.subr.bf16.mxu1 %v2614_v0  ;;  %678 = vmatprep.mubr.bf16.mxu0 %v174_v7  ;;  %v1412_v7 = vld [vmem:[%s3682_s2 + $0x108] sm:$0xff] }
  0x65   :  { %1595 = vperm.xlu0 %2580, %v1409_v61   ;;  %v1837_v61 = vld [vmem:[%s3683_s3 + $0x50] sm:$0xff] }
  0x67   :  { %914 = vmatpush2.bf16.msra.mxu1 %v2607_v10  ;;  %v1413_v10 = vld [vmem:[%s3682_s2 + $0x110] sm:$0xff] }
  0x68   :  { %915 = vmatprep.subr.bf16.mxu1 %v2614_v0 }
  0x69   :  { %1605 = vperm.xlu0 %2580, %v1411_v2   ;;  %v1433_v2 = vld [vmem:[%s3682_s2 + $0x1b0] sm:$0xff] }
  0x6a   :  { %871 = vmatmul.mubr.bf16.gmra.mxu1 %v269_v13  ;;  %679 = vmatmul.mubr.bf16.gmra.mxu0 %v173_v14  ;;  %v1415_v13 = vld [vmem:[%s3682_s2 + $0x120] sm:$0xff]  ;;  %v100_v14 = vld [vmem:[%s3681_s0 + $0x58] sm:$0xff] }
  0x6b   :  { %916 = vmatpush2.bf16.msra.mxu1 %v2608_v17  ;;  %878 = vmatprep.mubr.bf16.mxu1 %v274_v18  ;;  %v197_v17 = vunpack.c.h.s8.bf16 %v109_v4  ;;  %v1416_v18 = vld [vmem:[%s3682_s2 + $0x128] sm:$0xff]  ;;  %v1434_v4 = vld [vmem:[%s3682_s2 + $0x1b8] sm:$0xff] }
  0x6c   :  { %917 = vmatprep.subr.bf16.mxu1 %v2614_v0  ;;  %686 = vmatprep.mubr.bf16.mxu0 %v178_v19  ;;  %v172_v19 = vunpack.c.l.s8.bf16 %v100_v14 }
  0x6d   :  { %1615 = vperm.xlu0 %2580, %v1413_v10  }
  0x6f   :  { %918 = vmatpush2.bf16.msra.mxu1 %v2609_v20  ;;  %v202_v20 = vunpack.c.l.s8.bf16 %v114_v15 }
  0x70   :  { %919 = vmatprep.subr.bf16.mxu1 %v2614_v0 }
  0x71   :  { %1625 = vperm.xlu0 %2580, %v1415_v13   ;;  %v192_v13 = vunpack.c.h.s8.bf16 %v108_v55 }
  0x72   :  { %879 = vmatmul.mubr.bf16.gmra.mxu1 %v273_v25  ;;  %687 = vmatmul.mubr.bf16.gmra.mxu0 %v177_v26  ;;  %v1841_v25 = vld [vmem:[%s3683_s3 + $0x70] sm:$0xff]  ;;  %v1419_v26 = vld [vmem:[%s3682_s2 + $0x140] sm:$0xff] }
  0x73   :  { %920 = vmatpush2.bf16.msra.mxu1 %v2610_v29  ;;  %886 = vmatprep.mubr.bf16.mxu1 %v278_v30  ;;  %v1420_v29 = vld [vmem:[%s3682_s2 + $0x148] sm:$0xff]  ;;  %v176_v30 = vunpack.c.h.s8.bf16 %v100_v14  ;;  %v222_v14 = vunpack.c.h.s8.bf16 %v122_v56 }
  0x74   :  { %921 = vmatprep.subr.bf16.mxu1 %v2614_v0  ;;  %694 = vmatprep.mubr.bf16.mxu0 %v182_v31  ;;  %v206_v31 = vunpack.c.h.s8.bf16 %v114_v15  ;;  %v1833_v15 = vld [vmem:[%s3683_s3 + $0x30] sm:$0xff] }
  0x75   :  { %1635 = vperm.xlu0 %2580, %v1417_v21   ;;  %2420 = vmatprep.subr.mxu0 %v1841_v25  ;;  %v1831_v21 = vld [vmem:[%s3683_s3 + $0x20] sm:$0xff] }
  0x76   :  { %2421 = vmatpush3.msra.mxu0 %v1841_v25  ;;  %v1440_v25 = vld [vmem:[%s3682_s2 + $0x1e8] sm:$0xff] }
  0x77   :  { %922 = vmatpush2.bf16.msra.mxu1 %v2611_v34  ;;  %v104_v34 = vld [vmem:[%s3681_s0 + $0x78] sm:$0xff] }
  0x78   :  { %923 = vmatprep.subr.bf16.mxu1 %v2614_v0  ;;  %v180_v40 = vunpack.c.l.s8.bf16 %v104_v34  ;;  %v184_v51 = vunpack.c.h.s8.bf16 %v104_v34  ;;  %v1828_v34 = vld [vmem:[%s3683_s3 + $0x8] sm:$0xff] }
  0x79   :  { %1645 = vperm.xlu0 %2580, %v1419_v26  }
  0x7a   :  { %887 = vmatmul.mubr.bf16.gmra.mxu1 %v277_v37  ;;  %695 = vmatmul.mubr.bf16.gmra.mxu0 %v181_v38  ;;  %v175_v37 = vunpack.c.h.s8.bf16 %v99_v23  ;;  %v205_v38 = vunpack.c.h.s8.bf16 %v113_v24 }
  0x7b   :  { %924 = vmatpush2.bf16.msra.mxu1 %v2612_v41  ;;  %927 = vmatprep.mubr.bf16.mxu1 %v156_v42  ;;  %v210_v41 = vunpack.c.l.s8.bf16 %v118_v35  ;;  %v1840_v42 = vld [vmem:[%s3683_s3 + $0x68] sm:$0xff] }
  0x7c   :  { %925 = vmatprep.subr.bf16.mxu1 %v2614_v0  ;;  %702 = vmatprep.mubr.bf16.mxu0 %v186_v43  ;;  %v1406_v0 = vld [vmem:[%s3682_s2 + $0xd8] sm:$0xff]  ;;  %v1425_v43 = vld [vmem:[%s3682_s2 + $0x170] sm:$0xff] }
  0x7d   :  { %1580 = vperm.xlu1 %2581, %v1406_v0   ;;  %1655 = vperm.xlu0 %2580, %v1421_v32   ;;  %v1430_v0 = vld [vmem:[%s3682_s2 + $0x198] sm:$0xff]  ;;  %v125_v32 = vld [vmem:[%s3681_s0 + $0x120] sm:$0xff] }
  0x7e   :  { %2422 = vmatprep.subr.mxu0 %v1840_v42 }
  0x7f   :  { %926 = vmatpush2.bf16.msra.mxu1 %v2613_v44  ;;  %v1426_v44 = vld [vmem:[%s3682_s2 + $0x178] sm:$0xff]  ;;  %2423 = vmatpush3.msra.mxu0 %v1840_v42 }
  0x81   :  { %1590 = vperm.xlu1 %2581, %v1408_v60   ;;  %1665 = vperm.xlu0 %2580, %v1423_v36   ;;  %v213_v60 = vunpack.c.h.s8.bf16 %v117_v46  ;;  %v225_v36 = vunpack.c.l.s8.bf16 %v125_v32 }
  0x82   :  { %928 = vmatmul.mubr.bf16.vlgmr.msra.gmra.mxu1 %v155_v49  ;;  %703 = vmatmul.mubr.bf16.gmra.mxu0 %v185_v50  ;;  %v209_v49 = vunpack.c.l.s8.bf16 %v117_v46  ;;  %v1428_v50 = vld [vmem:[%s3682_s2 + $0x188] sm:$0xff]  ;;  %v115_v46 = vld [vmem:[%s3681_s0 + $0xd0] sm:$0xff] }
  0x83   :  { %935 = vmatprep.mubr.bf16.mxu1 %v160_v53  ;;  %710 = vmatprep.mubr.bf16.mxu0 %v190_v54  ;;  %v1429_v53 = vld [vmem:[%s3682_s2 + $0x190] sm:$0xff]  ;;  %v1839_v54 = vld [vmem:[%s3683_s3 + $0x60] sm:$0xff] }
  0x84   :  { %2424 = vmatprep.subr.mxu0 %v1839_v54 }
  0x85   :  { %1600 = vperm.xlu1 %2581, %v1410_v1   ;;  %1675 = vperm.xlu0 %2580, %v1425_v43   ;;  %v218_v1 = vunpack.c.l.s8.bf16 %v122_v56  ;;  %v229_v43 = vunpack.c.h.s8.bf16 %v125_v32  ;;  %v132_v32 = vld [vmem:[%s3681_s0 + $0x158] sm:$0xff] }
  0x86   :  { %2425 = vmatpush3.msra.mxu0 %v1839_v54  ;;  %v207_v54 = vunpack.c.h.s8.bf16 %v115_v46 }
  0x87   :  { %2426 = vmatprep.subr.mxu0 %v1838_v57 }
  0x88   :  { %2427 = vmatpush3.msra.mxu0 %v1838_v57  ;;  %v119_v57 = vld [vmem:[%s3681_s0 + $0xf0] sm:$0xff] }
  0x89   :  { %1610 = vperm.xlu1 %2581, %v1412_v7   ;;  %1685 = vperm.xlu0 %2580, %v1427_v47   ;;  %v1835_v7 = vld [vmem:[%s3683_s3 + $0x40] sm:$0xff] }
  0x8a   :  { %936 = vmatmul.mubr.bf16.gmra.mxu1 %v159_v58  ;;  %711 = vmatmul.mubr.bf16.gmra.mxu0 %v189_v59  ;;  %v1431_v58 = vld [vmem:[%s3682_s2 + $0x1a0] sm:$0xff]  ;;  %v183_v59 = vunpack.c.h.s8.bf16 %v103_v45 }
  0x8b   :  { %943 = vmatprep.mubr.bf16.mxu1 %v164_v62  ;;  %718 = vmatprep.mubr.bf16.mxu0 %v194_v63  ;;  %v1432_v62 = vld [vmem:[%s3682_s2 + $0x1a8] sm:$0xff]  ;;  %v188_v63 = vunpack.c.l.s8.bf16 %v108_v55  ;;  %v129_v47 = vld [vmem:[%s3681_s0 + $0x140] sm:$0xff] }
  0x8c   :  { %2428 = vmatprep.subr.mxu0 %v1837_v61 }
  0x8d   :  { %1620 = vperm.xlu1 %2581, %v1414_v12   ;;  %1695 = vperm.xlu0 %2580, %v1429_v53   ;;  %v1436_v12 = vld [vmem:[%s3682_s2 + $0x1c8] sm:$0xff] }
  0x8e   :  { %2429 = vmatpush3.msra.mxu0 %v1837_v61  ;;  %v134_v53 = vld [vmem:[%s3681_s0 + $0x168] sm:$0xff] }
  0x8f   :  { %2430 = vmatprep.subr.mxu0 %v1836_v3  ;;  %v242_v56 = vunpack.c.l.s8.bf16 %v134_v53 }
  0x90   :  { %2431 = vmatpush3.msra.mxu0 %v1836_v3 }
  0x91   :  { %1630 = vperm.xlu1 %2581, %v1416_v18   ;;  %1705 = vperm.xlu0 %2580, %v1431_v58   ;;  %v1832_v18 = vld [vmem:[%s3683_s3 + $0x28] sm:$0xff]  ;;  %v133_v58 = vld [vmem:[%s3681_s0 + $0x160] sm:$0xff] }
  0x92   :  { %944 = vmatmul.mubr.bf16.gmra.mxu1 %v163_v5  ;;  %719 = vmatmul.mubr.bf16.gmra.mxu0 %v193_v6  ;;  %v107_v5 = vld [vmem:[%s3681_s0 + $0x90] sm:$0xff]  ;;  %v121_v6 = vld [vmem:[%s3681_s0 + $0x100] sm:$0xff] }
  0x93   :  { %951 = vmatprep.mubr.bf16.mxu1 %v168_v8  ;;  %726 = vmatprep.mubr.bf16.mxu0 %v198_v9  ;;  %v1435_v8 = vld [vmem:[%s3682_s2 + $0x1c0] sm:$0xff]  ;;  %v1834_v9 = vld [vmem:[%s3683_s3 + $0x38] sm:$0xff]  ;;  %v187_v10 = vunpack.c.l.s8.bf16 %v107_v5  ;;  %v217_v11 = vunpack.c.l.s8.bf16 %v121_v6  ;;  %v191_v23 = vunpack.c.h.s8.bf16 %v107_v5  ;;  %v221_v24 = vunpack.c.h.s8.bf16 %v121_v6 }
  0x94   :  { %2432 = vmatprep.subr.mxu0 %v1835_v7 }
  0x95   :  { %1640 = vperm.xlu1 %2581, %v1418_v22   ;;  %1715 = vperm.xlu0 %2580, %v1433_v2   ;;  %v1439_v22 = vld [vmem:[%s3682_s2 + $0x1e0] sm:$0xff]  ;;  %v245_v2 = vunpack.c.h.s8.bf16 %v133_v58 }
  0x96   :  { %2433 = vmatpush3.msra.mxu0 %v1835_v7 }
  0x97   :  { %2434 = vmatprep.subr.mxu0 %v1834_v9 }
  0x98   :  { %2435 = vmatpush3.msra.mxu0 %v1834_v9 }
  0x99   :  { %1650 = vperm.xlu1 %2581, %v1420_v29   ;;  %1725 = vperm.xlu0 %2580, %v1435_v8   ;;  %v1441_v29 = vld [vmem:[%s3682_s2 + $0x1f0] sm:$0xff] }
  0x9a   :  { %952 = vmatmul.mubr.bf16.gmra.mxu1 %v167_v16  ;;  %727 = vmatmul.mubr.bf16.gmra.mxu0 %v197_v17  ;;  %v1437_v16 = vld [vmem:[%s3682_s2 + $0x1d0] sm:$0xff]  ;;  %v1438_v17 = vld [vmem:[%s3682_s2 + $0x1d8] sm:$0xff] }
  0x9b   :  { %959 = vmatprep.mubr.bf16.mxu1 %v172_v19  ;;  %734 = vmatprep.mubr.bf16.mxu0 %v202_v20  ;;  %v112_v19 = vld [vmem:[%s3681_s0 + $0xb8] sm:$0xff]  ;;  %v126_v20 = vld [vmem:[%s3681_s0 + $0x128] sm:$0xff] }
  0x9c   :  { %2436 = vmatprep.subr.mxu0 %v1833_v15  ;;  %v196_v26 = vunpack.c.l.s8.bf16 %v112_v19 }
  0x9d   :  { %1660 = vperm.xlu1 %2581, %v1422_v33   ;;  %1735 = vperm.xlu0 %2580, %v1437_v16   ;;  %v1829_v33 = vld [vmem:[%s3683_s3 + $0x10] sm:$0xff] }
  0x9e   :  { %2437 = vmatpush3.msra.mxu0 %v1833_v15 }
  0x9f   :  { %2438 = vmatprep.subr.mxu0 %v1832_v18 }
  0xa0   :  { %2439 = vmatpush3.msra.mxu0 %v1832_v18 }
  0xa1   :  { %1670 = vperm.xlu1 %2581, %v1424_v39   ;;  %2440 = vmatprep.subr.mxu0 %v1831_v21  ;;  %v1827_v39 = vld [vmem:[%s3683_s3] sm:$0xff] }
  0xa2   :  { %960 = vmatmul.mubr.bf16.gmra.mxu1 %v171_v27  ;;  %735 = vmatmul.mubr.bf16.gmra.mxu0 %v201_v28  ;;  %v226_v27 = vunpack.c.l.s8.bf16 %v126_v20  ;;  %v1830_v28 = vld [vmem:[%s3683_s3 + $0x18] sm:$0xff] }
  0xa3   :  { %967 = vmatprep.mubr.bf16.mxu1 %v176_v30  ;;  %742 = vmatprep.mubr.bf16.mxu0 %v206_v31  ;;  %v1442_v30 = vld [vmem:[%s3682_s2 + $0x1f8] sm:$0xff]  ;;  %v111_v31 = vld [vmem:[%s3681_s0 + $0xb0] sm:$0xff] }
  0xa4   :  { %1745 = vperm.xlu0 %2580, %v1439_v22   ;;  %2441 = vmatpush3.msra.mxu0 %v1831_v21  ;;  %v195_v35 = vunpack.c.l.s8.bf16 %v111_v31  ;;  %v199_v42 = vunpack.c.h.s8.bf16 %v111_v31 }
  0xa5   :  { %1680 = vperm.xlu1 %2581, %v1426_v44   ;;  %2442 = vmatprep.subr.mxu0 %v1830_v28 }
  0xa6   :  { %2443 = vmatpush3.msra.mxu0 %v1830_v28 }
  0xa7   :  { %2444 = vmatprep.subr.mxu0 %v1829_v33 }
  0xa8   :  { %1755 = vperm.xlu0 %2580, %v1441_v29   ;;  %2445 = vmatpush3.msra.mxu0 %v1829_v33 }
  0xa9   :  { %1690 = vperm.xlu1 %2581, %v1428_v50   ;;  %2446 = vmatprep.subr.mxu0 %v1828_v34 }
  0xaa   :  { %968 = vmatmul.mubr.bf16.gmra.mxu1 %v175_v37  ;;  %743 = vmatmul.mubr.bf16.gmra.mxu0 %v205_v38  ;;  %v200_v37 = vunpack.c.h.s8.bf16 %v112_v19  ;;  %v230_v38 = vunpack.c.h.s8.bf16 %v126_v20  ;;  %v127_v20 = vld [vmem:[%s3681_s0 + $0x130] sm:$0xff] }
  0xab   :  { %975 = vmatprep.mubr.bf16.mxu1 %v180_v40  ;;  %750 = vmatprep.mubr.bf16.mxu0 %v210_v41  ;;  %v116_v40 = vld [vmem:[%s3681_s0 + $0xd8] sm:$0xff]  ;;  %v130_v41 = vld [vmem:[%s3681_s0 + $0x148] sm:$0xff] }
  0xac   :  { %2447 = vmatpush3.msra.mxu0 %v1828_v34  ;;  %v204_v44 = vunpack.c.l.s8.bf16 %v116_v40  ;;  %v234_v45 = vunpack.c.l.s8.bf16 %v130_v41  ;;  %v208_v50 = vunpack.c.h.s8.bf16 %v116_v40 }
  0xad   :  { %1700 = vperm.xlu1 %2581, %v1430_v0   ;;  %2448 = vmatprep.subr.mxu0 %v1827_v39  ;;  %v237_v0 = vunpack.c.h.s8.bf16 %v129_v47 }
  0xae   :  { %2449 = vmatpush3.msra.mxu0 %v1827_v39 }
  0xb1   :  { %1710 = vperm.xlu1 %2581, %v1432_v62   ;;  %v246_v62 = vunpack.c.h.s8.bf16 %v134_v53 }
  0xb2   :  { %976 = vmatmul.mubr.bf16.gmra.mxu1 %v179_v48  ;;  %751 = vmatmul.mubr.bf16.gmra.mxu0 %v209_v49  ;;  %v203_v48 = vunpack.c.l.s8.bf16 %v115_v46  ;;  %v233_v49 = vunpack.c.l.s8.bf16 %v129_v47 }
  0xb3   :  { %983 = vmatprep.mubr.bf16.mxu1 %v184_v51  ;;  %758 = vmatprep.mubr.bf16.mxu0 %v214_v52  ;;  %v238_v51 = vunpack.c.h.s8.bf16 %v130_v41  ;;  %v120_v52 = vld [vmem:[%s3681_s0 + $0xf8] sm:$0xff] }
  0xb4   :  { %v212_v55 = vunpack.c.l.s8.bf16 %v120_v52  ;;  %v216_v61 = vunpack.c.h.s8.bf16 %v120_v52 }
  0xb5   :  { %1720 = vperm.xlu1 %2581, %v1434_v4   ;;  %v123_v4 = vld [vmem:[%s3681_s0 + $0x110] sm:$0xff] }
  0xb6   :  { %v219_v5 = vunpack.c.l.s8.bf16 %v123_v4 }
  0xb9   :  { %1730 = vperm.xlu1 %2581, %v1436_v12  }
  0xba   :  { %984 = vmatmul.mubr.bf16.gmra.mxu1 %v183_v59  ;;  %759 = vmatmul.mubr.bf16.gmra.mxu0 %v213_v60  ;;  %v211_v59 = vunpack.c.l.s8.bf16 %v119_v57  ;;  %v241_v60 = vunpack.c.l.s8.bf16 %v133_v58 }
  0xbb   :  { %991 = vmatprep.mubr.bf16.mxu1 %v188_v63  ;;  %766 = vmatprep.mubr.bf16.mxu0 %v218_v1  ;;  %v124_v63 = vld [vmem:[%s3681_s0 + $0x118] sm:$0xff]  ;;  %v215_v1 = vunpack.c.h.s8.bf16 %v119_v57 }
  0xbc   :  { %v220_v3 = vunpack.c.l.s8.bf16 %v124_v63  ;;  %v224_v6 = vunpack.c.h.s8.bf16 %v124_v63  ;;  %v135_v63 = vld [vmem:[%s3681_s0 + $0x170] sm:$0xff] }
  0xbd   :  { %1740 = vperm.xlu1 %2581, %v1438_v17  }
  0xc1   :  { %1750 = vperm.xlu1 %2581, %v1440_v25  }
  0xc2   :  { %992 = vmatmul.mubr.bf16.gmra.mxu1 %v187_v10  ;;  %767 = vmatmul.mubr.bf16.gmra.mxu0 %v217_v11  ;;  %v128_v10 = vld [vmem:[%s3681_s0 + $0x138] sm:$0xff] }
  0xc3   :  { %999 = vmatprep.mubr.bf16.mxu1 %v192_v13  ;;  %774 = vmatprep.mubr.bf16.mxu0 %v222_v14  ;;  %v223_v13 = vunpack.c.h.s8.bf16 %v123_v4  ;;  %v228_v15 = vunpack.c.l.s8.bf16 %v128_v10  ;;  %v243_v4 = vunpack.c.l.s8.bf16 %v135_v63 }
  0xc5   :  { %1760 = vperm.xlu1 %2581, %v1442_v30  }
  0xca   :  { %1000 = vmatmul.mubr.bf16.gmra.mxu1 %v191_v23  ;;  %775 = vmatmul.mubr.bf16.gmra.mxu0 %v221_v24  ;;  %v227_v24 = vunpack.c.l.s8.bf16 %v127_v20 }
  0xcb   :  { %1007 = vmatprep.mubr.bf16.mxu1 %v196_v26  ;;  %782 = vmatprep.mubr.bf16.mxu0 %v226_v27  ;;  %v232_v26 = vunpack.c.h.s8.bf16 %v128_v10 }
  0xd2   :  { %1008 = vmatmul.mubr.bf16.gmra.mxu1 %v195_v35  ;;  %783 = vmatmul.mubr.bf16.gmra.mxu0 %v225_v36  ;;  %v231_v35 = vunpack.c.h.s8.bf16 %v127_v20 }
  0xd3   :  { %1015 = vmatprep.mubr.bf16.mxu1 %v200_v37  ;;  %790 = vmatprep.mubr.bf16.mxu0 %v230_v38  ;;  %v236_v37 = vunpack.c.l.s8.bf16 %v132_v32 }
  0xda   :  { %1016 = vmatmul.mubr.bf16.gmra.mxu1 %v199_v42  ;;  %791 = vmatmul.mubr.bf16.gmra.mxu0 %v229_v43  ;;  %v131_v42 = vld [vmem:[%s3681_s0 + $0x150] sm:$0xff] }
  0xdb   :  { %1023 = vmatprep.mubr.bf16.mxu1 %v204_v44  ;;  %798 = vmatprep.mubr.bf16.mxu0 %v234_v45  ;;  %v235_v46 = vunpack.c.l.s8.bf16 %v131_v42 }
  0xe2   :  { %1024 = vmatmul.mubr.bf16.gmra.mxu1 %v203_v48  ;;  %799 = vmatmul.mubr.bf16.gmra.mxu0 %v233_v49  ;;  %v240_v48 = vunpack.c.h.s8.bf16 %v132_v32  ;;  %v139_v32 = vld [vmem:[%s3681_s0 + $0x190] sm:$0xff] }
  0xe3   :  { %1031 = vmatprep.mubr.bf16.mxu1 %v208_v50  ;;  %806 = vmatprep.mubr.bf16.mxu0 %v238_v51 }
  0xea   :  { %1032 = vmatmul.mubr.bf16.gmra.mxu1 %v207_v54  ;;  %807 = vmatmul.mubr.bf16.gmra.mxu0 %v237_v0  ;;  %v136_v54 = vld [vmem:[%s3681_s0 + $0x178] sm:$0xff] }
  0xeb   :  { %1039 = vmatprep.mubr.bf16.mxu1 %v212_v55  ;;  %814 = vmatprep.mubr.bf16.mxu0 %v242_v56  ;;  %v239_v56 = vunpack.c.h.s8.bf16 %v131_v42  ;;  %v244_v58 = vunpack.c.l.s8.bf16 %v136_v54 }
  0xf2   :  { %1040 = vmatmul.mubr.bf16.gmra.mxu1 %v211_v59  ;;  %815 = vmatmul.mubr.bf16.gmra.mxu0 %v241_v60 }
  0xf3   :  { %1047 = vmatprep.mubr.bf16.mxu1 %v216_v61  ;;  %822 = vmatprep.mubr.bf16.mxu0 %v246_v62 }
  0xfa   :  { %1048 = vmatmul.mubr.bf16.gmra.mxu1 %v215_v1  ;;  %823 = vmatmul.mubr.bf16.gmra.mxu0 %v245_v2 }
  0xfb   :  { %1055 = vmatprep.mubr.bf16.mxu1 %v220_v3 }
 0x102   :  { %v3185_v7 = vpop.f32.mrf.mxu1  ;;  %1056 = vmatmul.mubr.bf16.gmra.mxu1 %v219_v5  ;;  %v3187_v8 = vpop.f32.mrf.mxu0 }
 0x103   :  { %1063 = vmatprep.mubr.bf16.mxu1 %v224_v6  ;;  %v248_v6 = vunpack.c.h.s8.bf16 %v136_v54  ;;  %v144_v54 = vld [vmem:[%s3681_s0 + $0x1b8] sm:$0xff] }
 0x104   :  { %v834_v9 = vpop.f32.mrf.mxu1  ;;  %v642_v11 = vpop.f32.mrf.mxu0 }
 0x106   :  { %v3192_v12 = vpop.f32.mrf.mxu1  ;;  %v3194_v14 = vpop.f32.mrf.mxu0 }
 0x108   :  { %v837_v16 = vpop.f32.mrf.mxu1  ;;  %v645_v17 = vpop.f32.mrf.mxu0 }
 0x109   :  { %v140_v16 = vld [vmem:[%s3681_s0 + $0x198] sm:$0xff] }
 0x10a   :  { %v3196_v18 = vpop.f32.mrf.mxu1  ;;  %1064 = vmatmul.mubr.bf16.gmra.mxu1 %v223_v13  ;;  %v3198_v19 = vpop.f32.mrf.mxu0  ;;  %v256_v42 = vunpack.c.h.s8.bf16 %v140_v16 }
 0x10b   :  { %1071 = vmatprep.mubr.bf16.mxu1 %v228_v15 }
 0x10c   :  { %v842_v21 = vpop.f32.mrf.mxu1  ;;  %v650_v22 = vpop.f32.mrf.mxu0 }
 0x10d   :  { %v247_v21 = vunpack.c.h.s8.bf16 %v135_v63 }
 0x10e   :  { %v3203_v23 = vpop.f32.mrf.mxu1  ;;  %v3205_v25 = vpop.f32.mrf.mxu0 }
 0x110   :  { %v845_v27 = vpop.f32.mrf.mxu1  ;;  %v653_v28 = vpop.f32.mrf.mxu0 }
 0x112   :  { %v3207_v29 = vpop.f32.mrf.mxu1  ;;  %1072 = vmatmul.mubr.bf16.gmra.mxu1 %v227_v24  ;;  %v3209_v30 = vpop.f32.mrf.mxu0  ;;  %v252_v24 = vunpack.c.l.s8.bf16 %v140_v16  ;;  %v143_v16 = vld [vmem:[%s3681_s0 + $0x1b0] sm:$0xff] }
 0x113   :  { %1079 = vmatprep.mubr.bf16.mxu1 %v232_v26 }
 0x114   :  { %v850_v31 = vpop.f32.mrf.mxu1  ;;  %v658_v33 = vpop.f32.mrf.mxu0 }
 0x116   :  { %v3214_v34 = vpop.f32.mrf.mxu1  ;;  %v3216_v36 = vpop.f32.mrf.mxu0 }
 0x118   :  { %v853_v38 = vpop.f32.mrf.mxu1  ;;  %v661_v39 = vpop.f32.mrf.mxu0 }
 0x119   :  { %v251_v38 = vunpack.c.l.s8.bf16 %v139_v32 }
 0x11a   :  { %v3218_v40 = vpop.f32.mrf.mxu1  ;;  %1080 = vmatmul.mubr.bf16.gmra.mxu1 %v231_v35  ;;  %v3220_v41 = vpop.f32.mrf.mxu0 }
 0x11b   :  { %1087 = vmatprep.mubr.bf16.mxu1 %v236_v37 }
 0x11c   :  { %v858_v43 = vpop.f32.mrf.mxu1  ;;  %v666_v44 = vpop.f32.mrf.mxu0 }
 0x11e   :  { %v3225_v45 = vpop.f32.mrf.mxu1  ;;  %v3227_v47 = vpop.f32.mrf.mxu0 }
 0x120   :  { %v861_v49 = vpop.f32.mrf.mxu1  ;;  %v669_v50 = vpop.f32.mrf.mxu0 }
 0x122   :  { %v3229_v51 = vpop.f32.mrf.mxu1  ;;  %1088 = vmatmul.mubr.bf16.gmra.mxu1 %v235_v46  ;;  %v3231_v52 = vpop.f32.mrf.mxu0 }
 0x123   :  { %1095 = vmatprep.mubr.bf16.mxu1 %v240_v48  ;;  %v1446_v46 = vpop.permute.xlu0 %1445 }
 0x124   :  { %v866_v53 = vpop.f32.mrf.mxu1  ;;  %v674_v0 = vpop.f32.mrf.mxu0 }
 0x126   :  { %v3236_v55 = vpop.f32.mrf.mxu1  ;;  %v3238_v57 = vpop.f32.mrf.mxu0 }
 0x128   :  { %v869_v59 = vpop.f32.mrf.mxu1  ;;  %v677_v60 = vpop.f32.mrf.mxu0 }
 0x12a   :  { %v3240_v61 = vpop.f32.mrf.mxu1  ;;  %1096 = vmatmul.mubr.bf16.gmra.mxu1 %v239_v56  ;;  %v3242_v62 = vpop.f32.mrf.mxu0 }
 0x12b   :  { %1103 = vmatprep.mubr.bf16.mxu1 %v244_v58  ;;  %v255_v58 = vunpack.c.h.s8.bf16 %v139_v32 }
 0x12c   :  { %v874_v1 = vpop.f32.mrf.mxu1  ;;  %v682_v2 = vpop.f32.mrf.mxu0 }
 0x12d   :  { %v260_v1 = vunpack.c.l.s8.bf16 %v144_v54  ;;  %v1451_v2 = vpop.permute.xlu0 %1450 }
 0x12e   :  { %v3247_v3 = vpop.f32.mrf.mxu1  ;;  %v3249_v5 = vpop.f32.mrf.mxu0 }
 0x130   :  { %v877_v9 = vpop.f32.mrf.mxu1  ;;  %v685_v10 = vpop.f32.mrf.mxu0 }
 0x132   :  { %v3251_v11 = vpop.f32.mrf.mxu1  ;;  %1104 = vmatmul.mubr.bf16.gmra.mxu1 %v243_v4  ;;  %v3253_v13 = vpop.f32.mrf.mxu0 }
 0x133   :  { %1111 = vmatprep.mubr.bf16.mxu1 %v248_v6 }
 0x134   :  { %v882_v15 = vpop.f32.mrf.mxu1  ;;  %v690_v17 = vpop.f32.mrf.mxu0 }
 0x135   :  { %v1456_v17 = vpop.permute.xlu1 %1455 }
 0x136   :  { %v3258_v20 = vpop.f32.mrf.mxu1  ;;  %v3260_v22 = vpop.f32.mrf.mxu0 }
 0x138   :  { %v885_v26 = vpop.f32.mrf.mxu1  ;;  %v693_v27 = vpop.f32.mrf.mxu0 }
 0x139   :  { %v259_v26 = vunpack.c.l.s8.bf16 %v143_v16 }
 0x13a   :  { %v3262_v28 = vpop.f32.mrf.mxu1  ;;  %1112 = vmatmul.mubr.bf16.gmra.mxu1 %v247_v21  ;;  %v3264_v31 = vpop.f32.mrf.mxu0 }
 0x13b   :  { %1119 = vmatprep.mubr.bf16.mxu1 %v252_v24 }
 0x13c   :  { %v890_v33 = vpop.f32.mrf.mxu1  ;;  %v698_v35 = vpop.f32.mrf.mxu0 }
 0x13d   :  { %v264_v35 = vunpack.c.h.s8.bf16 %v144_v54 }
 0x13e   :  { %v3269_v37 = vpop.f32.mrf.mxu1  ;;  %v3271_v39 = vpop.f32.mrf.mxu0 }
 0x140   :  { %v893_v43 = vpop.f32.mrf.mxu1  ;;  %v701_v44 = vpop.f32.mrf.mxu0 }
 0x142   :  { %v929_v48 = vpop.f32.mrf.mxu1  ;;  %1120 = vmatmul.mubr.bf16.gmra.mxu1 %v251_v38  ;;  %v3273_v49 = vpop.f32.mrf.mxu0 }
 0x143   :  { %v930_v50 = vadd.f32 %v929_v48, %v3187_v8  ;;  %1127 = vmatprep.mubr.bf16.mxu1 %v256_v42  ;;  %v1461_v42 = vpop.permute.xlu1 %1460 }
 0x144   :  { %v931_v53 = vpop.f32.mrf.mxu1  ;;  %v706_v0 = vpop.f32.mrf.mxu0 }
 0x145   :  { %v1763_v63 = vmul.f32 %v1446_v46, %v930_v50  ;;  %v148_v53 = vld [vmem:[%s3681_s0 + $0x1d8] sm:$0xff]  ;;  %v1466_v0 = vpop.permute.xlu0 %1465 }
 0x146   :  { %v932_v56 = vpop.f32.mrf.mxu1  ;;  %v3279_v59 = vpop.f32.mrf.mxu0 }
 0x147   :  { %v933_v60 = vadd.f32 %v932_v56, %v3194_v14  ;;  %2450 = vmatprep.mubr.f32.mxu0 %v1763_v63  ;;  %v263_v56 = vunpack.c.h.s8.bf16 %v143_v16  ;;  %v147_v16 = vld [vmem:[%s3681_s0 + $0x1d0] sm:$0xff] }
 0x148   :  { %v934_v4 = vpop.f32.mrf.mxu1  ;;  %v709_v6 = vpop.f32.mrf.mxu0 }
 0x149   :  { %v1764_v15 = vmul.f32 %v1451_v2, %v933_v60  ;;  %v1471_v4 = vpop.permute.xlu1 %1470 }
 0x14a   :  { %v937_v8 = vpop.f32.mrf.mxu1  ;;  %1128 = vmatmul.mubr.bf16.gmra.mxu1 %v255_v58  ;;  %v3282_v9 = vpop.f32.mrf.mxu0 }
 0x14b   :  { %v938_v10 = vadd.f32 %v937_v8, %v3198_v19  ;;  %1135 = vmatprep.mubr.bf16.mxu1 %v260_v1  ;;  %2451 = vmatmul.mubr.f32.vlgmr.msra.gmra.mxu0 %v1764_v15  ;;  %v268_v1 = vunpack.c.l.s8.bf16 %v148_v53 }
 0x14c   :  { %v939_v14 = vpop.f32.mrf.mxu1  ;;  %v714_v21 = vpop.f32.mrf.mxu0 }
 0x14d   :  { %v1765_v33 = vmul.f32 %v1456_v17, %v938_v10  ;;  %v1476_v14 = vpop.permute.xlu0 %1475 }
 0x14e   :  { %v940_v24 = vpop.f32.mrf.mxu1  ;;  %v3288_v27 = vpop.f32.mrf.mxu0 }
 0x14f   :  { %v941_v32 = vadd.f32 %v940_v24, %v3205_v25  ;;  %2453 = vmatprep.mubr.f32.mxu0 %v1765_v33  ;;  %v267_v24 = vunpack.c.l.s8.bf16 %v147_v16 }
 0x150   :  { %v942_v38 = vpop.f32.mrf.mxu1  ;;  %v717_v19 = vpop.f32.mrf.mxu0 }
 0x151   :  { %v1766_v48 = vmul.f32 %v1461_v42, %v941_v32  ;;  %v1481_v19 = vpop.permute.xlu1 %1480 }
 0x152   :  { %v945_v43 = vpop.f32.mrf.mxu1  ;;  %1136 = vmatmul.mubr.bf16.gmra.mxu1 %v259_v26  ;;  %v3291_v44 = vpop.f32.mrf.mxu0 }
 0x153   :  { %v946_v46 = vadd.f32 %v945_v43, %v3209_v30  ;;  %1143 = vmatprep.mubr.bf16.mxu1 %v264_v35  ;;  %2454 = vmatmul.mubr.f32.gmra.mxu0 %v1766_v48  ;;  %v272_v35 = vunpack.c.h.s8.bf16 %v148_v53 }
 0x154   :  { %v947_v50 = vpop.f32.mrf.mxu1  ;;  %v722_v25 = vpop.f32.mrf.mxu0 }
 0x155   :  { %v1767_v63 = vmul.f32 %v1466_v0, %v946_v46  ;;  %v152_v25 = vld [vmem:[%s3681_s0 + $0x1f8] sm:$0xff] }
 0x156   :  { %v948_v54 = vpop.f32.mrf.mxu1  ;;  %v3297_v58 = vpop.f32.mrf.mxu0 }
 0x157   :  { %v949_v60 = vadd.f32 %v948_v54, %v3216_v36  ;;  %2456 = vmatprep.mubr.f32.mxu0 %v1767_v63  ;;  %v271_v54 = vunpack.c.h.s8.bf16 %v147_v16  ;;  %v276_v63 = vunpack.c.l.s8.bf16 %v152_v25 }
 0x158   :  { %v950_v2 = vpop.f32.mrf.mxu1  ;;  %v725_v30 = vpop.f32.mrf.mxu0 }
 0x159   :  { %v1768_v15 = vmul.f32 %v1471_v4, %v949_v60 }
 0x15a   :  { %v953_v6 = vpop.f32.mrf.mxu1  ;;  %1144 = vmatmul.mubr.bf16.gmra.mxu1 %v263_v56  ;;  %v3300_v8 = vpop.f32.mrf.mxu0 }
 0x15b   :  { %v954_v10 = vadd.f32 %v953_v6, %v3220_v41  ;;  %1151 = vmatprep.mubr.bf16.mxu1 %v268_v1  ;;  %2457 = vmatmul.mubr.f32.gmra.mxu0 %v1768_v15  ;;  %v151_v15 = vld [vmem:[%s3681_s0 + $0x1f0] sm:$0xff] }
 0x15c   :  { %v955_v17 = vpop.f32.mrf.mxu1  ;;  %v730_v36 = vpop.f32.mrf.mxu0 }
 0x15d   :  { %v1769_v32 = vmul.f32 %v1476_v14, %v954_v10 }
 0x15e   :  { %v956_v21 = vpop.f32.mrf.mxu1  ;;  %v3306_v26 = vpop.f32.mrf.mxu0 }
 0x15f   :  { %v957_v33 = vadd.f32 %v956_v21, %v3227_v47  ;;  %2459 = vmatprep.mubr.f32.mxu0 %v1769_v32  ;;  %v1486_v47 = vpop.permute.xlu0 %1485  ;;  %v275_v21 = vunpack.c.l.s8.bf16 %v151_v15 }
 0x160   :  { %v958_v38 = vpop.f32.mrf.mxu1  ;;  %v733_v41 = vpop.f32.mrf.mxu0 }
 0x161   :  { %v1770_v46 = vmul.f32 %v1481_v19, %v957_v33  ;;  %v280_v33 = vunpack.c.h.s8.bf16 %v152_v25 }
 0x162   :  { %v961_v42 = vpop.f32.mrf.mxu1  ;;  %1152 = vmatmul.mubr.bf16.gmra.mxu1 %v267_v24  ;;  %v3309_v43 = vpop.f32.mrf.mxu0 }
 0x163   :  { %v962_v48 = vadd.f32 %v961_v42, %v3231_v52  ;;  %1159 = vmatprep.mubr.bf16.mxu1 %v272_v35  ;;  %2460 = vmatmul.mubr.f32.gmra.mxu0 %v1770_v46  ;;  %v1491_v52 = vpop.permute.xlu1 %1490  ;;  %v1496_v36 = vpop.permute.xlu0 %1495 }
 0x164   :  { %v963_v50 = vpop.f32.mrf.mxu1  ;;  %v738_v0 = vpop.f32.mrf.mxu0 }
 0x165   :  { %v1771_v1 = vmul.f32 %v1486_v47, %v962_v48 }
 0x166   :  { %v964_v53 = vpop.f32.mrf.mxu1  ;;  %v3315_v56 = vpop.f32.mrf.mxu0 }
 0x167   :  { %v965_v60 = vadd.f32 %v964_v53, %v3238_v57  ;;  %2462 = vmatprep.mubr.f32.mxu0 %v1771_v1  ;;  %v1501_v41 = vpop.permute.xlu1 %1500  ;;  %v1506_v47 = vpop.permute.xlu0 %1505 }
 0x168   :  { %v966_v2 = vpop.f32.mrf.mxu1  ;;  %v741_v30 = vpop.f32.mrf.mxu0 }
 0x169   :  { %v1772_v16 = vmul.f32 %v1491_v52, %v965_v60 }
 0x16a   :  { %v969_v4 = vpop.f32.mrf.mxu1  ;;  %1160 = vmatmul.mubr.bf16.gmra.mxu1 %v271_v54  ;;  %v3318_v6 = vpop.f32.mrf.mxu0 }
 0x16b   :  { %v970_v10 = vadd.f32 %v969_v4, %v3242_v62  ;;  %1167 = vmatprep.mubr.bf16.mxu1 %v276_v63  ;;  %2463 = vmatmul.mubr.f32.gmra.mxu0 %v1772_v16  ;;  %v1511_v2 = vpop.permute.xlu1 %1510 }
 0x16c   :  { %v971_v17 = vpop.f32.mrf.mxu1  ;;  %v746_v57 = vpop.f32.mrf.mxu0 }
 0x16d   :  { %v1773_v35 = vmul.f32 %v1496_v36, %v970_v10  ;;  %v1516_v17 = vpop.permute.xlu0 %1515 }
 0x16e   :  { %v972_v14 = vpop.f32.mrf.mxu1  ;;  %v3324_v24 = vpop.f32.mrf.mxu0 }
 0x16f   :  { %v973_v32 = vadd.f32 %v972_v14, %v3249_v5  ;;  %2465 = vmatprep.mubr.f32.mxu0 %v1773_v35  ;;  %v279_v5 = vunpack.c.h.s8.bf16 %v151_v15 }
 0x170   :  { %v974_v38 = vpop.f32.mrf.mxu1  ;;  %v749_v62 = vpop.f32.mrf.mxu0 }
 0x171   :  { %v1774_v48 = vmul.f32 %v1501_v41, %v973_v32  ;;  %v1521_v32 = vpop.permute.xlu1 %1520 }
 0x172   :  { %v977_v19 = vpop.f32.mrf.mxu1  ;;  %1168 = vmatmul.mubr.bf16.gmra.mxu1 %v275_v21  ;;  %v3327_v42 = vpop.f32.mrf.mxu0 }
 0x173   :  { %v978_v46 = vadd.f32 %v977_v19, %v3253_v13  ;;  %1175 = vmatprep.mubr.bf16.mxu1 %v280_v33  ;;  %2466 = vmatmul.mubr.f32.gmra.mxu0 %v1774_v48  ;;  %v1526_v19 = vpop.permute.xlu0 %1525 }
 0x174   :  { %v979_v50 = vpop.f32.mrf.mxu1  ;;  %v754_v0 = vpop.f32.mrf.mxu0 }
 0x175   :  { %v1775_v60 = vmul.f32 %v1506_v47, %v978_v46 }
 0x176   :  { %v980_v53 = vpop.f32.mrf.mxu1  ;;  %v3330_v25 = vpop.f32.mrf.mxu0 }
 0x177   :  { %v981_v54 = vadd.f32 %v980_v53, %v3260_v22  ;;  %2468 = vmatprep.mubr.f32.mxu0 %v1775_v60  ;;  %v1531_v53 = vpop.permute.xlu1 %1530 }
 0x178   :  { %v982_v63 = vpop.f32.mrf.mxu1  ;;  %v757_v1 = vpop.f32.mrf.mxu0 }
 0x179   :  { %v1776_v4 = vmul.f32 %v1511_v2, %v981_v54  ;;  %v1536_v2 = vpop.permute.xlu0 %1535 }
 0x17a   :  { %v985_v30 = vpop.f32.mrf.mxu1  ;;  %1176 = vmatmul.mubr.bf16.gmra.mxu1 %v279_v5  ;;  %v3333_v13 = vpop.f32.mrf.mxu0 }
 0x17b   :  { %v986_v52 = vadd.f32 %v985_v30, %v3264_v31  ;;  %2469 = vmatmul.mubr.f32.gmra.mxu0 %v1776_v4 }
 0x17c   :  { %v987_v10 = vpop.f32.mrf.mxu1  ;;  %v762_v16 = vpop.f32.mrf.mxu0 }
 0x17d   :  { %v1777_v36 = vmul.f32 %v1516_v17, %v986_v52  ;;  %v1541_v17 = vpop.permute.xlu1 %1540 }
 0x17e   :  { %v988_v15 = vpop.f32.mrf.mxu1  ;;  %v3336_v57 = vpop.f32.mrf.mxu0 }
 0x17f   :  { %v989_v22 = vadd.f32 %v988_v15, %v3271_v39  ;;  %2471 = vmatprep.mubr.f32.mxu0 %v1777_v36 }
 0x180   :  { %v990_v14 = vpop.f32.mrf.mxu1  ;;  %v765_v21 = vpop.f32.mrf.mxu0 }
 0x181   :  { %v1778_v38 = vmul.f32 %v1521_v32, %v989_v22  ;;  %v1546_v32 = vpop.permute.xlu0 %1545 }
 0x182   :  { %v993_v33 = vpop.f32.mrf.mxu1  ;;  %v3339_v35 = vpop.f32.mrf.mxu0 }
 0x183   :  { %v994_v31 = vadd.f32 %v993_v33, %v3273_v49  ;;  %2472 = vmatmul.mubr.f32.gmra.mxu0 %v1778_v38 }
 0x184   :  { %v995_v62 = vpop.f32.mrf.mxu1  ;;  %v770_v41 = vpop.f32.mrf.mxu0 }
 0x185   :  { %v1779_v50 = vmul.f32 %v1526_v19, %v994_v31  ;;  %v1551_v19 = vpop.permute.xlu1 %1550 }
 0x186   :  { %v996_v46 = vpop.f32.mrf.mxu1  ;;  %v3342_v48 = vpop.f32.mrf.mxu0 }
 0x187   :  { %v997_v39 = vadd.f32 %v996_v46, %v3279_v59  ;;  %2474 = vmatprep.mubr.f32.mxu0 %v1779_v50 }
 0x188   :  { %v998_v0 = vpop.f32.mrf.mxu1  ;;  %v773_v47 = vpop.f32.mrf.mxu0 }
 0x189   :  { %v1780_v60 = vmul.f32 %v1531_v53, %v997_v39  ;;  %v1556_v53 = vpop.permute.xlu0 %1555 }
 0x18a   :  { %v1001_v5 = vpop.f32.mrf.mxu1  ;;  %v3345_v54 = vpop.f32.mrf.mxu0 }
 0x18b   :  { %v1002_v49 = vadd.f32 %v1001_v5, %v3282_v9  ;;  %2475 = vmatmul.mubr.f32.gmra.mxu0 %v1780_v60 }
 0x18c   :  { %v1003_v63 = vpop.f32.mrf.mxu1  ;;  %v778_v1 = vpop.f32.mrf.mxu0 }
 0x18d   :  { %v1781_v4 = vmul.f32 %v1536_v2, %v1002_v49  ;;  %v1561_v2 = vpop.permute.xlu1 %1560 }
 0x18e   :  { %v1004_v30 = vpop.f32.mrf.mxu1  ;;  %v3348_v52 = vpop.f32.mrf.mxu0 }
 0x18f   :  { %v1005_v59 = vadd.f32 %v1004_v30, %v3288_v27  ;;  %2477 = vmatprep.mubr.f32.mxu0 %v1781_v4 }
 0x190   :  { %v1006_v10 = vpop.f32.mrf.mxu1  ;;  %v781_v16 = vpop.f32.mrf.mxu0 }
 0x191   :  { %v1782_v36 = vmul.f32 %v1541_v17, %v1005_v59  ;;  %v1566_v17 = vpop.permute.xlu0 %1565 }
 0x192   :  { %v1009_v15 = vpop.f32.mrf.mxu1  ;;  %v3351_v22 = vpop.f32.mrf.mxu0 }
 0x193   :  { %v1010_v9 = vadd.f32 %v1009_v15, %v3291_v44  ;;  %2478 = vmatmul.mubr.f32.gmra.mxu0 %v1782_v36 }
 0x194   :  { %v1011_v14 = vpop.f32.mrf.mxu1  ;;  %v786_v21 = vpop.f32.mrf.mxu0 }
 0x195   :  { %v1783_v38 = vmul.f32 %v1546_v32, %v1010_v9  ;;  %v1571_v32 = vpop.permute.xlu1 %1570 }
 0x196   :  { %v1012_v33 = vpop.f32.mrf.mxu1  ;;  %v3354_v31 = vpop.f32.mrf.mxu0 }
 0x197   :  { %v1013_v27 = vadd.f32 %v1012_v33, %v3297_v58  ;;  %2480 = vmatprep.mubr.f32.mxu0 %v1783_v38 }
 0x198   :  { %v1014_v62 = vpop.f32.mrf.mxu1  ;;  %v789_v41 = vpop.f32.mrf.mxu0 }
 0x199   :  { %v1784_v50 = vmul.f32 %v1551_v19, %v1013_v27  ;;  %v1576_v19 = vpop.permute.xlu0 %1575 }
 0x19a   :  { %v1017_v46 = vpop.f32.mrf.mxu1  ;;  %v3357_v39 = vpop.f32.mrf.mxu0 }
 0x19b   :  { %v1018_v44 = vadd.f32 %v1017_v46, %v3300_v8  ;;  %2481 = vmatmul.mubr.f32.gmra.mxu0 %v1784_v50 }
 0x19c   :  { %v1019_v0 = vpop.f32.mrf.mxu1  ;;  %v794_v47 = vpop.f32.mrf.mxu0 }
 0x19d   :  { %v1785_v60 = vmul.f32 %v1556_v53, %v1018_v44  ;;  %v1581_v53 = vpop.permute.xlu1 %1580 }
 0x19e   :  { %v1020_v5 = vpop.f32.mrf.mxu1  ;;  %v3360_v49 = vpop.f32.mrf.mxu0 }
 0x19f   :  { %v1021_v58 = vadd.f32 %v1020_v5, %v3306_v26  ;;  %2483 = vmatprep.mubr.f32.mxu0 %v1785_v60 }
 0x1a0   :  { %v1022_v63 = vpop.f32.mrf.mxu1  ;;  %v797_v1 = vpop.f32.mrf.mxu0 }
 0x1a1   :  { %v1786_v4 = vmul.f32 %v1561_v2, %v1021_v58  ;;  %v1586_v2 = vpop.permute.xlu0 %1585 }
 0x1a2   :  { %v1025_v30 = vpop.f32.mrf.mxu1  ;;  %v3363_v59 = vpop.f32.mrf.mxu0 }
 0x1a3   :  { %v1026_v8 = vadd.f32 %v1025_v30, %v3309_v43  ;;  %2484 = vmatmul.mubr.f32.gmra.mxu0 %v1786_v4 }
 0x1a4   :  { %v1027_v10 = vpop.f32.mrf.mxu1  ;;  %v802_v16 = vpop.f32.mrf.mxu0 }
 0x1a5   :  { %v1787_v36 = vmul.f32 %v1566_v17, %v1026_v8  ;;  %v1591_v17 = vpop.permute.xlu1 %1590 }
 0x1a6   :  { %v1028_v15 = vpop.f32.mrf.mxu1  ;;  %v3366_v9 = vpop.f32.mrf.mxu0 }
 0x1a7   :  { %v1029_v26 = vadd.f32 %v1028_v15, %v3315_v56  ;;  %2486 = vmatprep.mubr.f32.mxu0 %v1787_v36 }
 0x1a8   :  { %v1030_v14 = vpop.f32.mrf.mxu1  ;;  %v805_v21 = vpop.f32.mrf.mxu0 }
 0x1a9   :  { %v1788_v38 = vmul.f32 %v1571_v32, %v1029_v26  ;;  %v1596_v32 = vpop.permute.xlu0 %1595 }
 0x1aa   :  { %v1033_v33 = vpop.f32.mrf.mxu1  ;;  %v3369_v27 = vpop.f32.mrf.mxu0 }
 0x1ab   :  { %v1034_v43 = vadd.f32 %v1033_v33, %v3318_v6  ;;  %2487 = vmatmul.mubr.f32.gmra.mxu0 %v1788_v38 }
 0x1ac   :  { %v1035_v62 = vpop.f32.mrf.mxu1  ;;  %v810_v41 = vpop.f32.mrf.mxu0 }
 0x1ad   :  { %v1789_v50 = vmul.f32 %v1576_v19, %v1034_v43  ;;  %v1601_v19 = vpop.permute.xlu1 %1600 }
 0x1ae   :  { %v1036_v46 = vpop.f32.mrf.mxu1  ;;  %v3372_v44 = vpop.f32.mrf.mxu0 }
 0x1af   :  { %v1037_v56 = vadd.f32 %v1036_v46, %v3324_v24  ;;  %2489 = vmatprep.mubr.f32.mxu0 %v1789_v50 }
 0x1b0   :  { %v1038_v0 = vpop.f32.mrf.mxu1  ;;  %v813_v47 = vpop.f32.mrf.mxu0 }
 0x1b1   :  { %v1790_v60 = vmul.f32 %v1581_v53, %v1037_v56  ;;  %v1606_v0 = vpop.permute.xlu0 %1605 }
 0x1b2   :  { %v1041_v5 = vpop.f32.mrf.mxu1  ;;  %v3375_v58 = vpop.f32.mrf.mxu0 }
 0x1b3   :  { %v1042_v6 = vadd.f32 %v1041_v5, %v3327_v42  ;;  %2490 = vmatmul.mubr.f32.gmra.mxu0 %v1790_v60  ;;  %v1611_v60 = vpop.permute.xlu1 %1610 }
 0x1b4   :  { %v1043_v63 = vpop.f32.mrf.mxu1  ;;  %v818_v1 = vpop.f32.mrf.mxu0 }
 0x1b5   :  { %v1791_v4 = vmul.f32 %v1586_v2, %v1042_v6 }
 0x1b6   :  { %v1044_v30 = vpop.f32.mrf.mxu1  ;;  %v3378_v8 = vpop.f32.mrf.mxu0 }
 0x1b7   :  { %v1045_v24 = vadd.f32 %v1044_v30, %v3330_v25  ;;  %2492 = vmatprep.mubr.f32.mxu0 %v1791_v4  ;;  %v1616_v30 = vpop.permute.xlu0 %1615 }
 0x1b8   :  { %v1046_v10 = vpop.f32.mrf.mxu1  ;;  %v821_v16 = vpop.f32.mrf.mxu0 }
 0x1b9   :  { %v1792_v36 = vmul.f32 %v1591_v17, %v1045_v24  ;;  %v1621_v16 = vpop.permute.xlu1 %1620 }
 0x1ba   :  { %v1049_v15 = vpop.f32.mrf.mxu1  ;;  %v3381_v26 = vpop.f32.mrf.mxu0 }
 0x1bb   :  { %v1050_v42 = vadd.f32 %v1049_v15, %v3333_v13  ;;  %2493 = vmatmul.mubr.f32.gmra.mxu0 %v1792_v36  ;;  %v1626_v36 = vpop.permute.xlu0 %1625 }
 0x1bc   :  { %v1051_v14 = vpop.f32.mrf.mxu1  ;;  %v826_v21 = vpop.f32.mrf.mxu0 }
 0x1bd   :  { %v1793_v38 = vmul.f32 %v1596_v32, %v1050_v42 }
 0x1be   :  { %v1052_v33 = vpop.f32.mrf.mxu1  ;;  %v3384_v43 = vpop.f32.mrf.mxu0 }
 0x1bf   :  { %v1053_v25 = vadd.f32 %v1052_v33, %v3336_v57  ;;  %2495 = vmatprep.mubr.f32.mxu0 %v1793_v38  ;;  %v1631_v33 = vpop.permute.xlu1 %1630 }
 0x1c0   :  { %v1054_v62 = vpop.f32.mrf.mxu1  ;;  %v829_v41 = vpop.f32.mrf.mxu0 }
 0x1c1   :  { %v1794_v50 = vmul.f32 %v1601_v19, %v1053_v25  ;;  %v1636_v41 = vpop.permute.xlu0 %1635 }
 0x1c2   :  { %v1057_v46 = vpop.f32.mrf.mxu1 }
 0x1c3   :  { %v1058_v56 = vadd.f32 %v1057_v46, %v3339_v35  ;;  %2496 = vmatmul.mubr.f32.gmra.mxu0 %v1794_v50  ;;  %v1641_v50 = vpop.permute.xlu1 %1640 }
 0x1c4   :  { %v1059_v13 = vpop.f32.mrf.mxu1 }
 0x1c5   :  { %v1795_v5 = vmul.f32 %v1606_v0, %v1058_v56 }
 0x1c6   :  { %v1060_v47 = vpop.f32.mrf.mxu1 }
 0x1c7   :  { %v1061_v53 = vadd.f32 %v1060_v47, %v3342_v48  ;;  %2498 = vmatprep.mubr.f32.mxu0 %v1795_v5 }
 0x1c8   :  { %v1062_v6 = vpop.f32.mrf.mxu1 }
 0x1c9   :  { %v1796_v1 = vmul.f32 %v1611_v60, %v1061_v53  ;;  %v1646_v53 = vpop.permute.xlu0 %1645 }
 0x1ca   :  { %v1065_v57 = vpop.f32.mrf.mxu1 }
 0x1cb   :  { %v1066_v63 = vadd.f32 %v1065_v57, %v3345_v54  ;;  %2499 = vmatmul.mubr.f32.gmra.mxu0 %v1796_v1  ;;  %v1651_v57 = vpop.permute.xlu1 %1650 }
 0x1cc   :  { %v1067_v2 = vpop.f32.mrf.mxu1 }
 0x1cd   :  { %v1797_v4 = vmul.f32 %v1616_v30, %v1066_v63  ;;  %v1656_v30 = vpop.permute.xlu0 %1655 }
 0x1ce   :  { %v1068_v24 = vpop.f32.mrf.mxu1 }
 0x1cf   :  { %v1069_v35 = vadd.f32 %v1068_v24, %v3348_v52  ;;  %2501 = vmatprep.mubr.f32.mxu0 %v1797_v4 }
 0x1d0   :  { %v1070_v10 = vpop.f32.mrf.mxu1 }
 0x1d1   :  { %v1798_v15 = vmul.f32 %v1621_v16, %v1069_v35  ;;  %v1661_v10 = vpop.permute.xlu1 %1660 }
 0x1d2   :  { %v1073_v17 = vpop.f32.mrf.mxu1 }
 0x1d3   :  { %v1074_v48 = vadd.f32 %v1073_v17, %v3351_v22  ;;  %2502 = vmatmul.mubr.f32.gmra.mxu0 %v1798_v15  ;;  %v1666_v15 = vpop.permute.xlu0 %1665 }
 0x1d4   :  { %v1075_v42 = vpop.f32.mrf.mxu1 }
 0x1d5   :  { %v1799_v21 = vmul.f32 %v1626_v36, %v1074_v48 }
 0x1d6   :  { %v1076_v14 = vpop.f32.mrf.mxu1 }
 0x1d7   :  { %v1077_v54 = vadd.f32 %v1076_v14, %v3354_v31  ;;  %2504 = vmatprep.mubr.f32.mxu0 %v1799_v21 }
 0x1d8   :  { %v1078_v32 = vpop.f32.mrf.mxu1 }
 0x1d9   :  { %v1800_v38 = vmul.f32 %v1631_v33, %v1077_v54  ;;  %v1671_v54 = vpop.permute.xlu1 %1670 }
 0x1da   :  { %v1081_v25 = vpop.f32.mrf.mxu1 }
 0x1db   :  { %v1082_v52 = vadd.f32 %v1081_v25, %v3357_v39  ;;  %2505 = vmatmul.mubr.f32.gmra.mxu0 %v1800_v38  ;;  %v1676_v25 = vpop.permute.xlu0 %1675 }
 0x1dc   :  { %v1083_v62 = vpop.f32.mrf.mxu1 }
 0x1dd   :  { %v1801_v46 = vmul.f32 %v1636_v41, %v1082_v52  ;;  %v1681_v41 = vpop.permute.xlu1 %1680 }
 0x1de   :  { %v1084_v19 = vpop.f32.mrf.mxu1 }
 0x1df   :  { %v1085_v22 = vadd.f32 %v1084_v19, %v3360_v49  ;;  %2507 = vmatprep.mubr.f32.mxu0 %v1801_v46 }
 0x1e0   :  { %v1086_v56 = vpop.f32.mrf.mxu1 }
 0x1e1   :  { %v1802_v0 = vmul.f32 %v1641_v50, %v1085_v22  ;;  %v1686_v56 = vpop.permute.xlu0 %1685 }
 0x1e2   :  { %v1089_v13 = vpop.f32.mrf.mxu1 }
 0x1e3   :  { %v1090_v31 = vadd.f32 %v1089_v13, %v3363_v59  ;;  %2508 = vmatmul.mubr.f32.gmra.mxu0 %v1802_v0  ;;  %v1691_v0 = vpop.permute.xlu1 %1690 }
 0x1e4   :  { %v1091_v47 = vpop.f32.mrf.mxu1 }
 0x1e5   :  { %v1803_v6 = vmul.f32 %v1646_v53, %v1090_v31  ;;  %v3409_v53 = vld [vmem:[%s3684_s4] ss:$0 sm:$0xff] }
 0x1e6   :  { %v1092_v5 = vpop.f32.mrf.mxu1 }
 0x1e7   :  { %v1093_v39 = vadd.f32 %v1092_v5, %v3366_v9  ;;  %2510 = vmatprep.mubr.f32.mxu0 %v1803_v6  ;;  %v1696_v6 = vpop.permute.xlu0 %1695 }
 0x1e8   :  { %v1094_v60 = vpop.f32.mrf.mxu1 }
 0x1e9   :  { %v1804_v1 = vmul.f32 %v1651_v57, %v1093_v39 }
 0x1ea   :  { %v1097_v63 = vpop.f32.mrf.mxu1 }
 0x1eb   :  { %v1098_v49 = vadd.f32 %v1097_v63, %v3369_v27  ;;  %2511 = vmatmul.mubr.f32.gmra.mxu0 %v1804_v1 }
 0x1ec   :  { %v1099_v2 = vpop.f32.mrf.mxu1 }
 0x1ed   :  { %v1805_v35 = vmul.f32 %v1656_v30, %v1098_v49  ;;  %v1701_v2 = vpop.permute.xlu1 %1700 }
 0x1ee   :  { %v1100_v24 = vpop.f32.mrf.mxu1 }
 0x1ef   :  { %v1101_v59 = vadd.f32 %v1100_v24, %v3372_v44  ;;  %2513 = vmatprep.mubr.f32.mxu0 %v1805_v35 }
 0x1f0   :  { %v1102_v4 = vpop.f32.mrf.mxu1 }
 0x1f1   :  { %v1806_v17 = vmul.f32 %v1661_v10, %v1101_v59  ;;  %v1706_v4 = vpop.permute.xlu0 %1705 }
 0x1f2   :  { %v1105_v16 = vpop.f32.mrf.mxu1 }
 0x1f3   :  { %v1106_v9 = vadd.f32 %v1105_v16, %v3375_v58  ;;  %2514 = vmatmul.mubr.f32.gmra.mxu0 %v1806_v17 }
 0x1f4   :  { %v1107_v48 = vpop.f32.mrf.mxu1 }
 0x1f5   :  { %v1807_v36 = vmul.f32 %v1666_v15, %v1106_v9 }
 0x1f6   :  { %v1108_v42 = vpop.f32.mrf.mxu1 }
 0x1f7   :  { %v1109_v27 = vadd.f32 %v1108_v42, %v3378_v8  ;;  %2516 = vmatprep.mubr.f32.mxu0 %v1807_v36 }
 0x1f8   :  { %v1110_v14 = vpop.f32.mrf.mxu1 }
 0x1f9   :  { %v1808_v32 = vmul.f32 %v1671_v54, %v1109_v27 }
 0x1fa   :  { %v1113_v21 = vpop.f32.mrf.mxu1 }
 0x1fb   :  { %v1114_v44 = vadd.f32 %v1113_v21, %v3381_v26  ;;  %2517 = vmatmul.mubr.f32.gmra.mxu0 %v1808_v32  ;;  %v1716_v21 = vpop.permute.xlu0 %1715 }
 0x1fc   :  { %v1115_v33 = vpop.f32.mrf.mxu1 }
 0x1fd   :  { %v1809_v38 = vmul.f32 %v1676_v25, %v1114_v44 }
 0x1fe   :  { %v1116_v52 = vpop.f32.mrf.mxu1 }
 0x1ff   :  { %v1117_v58 = vadd.f32 %v1116_v52, %v3384_v43  ;;  %2519 = vmatprep.mubr.f32.mxu0 %v1809_v38 }
 0x200   :  { %v1118_v62 = vpop.f32.mrf.mxu1 }
 0x201   :  { %v1810_v22 = vmul.f32 %v1681_v41, %v1117_v58 }
 0x202   :  { %v1121_v19 = vpop.f32.mrf.mxu1 }
 0x203   :  { %v1122_v8 = vadd.f32 %v1121_v19, %v3185_v7  ;;  %2520 = vmatmul.mubr.f32.gmra.mxu0 %v1810_v22  ;;  %v1726_v22 = vpop.permute.xlu0 %1725 }
 0x204   :  { %v1123_v46 = vpop.f32.mrf.mxu1 }
 0x205   :  { %v1811_v13 = vmul.f32 %v1686_v56, %v1122_v8 }
 0x206   :  { %v1124_v50 = vpop.f32.mrf.mxu1 }
 0x207   :  { %v1125_v26 = vadd.f32 %v1124_v50, %v3192_v12  ;;  %2522 = vmatprep.mubr.f32.mxu0 %v1811_v13 }
 0x208   :  { %v1126_v31 = vpop.f32.mrf.mxu1 }
 0x209   :  { %v1812_v7 = vmul.f32 %v1691_v0, %v1125_v26 }
 0x20a   :  { %v1129_v47 = vpop.f32.mrf.mxu1 }
 0x20b   :  { %v1130_v43 = vadd.f32 %v1129_v47, %v3196_v18  ;;  %v2452_v39 = vpop.f32.mrf.mxu0  ;;  %2523 = vmatmul.mubr.f32.gmra.mxu0 %v1812_v7 }
 0x20c   :  { %v1131_v5 = vpop.f32.mrf.mxu1  ;;  %v1922_v12 = vadd.f32 %v2452_v39, %v3409_v53  ;;  %v1736_v39 = vpop.permute.xlu0 %1735 }
 0x20d   :  { %v1916_v63 = vpop.f32.mrf.mxu0  ;;  %v1813_v49 = vmul.f32 %v1696_v6, %v1130_v43 }
 0x20e   :  { %v1132_v60 = vpop.f32.mrf.mxu1  ;;  %2236 = vst [vmem:[%s3685_s5 + $0x8] sm:$0xff] %v1922_v12  ;;  %v1917_v18 = vadd.f32 %v3409_v53, %v1916_v63 }
 0x20f   :  { %v1133_v57 = vadd.f32 %v1132_v60, %v3203_v23  ;;  %2525 = vmatprep.mubr.f32.mxu0 %v1813_v49 }
 0x210   :  { %v1134_v1 = vpop.f32.mrf.mxu1  ;;  %2235 = vst [vmem:[%s3685_s5] sm:$0xff] %v1917_v18 }
 0x211   :  { %v1814_v59 = vmul.f32 %v1701_v2, %v1133_v57 }
 0x212   :  { %v1137_v30 = vpop.f32.mrf.mxu1 }
 0x213   :  { %v1138_v24 = vadd.f32 %v1137_v30, %v3207_v29  ;;  %v2455_v35 = vpop.f32.mrf.mxu0  ;;  %2526 = vmatmul.mubr.f32.gmra.mxu0 %v1814_v59  ;;  %v1711_v29 = vpop.permute.xlu1 %1710 }
 0x214   :  { %v1139_v23 = vpop.f32.mrf.mxu1  ;;  %v1932_v16 = vadd.f32 %v2455_v35, %v3409_v53  ;;  %v1746_v59 = vpop.permute.xlu0 %1745 }
 0x215   :  { %v1926_v17 = vpop.f32.mrf.mxu0  ;;  %v1815_v48 = vmul.f32 %v1706_v4, %v1138_v24 }
 0x216   :  { %v1140_v10 = vpop.f32.mrf.mxu1  ;;  %2238 = vst [vmem:[%s3685_s5 + $0x18] sm:$0xff] %v1932_v16  ;;  %v1927_v42 = vadd.f32 %v3409_v53, %v1926_v17 }
 0x217   :  { %v1141_v9 = vadd.f32 %v1140_v10, %v3214_v34  ;;  %2528 = vmatprep.mubr.f32.mxu0 %v1815_v48 }
 0x218   :  { %v1142_v15 = vpop.f32.mrf.mxu1  ;;  %2237 = vst [vmem:[%s3685_s5 + $0x10] sm:$0xff] %v1927_v42 }
 0x219   :  { %v1816_v14 = vmul.f32 %v1711_v29, %v1141_v9 }
 0x21a   :  { %v1145_v27 = vpop.f32.mrf.mxu1 }
 0x21b   :  { %v1146_v36 = vadd.f32 %v1145_v27, %v3218_v40  ;;  %v2458_v54 = vpop.f32.mrf.mxu0  ;;  %2529 = vmatmul.mubr.f32.gmra.mxu0 %v1816_v14  ;;  %v1721_v40 = vpop.permute.xlu1 %1720 }
 0x21c   :  { %v1147_v34 = vpop.f32.mrf.mxu1  ;;  %v1942_v32 = vadd.f32 %v2458_v54, %v3409_v53  ;;  %v1756_v27 = vpop.permute.xlu0 %1755 }
 0x21d   :  { %v1936_v25 = vpop.f32.mrf.mxu0  ;;  %v1817_v52 = vmul.f32 %v1716_v21, %v1146_v36 }
 0x21e   :  { %v1148_v44 = vpop.f32.mrf.mxu1  ;;  %2240 = vst [vmem:[%s3685_s5 + $0x28] sm:$0xff] %v1942_v32  ;;  %v1937_v38 = vadd.f32 %v3409_v53, %v1936_v25 }
 0x21f   :  { %v1149_v33 = vadd.f32 %v1148_v44, %v3225_v45  ;;  %2531 = vmatprep.mubr.f32.mxu0 %v1817_v52 }
 0x220   :  { %v1150_v58 = vpop.f32.mrf.mxu1  ;;  %2239 = vst [vmem:[%s3685_s5 + $0x20] sm:$0xff] %v1937_v38 }
 0x221   :  { %v1818_v19 = vmul.f32 %v1721_v40, %v1149_v33 }
 0x222   :  { %v1153_v62 = vpop.f32.mrf.mxu1 }
 0x223   :  { %v1154_v41 = vadd.f32 %v1153_v62, %v3229_v51  ;;  %v2461_v8 = vpop.f32.mrf.mxu0  ;;  %2532 = vmatmul.mubr.f32.gmra.mxu0 %v1818_v19  ;;  %v1731_v51 = vpop.permute.xlu1 %1730 }
 0x224   :  { %v1155_v45 = vpop.f32.mrf.mxu1  ;;  %v1952_v56 = vadd.f32 %v2461_v8, %v3409_v53 }
 0x225   :  { %v1946_v26 = vpop.f32.mrf.mxu0  ;;  %v1819_v13 = vmul.f32 %v1726_v22, %v1154_v41 }
 0x226   :  { %v1156_v46 = vpop.f32.mrf.mxu1  ;;  %2242 = vst [vmem:[%s3685_s5 + $0x38] sm:$0xff] %v1952_v56  ;;  %v1947_v0 = vadd.f32 %v3409_v53, %v1946_v26 }
 0x227   :  { %v1157_v50 = vadd.f32 %v1156_v46, %v3236_v55  ;;  %2534 = vmatprep.mubr.f32.mxu0 %v1819_v13 }
 0x228   :  { %v1158_v31 = vpop.f32.mrf.mxu1  ;;  %2241 = vst [vmem:[%s3685_s5 + $0x30] sm:$0xff] %v1947_v0 }
 0x229   :  { %v1820_v7 = vmul.f32 %v1731_v51, %v1157_v50 }
 0x22a   :  { %v1161_v47 = vpop.f32.mrf.mxu1 }
 0x22b   :  { %v1162_v43 = vadd.f32 %v1161_v47, %v3240_v61  ;;  %v2464_v5 = vpop.f32.mrf.mxu0  ;;  %2535 = vmatmul.mubr.f32.gmra.mxu0 %v1820_v7  ;;  %v1741_v61 = vpop.permute.xlu1 %1740 }
 0x22c   :  { %v1163_v55 = vpop.f32.mrf.mxu1  ;;  %v1962_v60 = vadd.f32 %v2464_v5, %v3409_v53 }
 0x22d   :  { %v1956_v57 = vpop.f32.mrf.mxu0  ;;  %v1821_v63 = vmul.f32 %v1736_v39, %v1162_v43 }
 0x22e   :  { %v1164_v6 = vpop.f32.mrf.mxu1  ;;  %2244 = vst [vmem:[%s3685_s5 + $0x48] sm:$0xff] %v1962_v60  ;;  %v1957_v1 = vadd.f32 %v3409_v53, %v1956_v57 }
 0x22f   :  { %v1165_v12 = vadd.f32 %v1164_v6, %v3247_v3  ;;  %2537 = vmatprep.mubr.f32.mxu0 %v1821_v63 }
 0x230   :  { %v1166_v49 = vpop.f32.mrf.mxu1  ;;  %2243 = vst [vmem:[%s3685_s5 + $0x40] sm:$0xff] %v1957_v1 }
 0x231   :  { %v1822_v30 = vmul.f32 %v1741_v61, %v1165_v12 }
 0x232   :  { %v1169_v18 = vpop.f32.mrf.mxu1 }
 0x233   :  { %v1170_v2 = vadd.f32 %v1169_v18, %v3251_v11  ;;  %v2467_v24 = vpop.f32.mrf.mxu0  ;;  %2538 = vmatmul.mubr.f32.gmra.mxu0 %v1822_v30  ;;  %v1751_v11 = vpop.permute.xlu1 %1750 }
 0x234   :  { %v1171_v3 = vpop.f32.mrf.mxu1  ;;  %v1972_v35 = vadd.f32 %v2467_v24, %v3409_v53 }
 0x235   :  { %v1966_v10 = vpop.f32.mrf.mxu0  ;;  %v1823_v16 = vmul.f32 %v1746_v59, %v1170_v2 }
 0x236   :  { %v1172_v23 = vpop.f32.mrf.mxu1  ;;  %2246 = vst [vmem:[%s3685_s5 + $0x58] sm:$0xff] %v1972_v35  ;;  %v1967_v17 = vadd.f32 %v3409_v53, %v1966_v10 }
 0x237   :  { %v1173_v4 = vadd.f32 %v1172_v23, %v3258_v20  ;;  %2540 = vmatprep.mubr.f32.mxu0 %v1823_v16 }
 0x238   :  { %v1174_v9 = vpop.f32.mrf.mxu1  ;;  %2245 = vst [vmem:[%s3685_s5 + $0x50] sm:$0xff] %v1967_v17 }
 0x239   :  { %v1824_v42 = vmul.f32 %v1751_v11, %v1173_v4 }
 0x23a   :  { %v1177_v48 = vpop.f32.mrf.mxu1 }
 0x23b   :  { %v1178_v15 = vadd.f32 %v1177_v48, %v3262_v28  ;;  %v2470_v29 = vpop.f32.mrf.mxu0  ;;  %2541 = vmatmul.mubr.f32.gmra.mxu0 %v1824_v42  ;;  %v1761_v28 = vpop.permute.xlu1 %1760 }
 0x23c   :  { %v1179_v20 = vpop.f32.mrf.mxu1  ;;  %v1982_v14 = vadd.f32 %v2470_v29, %v3409_v53 }
 0x23d   :  { %v1976_v54 = vpop.f32.mrf.mxu0  ;;  %v1825_v21 = vmul.f32 %v1756_v27, %v1178_v15 }
 0x23e   :  { %v1180_v36 = vpop.f32.mrf.mxu1  ;;  %2248 = vst [vmem:[%s3685_s5 + $0x68] sm:$0xff] %v1982_v14  ;;  %v1977_v32 = vadd.f32 %v3409_v53, %v1976_v54 }
 0x23f   :  { %v1181_v34 = vadd.f32 %v1180_v36, %v3269_v37  ;;  %2543 = vmatprep.mubr.f32.mxu0 %v1825_v21 }
 0x240   :  { %v1182_v44 = vpop.f32.mrf.mxu1  ;;  %2247 = vst [vmem:[%s3685_s5 + $0x60] sm:$0xff] %v1977_v32 }
 0x241   :  { %v1826_v33 = vmul.f32 %v1761_v28, %v1181_v34 }
 0x243   :  { %v2473_v25 = vpop.f32.mrf.mxu0  ;;  %2544 = vmatmul.mubr.f32.gmra.mxu0 %v1826_v33 }
 0x244   :  { %v1992_v37 = vadd.f32 %v2473_v25, %v3409_v53 }
 0x245   :  { %v1986_v52 = vpop.f32.mrf.mxu0 }
 0x246   :  { %2250 = vst [vmem:[%s3685_s5 + $0x78] sm:$0xff] %v1992_v37  ;;  %v1987_v58 = vadd.f32 %v3409_v53, %v1986_v52 }
 0x248   :  { %2249 = vst [vmem:[%s3685_s5 + $0x70] sm:$0xff] %v1987_v58 }
 0x24b   :  { %v2476_v38 = vpop.f32.mrf.mxu0 }
 0x24c   :  { %v2002_v40 = vadd.f32 %v2476_v38, %v3409_v53 }
 0x24d   :  { %v1996_v62 = vpop.f32.mrf.mxu0 }
 0x24e   :  { %2252 = vst [vmem:[%s3685_s5 + $0x88] sm:$0xff] %v2002_v40  ;;  %v1997_v41 = vadd.f32 %v3409_v53, %v1996_v62 }
 0x250   :  { %2251 = vst [vmem:[%s3685_s5 + $0x80] sm:$0xff] %v1997_v41 }
 0x253   :  { %v2479_v19 = vpop.f32.mrf.mxu0 }
 0x254   :  { %v2012_v45 = vadd.f32 %v2479_v19, %v3409_v53 }
 0x255   :  { %v2006_v8 = vpop.f32.mrf.mxu0 }
 0x256   :  { %2254 = vst [vmem:[%s3685_s5 + $0x98] sm:$0xff] %v2012_v45  ;;  %v2007_v22 = vadd.f32 %v3409_v53, %v2006_v8 }
 0x258   :  { %2253 = vst [vmem:[%s3685_s5 + $0x90] sm:$0xff] %v2007_v22 }
 0x25b   :  { %v2482_v46 = vpop.f32.mrf.mxu0 }
 0x25c   :  { %v2022_v56 = vadd.f32 %v2482_v46, %v3409_v53 }
 0x25d   :  { %v2016_v50 = vpop.f32.mrf.mxu0 }
 0x25e   :  { %2256 = vst [vmem:[%s3685_s5 + $0xa8] sm:$0xff] %v2022_v56  ;;  %v2017_v26 = vadd.f32 %v3409_v53, %v2016_v50 }
 0x260   :  { %2255 = vst [vmem:[%s3685_s5 + $0xa0] sm:$0xff] %v2017_v26 }
 0x263   :  { %v2485_v13 = vpop.f32.mrf.mxu0 }
 0x264   :  { %v2032_v31 = vadd.f32 %v2485_v13, %v3409_v53 }
 0x265   :  { %v2026_v0 = vpop.f32.mrf.mxu0 }
 0x266   :  { %2258 = vst [vmem:[%s3685_s5 + $0xb8] sm:$0xff] %v2032_v31  ;;  %v2027_v51 = vadd.f32 %v3409_v53, %v2026_v0 }
 0x268   :  { %2257 = vst [vmem:[%s3685_s5 + $0xb0] sm:$0xff] %v2027_v51 }
 0x26b   :  { %v2488_v47 = vpop.f32.mrf.mxu0 }
 0x26c   :  { %v2042_v43 = vadd.f32 %v2488_v47, %v3409_v53 }
 0x26d   :  { %v2036_v7 = vpop.f32.mrf.mxu0 }
 0x26e   :  { %2260 = vst [vmem:[%s3685_s5 + $0xc8] sm:$0xff] %v2042_v43  ;;  %v2037_v55 = vadd.f32 %v3409_v53, %v2036_v7 }
 0x270   :  { %2259 = vst [vmem:[%s3685_s5 + $0xc0] sm:$0xff] %v2037_v55 }
 0x273   :  { %v2491_v5 = vpop.f32.mrf.mxu0 }
 0x274   :  { %v2052_v39 = vadd.f32 %v2491_v5, %v3409_v53 }
 0x275   :  { %v2046_v6 = vpop.f32.mrf.mxu0 }
 0x276   :  { %2262 = vst [vmem:[%s3685_s5 + $0xd8] sm:$0xff] %v2052_v39  ;;  %v2047_v60 = vadd.f32 %v3409_v53, %v2046_v6 }
 0x278   :  { %2261 = vst [vmem:[%s3685_s5 + $0xd0] sm:$0xff] %v2047_v60 }
 0x27b   :  { %v2494_v12 = vpop.f32.mrf.mxu0 }
 0x27c   :  { %v2062_v57 = vadd.f32 %v2494_v12, %v3409_v53 }
 0x27d   :  { %v2056_v63 = vpop.f32.mrf.mxu0 }
 0x27e   :  { %2264 = vst [vmem:[%s3685_s5 + $0xe8] sm:$0xff] %v2062_v57  ;;  %v2057_v49 = vadd.f32 %v3409_v53, %v2056_v63 }
 0x280   :  { %2263 = vst [vmem:[%s3685_s5 + $0xe0] sm:$0xff] %v2057_v49 }
 0x283   :  { %v2497_v1 = vpop.f32.mrf.mxu0 }
 0x284   :  { %v2072_v61 = vadd.f32 %v2497_v1, %v3409_v53 }
 0x285   :  { %v2066_v18 = vpop.f32.mrf.mxu0 }
 0x286   :  { %2266 = vst [vmem:[%s3685_s5 + $0xf8] sm:$0xff] %v2072_v61  ;;  %v2067_v2 = vadd.f32 %v3409_v53, %v2066_v18 }
 0x288   :  { %2265 = vst [vmem:[%s3685_s5 + $0xf0] sm:$0xff] %v2067_v2 }
 0x28b   :  { %v2500_v30 = vpop.f32.mrf.mxu0 }
 0x28c   :  { %v2082_v3 = vadd.f32 %v2500_v30, %v3409_v53 }
 0x28d   :  { %v2076_v24 = vpop.f32.mrf.mxu0 }
 0x28e   :  { %2268 = vst [vmem:[%s3685_s5 + $0x108] sm:$0xff] %v2082_v3  ;;  %v2077_v59 = vadd.f32 %v3409_v53, %v2076_v24 }
 0x290   :  { %2267 = vst [vmem:[%s3685_s5 + $0x100] sm:$0xff] %v2077_v59 }
 0x293   :  { %v2503_v23 = vpop.f32.mrf.mxu0 }
 0x294   :  { %v2092_v35 = vadd.f32 %v2503_v23, %v3409_v53 }
 0x295   :  { %v2086_v4 = vpop.f32.mrf.mxu0 }
 0x296   :  { %2270 = vst [vmem:[%s3685_s5 + $0x118] sm:$0xff] %v2092_v35  ;;  %v2087_v10 = vadd.f32 %v3409_v53, %v2086_v4 }
 0x298   :  { %2269 = vst [vmem:[%s3685_s5 + $0x110] sm:$0xff] %v2087_v10 }
 0x29b   :  { %v2506_v16 = vpop.f32.mrf.mxu0 }
 0x29c   :  { %v2102_v9 = vadd.f32 %v2506_v16, %v3409_v53 }
 0x29d   :  { %v2096_v17 = vpop.f32.mrf.mxu0 }
 0x29e   :  { %2272 = vst [vmem:[%s3685_s5 + $0x128] sm:$0xff] %v2102_v9  ;;  %v2097_v11 = vadd.f32 %v3409_v53, %v2096_v17 }
 0x2a0   :  { %2271 = vst [vmem:[%s3685_s5 + $0x120] sm:$0xff] %v2097_v11 }
 0x2a3   :  { %v2509_v48 = vpop.f32.mrf.mxu0 }
 0x2a4   :  { %v2112_v15 = vadd.f32 %v2509_v48, %v3409_v53 }
 0x2a5   :  { %v2106_v42 = vpop.f32.mrf.mxu0 }
 0x2a6   :  { %2274 = vst [vmem:[%s3685_s5 + $0x138] sm:$0xff] %v2112_v15  ;;  %v2107_v20 = vadd.f32 %v3409_v53, %v2106_v42 }
 0x2a8   :  { %2273 = vst [vmem:[%s3685_s5 + $0x130] sm:$0xff] %v2107_v20 }
 0x2ab   :  { %v2512_v29 = vpop.f32.mrf.mxu0 }
 0x2ac   :  { %v2122_v27 = vadd.f32 %v2512_v29, %v3409_v53 }
 0x2ad   :  { %v2116_v36 = vpop.f32.mrf.mxu0 }
 0x2ae   :  { %2276 = vst [vmem:[%s3685_s5 + $0x148] sm:$0xff] %v2122_v27  ;;  %v2117_v14 = vadd.f32 %v3409_v53, %v2116_v36 }
 0x2b0   :  { %2275 = vst [vmem:[%s3685_s5 + $0x140] sm:$0xff] %v2117_v14 }
 0x2b3   :  { %v2515_v34 = vpop.f32.mrf.mxu0 }
 0x2b4   :  { %v2132_v54 = vadd.f32 %v2515_v34, %v3409_v53 }
 0x2b5   :  { %v2126_v21 = vpop.f32.mrf.mxu0 }
 0x2b6   :  { %2278 = vst [vmem:[%s3685_s5 + $0x158] sm:$0xff] %v2132_v54  ;;  %v2127_v44 = vadd.f32 %v3409_v53, %v2126_v21 }
 0x2b8   :  { %2277 = vst [vmem:[%s3685_s5 + $0x150] sm:$0xff] %v2127_v44 }
 0x2bb   :  { %v2518_v32 = vpop.f32.mrf.mxu0 }
 0x2bc   :  { %v2142_v28 = vadd.f32 %v2518_v32, %v3409_v53 }
 0x2bd   :  { %v2136_v33 = vpop.f32.mrf.mxu0 }
 0x2be   :  { %2280 = vst [vmem:[%s3685_s5 + $0x168] sm:$0xff] %v2142_v28  ;;  %v2137_v25 = vadd.f32 %v3409_v53, %v2136_v33 }
 0x2c0   :  { %2279 = vst [vmem:[%s3685_s5 + $0x160] sm:$0xff] %v2137_v25 }
 0x2c3   :  { %v2521_v37 = vpop.f32.mrf.mxu0 }
 0x2c4   :  { %v2152_v52 = vadd.f32 %v2521_v37, %v3409_v53 }
 0x2c5   :  { %v2146_v58 = vpop.f32.mrf.mxu0 }
 0x2c6   :  { %2282 = vst [vmem:[%s3685_s5 + $0x178] sm:$0xff] %v2152_v52  ;;  %v2147_v38 = vadd.f32 %v3409_v53, %v2146_v58 }
 0x2c8   :  { %2281 = vst [vmem:[%s3685_s5 + $0x170] sm:$0xff] %v2147_v38 }
 0x2cb   :  { %v2524_v40 = vpop.f32.mrf.mxu0 }
 0x2cc   :  { %v2162_v62 = vadd.f32 %v2524_v40, %v3409_v53 }
 0x2cd   :  { %v2156_v41 = vpop.f32.mrf.mxu0 }
 0x2ce   :  { %2284 = vst [vmem:[%s3685_s5 + $0x188] sm:$0xff] %v2162_v62  ;;  %v2157_v19 = vadd.f32 %v3409_v53, %v2156_v41 }
 0x2d0   :  { %2283 = vst [vmem:[%s3685_s5 + $0x180] sm:$0xff] %v2157_v19 }
 0x2d3   :  { %v2527_v45 = vpop.f32.mrf.mxu0 }
 0x2d4   :  { %v2172_v8 = vadd.f32 %v2527_v45, %v3409_v53 }
 0x2d5   :  { %v2166_v22 = vpop.f32.mrf.mxu0 }
 0x2d6   :  { %2286 = vst [vmem:[%s3685_s5 + $0x198] sm:$0xff] %v2172_v8  ;;  %v2167_v46 = vadd.f32 %v3409_v53, %v2166_v22 }
 0x2d8   :  { %2285 = vst [vmem:[%s3685_s5 + $0x190] sm:$0xff] %v2167_v46 }
 0x2db   :  { %v2530_v56 = vpop.f32.mrf.mxu0 }
 0x2dc   :  { %v2182_v50 = vadd.f32 %v2530_v56, %v3409_v53 }
 0x2dd   :  { %v2176_v26 = vpop.f32.mrf.mxu0 }
 0x2de   :  { %2288 = vst [vmem:[%s3685_s5 + $0x1a8] sm:$0xff] %v2182_v50  ;;  %v2177_v13 = vadd.f32 %v3409_v53, %v2176_v26 }
 0x2e0   :  { %2287 = vst [vmem:[%s3685_s5 + $0x1a0] sm:$0xff] %v2177_v13 }
 0x2e3   :  { %v2533_v31 = vpop.f32.mrf.mxu0 }
 0x2e4   :  { %v2192_v0 = vadd.f32 %v2533_v31, %v3409_v53 }
 0x2e5   :  { %v2186_v51 = vpop.f32.mrf.mxu0 }
 0x2e6   :  { %2290 = vst [vmem:[%s3685_s5 + $0x1b8] sm:$0xff] %v2192_v0  ;;  %v2187_v47 = vadd.f32 %v3409_v53, %v2186_v51 }
 0x2e8   :  { %2289 = vst [vmem:[%s3685_s5 + $0x1b0] sm:$0xff] %v2187_v47 }
 0x2eb   :  { %v2536_v43 = vpop.f32.mrf.mxu0 }
 0x2ec   :  { %v2202_v7 = vadd.f32 %v2536_v43, %v3409_v53 }
 0x2ed   :  { %v2196_v55 = vpop.f32.mrf.mxu0 }
 0x2ee   :  { %2292 = vst [vmem:[%s3685_s5 + $0x1c8] sm:$0xff] %v2202_v7  ;;  %v2197_v5 = vadd.f32 %v3409_v53, %v2196_v55 }
 0x2f0   :  { %2291 = vst [vmem:[%s3685_s5 + $0x1c0] sm:$0xff] %v2197_v5 }
 0x2f3   :  { %v2539_v39 = vpop.f32.mrf.mxu0 }
 0x2f4   :  { %v2212_v6 = vadd.f32 %v2539_v39, %v3409_v53 }
 0x2f5   :  { %v2206_v60 = vpop.f32.mrf.mxu0 }
 0x2f6   :  { %2294 = vst [vmem:[%s3685_s5 + $0x1d8] sm:$0xff] %v2212_v6  ;;  %v2207_v12 = vadd.f32 %v3409_v53, %v2206_v60 }
 0x2f8   :  { %2293 = vst [vmem:[%s3685_s5 + $0x1d0] sm:$0xff] %v2207_v12 }
 0x2fb   :  { %v2542_v57 = vpop.f32.mrf.mxu0 }
 0x2fc   :  { %v2222_v63 = vadd.f32 %v2542_v57, %v3409_v53 }
 0x2fd   :  { %v2216_v49 = vpop.f32.mrf.mxu0 }
 0x2fe   :  { %2296 = vst [vmem:[%s3685_s5 + $0x1e8] sm:$0xff] %v2222_v63  ;;  %v2217_v1 = vadd.f32 %v3409_v53, %v2216_v49 }
 0x300   :  { %2295 = vst [vmem:[%s3685_s5 + $0x1e0] sm:$0xff] %v2217_v1 }
 0x303   :  { %v2545_v61 = vpop.f32.mrf.mxu0 }
 0x304   :  { %v2232_v18 = vadd.f32 %v2545_v61, %v3409_v53 }
 0x305   :  { %v2226_v2 = vpop.f32.mrf.mxu0 }
 0x306   :  { %2298 = vst [vmem:[%s3685_s5 + $0x1f8] sm:$0xff] %v2232_v18  ;;  %v2227_v30 = vadd.f32 %v3409_v53, %v2226_v2 }
 0x308   :  { %2297 = vst [vmem:[%s3685_s5 + $0x1f0] sm:$0xff] %v2227_v30 }

// kernel: gnn_attribute_decoder_forward.2
= control target key start
LH: loop header
LB: loop body
LE: loop exit
PB: predicated region body
PF: predicated region fallthrough
CT: control target
= control target key end

     0   :  { %v2678_v0 = vmov 0   ;;  %s3744_s1 = inlined_call_operand.vmem [shape: bf16[512,128], index: 1, kind: input, shape index: {}]   ;;  %s3745_s0 = inlined_call_operand.vmem [shape: s8[512,512], index: 0, kind: input, shape index: {}]   ;;  %s3746_s2 = inlined_call_operand.vmem [shape: f32[512,1], index: 2, kind: input, shape index: {}]   ;;  %s3747_s3 = inlined_call_operand.vmem [shape: f32[128,128], index: 3, kind: input, shape index: {}]   ;;  %s3748_s4 = inlined_call_operand.vmem [shape: f32[1,128], index: 4, kind: input, shape index: {}]   ;;  %s3749_s5 = inlined_call_operand.vmem [shape: f32[512,128], index: 5, kind: output, shape index: {}]  }
   0x1   :  { %2610 = vmatprep.subr.bf16.mxu1 %v2678_v0  ;;  %v2646_v1 = vld [vmem:[%s3744_s1 + $0x38] sm:$0xff]   ;;  %606 = vmatprep.subr.bf16.mxu0 %v2678_v0  ;;  %v2647_v2 = vld [vmem:[%s3744_s1 + $0x30] sm:$0xff]   ;;  %v2648_v3 = vld [vmem:[%s3744_s1 + $0x28] sm:$0xff]  }
   0x2   :  { %2644 = vset.pattern.permute.xlu0 %v2678_v0  ;;  %2645 = vset.pattern.permute.xlu1 %v2678_v0  ;;  %v2649_v4 = vld [vmem:[%s3744_s1 + $0x20] sm:$0xff]   ;;  %v2650_v5 = vld [vmem:[%s3744_s1 + $0x18] sm:$0xff]   ;;  %v2739_v6 = vld [vmem:[%s3745_s0 + $0x188] sm:$0xff] }
   0x3   :  { %2626 = vmatpush1.bf16.msra.mxu1 %v2646_v1  ;;  %607 = vmatpush1.bf16.msra.mxu0 %v2646_v1  ;;  %v250_v7 = vunpack.c.l.s8.bf16 %v2739_v6  ;;  %v2651_v8 = vld [vmem:[%s3744_s1 + $0x10] sm:$0xff]   ;;  %v2652_v9 = vld [vmem:[%s3744_s1 + $0x8] sm:$0xff]   ;;  %v2653_v10 = vld [vmem:[%s3744_s1] sm:$0xff]   ;;  %v254_v25 = vunpack.c.h.s8.bf16 %v2739_v6 }
   0x4   :  { %2611 = vmatprep.subr.bf16.mxu1 %v2678_v0  ;;  %608 = vmatprep.subr.bf16.mxu0 %v2678_v0  ;;  %v2654_v11 = vld [vmem:[%s3744_s1 + $0x78] sm:$0xff]   ;;  %v2655_v12 = vld [vmem:[%s3744_s1 + $0x70] sm:$0xff]   ;;  %v90_v13 = vld [vmem:[%s3745_s0 + $0x8] sm:$0xff] }
   0x5   :  { %830 = vmatprep.mubr.bf16.mxu1 %v250_v7  ;;  %v154_v14 = vunpack.c.l.s8.bf16 %v90_v13  ;;  %v2656_v15 = vld [vmem:[%s3744_s1 + $0x68] sm:$0xff]   ;;  %v2657_v16 = vld [vmem:[%s3744_s1 + $0x60] sm:$0xff]   ;;  %v2658_v17 = vld [vmem:[%s3744_s1 + $0x58] sm:$0xff]   ;;  %v158_v27 = vunpack.c.h.s8.bf16 %v90_v13 }
   0x6   :  { %v2659_v18 = vld [vmem:[%s3744_s1 + $0x50] sm:$0xff]   ;;  %v2660_v19 = vld [vmem:[%s3744_s1 + $0x48] sm:$0xff]   ;;  %v2661_v20 = vld [vmem:[%s3744_s1 + $0x40] sm:$0xff]  }
   0x7   :  { %2627 = vmatpush1.bf16.msra.mxu1 %v2647_v2  ;;  %609 = vmatpush1.bf16.msra.mxu0 %v2647_v2  ;;  %v137_v21 = vld [vmem:[%s3745_s0 + $0x180] sm:$0xff]  ;;  %v2662_v26 = vld [vmem:[%s3744_s1 + $0xb8] sm:$0xff]   ;;  %v2663_v28 = vld [vmem:[%s3744_s1 + $0xb0] sm:$0xff]  }
   0x8   :  { %2612 = vmatprep.subr.bf16.mxu1 %v2678_v0  ;;  %610 = vmatprep.subr.bf16.mxu0 %v2678_v0  ;;  %v89_v22 = vld [vmem:[%s3745_s0] sm:$0xff]  ;;  %v249_v23 = vunpack.c.l.s8.bf16 %v137_v21  ;;  %v142_v29 = vld [vmem:[%s3745_s0 + $0x1a8] sm:$0xff]  ;;  %v253_v31 = vunpack.c.h.s8.bf16 %v137_v21  ;;  %v1381_v43 = vld [vmem:[%s3746_s2 + $0x10] sm:$0xff] }
   0x9   :  { %638 = vmatprep.mubr.bf16.mxu0 %v154_v14  ;;  %v153_v24 = vunpack.c.l.s8.bf16 %v89_v22  ;;  %v94_v30 = vld [vmem:[%s3745_s0 + $0x28] sm:$0xff]  ;;  %v157_v32 = vunpack.c.h.s8.bf16 %v89_v22  ;;  %v258_v34 = vunpack.c.l.s8.bf16 %v142_v29  ;;  %v1379_v36 = vld [vmem:[%s3746_s2] sm:$0xff]  ;;  %v2666_v44 = vld [vmem:[%s3744_s1 + $0x98] sm:$0xff]   ;;  %v262_v45 = vunpack.c.h.s8.bf16 %v142_v29  ;;  %1455 = vperm.xlu1 %2645, %v1381_v43  }
   0xa   :  { %v2664_v33 = vld [vmem:[%s3744_s1 + $0xa8] sm:$0xff]   ;;  %v162_v35 = vunpack.c.l.s8.bf16 %v94_v30  ;;  %v2665_v37 = vld [vmem:[%s3744_s1 + $0xa0] sm:$0xff]   ;;  %1445 = vperm.xlu0 %2644, %v1379_v36   ;;  %v166_v46 = vunpack.c.h.s8.bf16 %v94_v30  ;;  %v1382_v47 = vld [vmem:[%s3746_s2 + $0x18] sm:$0xff] }
   0xb   :  { %2628 = vmatpush1.bf16.msra.mxu1 %v2648_v3  ;;  %611 = vmatpush1.bf16.msra.mxu0 %v2648_v3  ;;  %v141_v38 = vld [vmem:[%s3745_s0 + $0x1a0] sm:$0xff]  ;;  %v1380_v42 = vld [vmem:[%s3746_s2 + $0x8] sm:$0xff]  ;;  %v2667_v49 = vld [vmem:[%s3744_s1 + $0x90] sm:$0xff]  }
   0xc   :  { %2613 = vmatprep.subr.bf16.mxu1 %v2678_v0  ;;  %612 = vmatprep.subr.bf16.mxu0 %v2678_v0  ;;  %v93_v39 = vld [vmem:[%s3745_s0 + $0x20] sm:$0xff]  ;;  %v257_v40 = vunpack.c.l.s8.bf16 %v141_v38  ;;  %v146_v50 = vld [vmem:[%s3745_s0 + $0x1c8] sm:$0xff]  ;;  %v261_v52 = vunpack.c.h.s8.bf16 %v141_v38  ;;  %v1385_v55 = vld [vmem:[%s3746_s2 + $0x30] sm:$0xff] }
   0xd   :  { %v161_v41 = vunpack.c.l.s8.bf16 %v93_v39  ;;  %v1383_v48 = vld [vmem:[%s3746_s2 + $0x20] sm:$0xff]  ;;  %v98_v51 = vld [vmem:[%s3745_s0 + $0x48] sm:$0xff]  ;;  %1460 = vperm.xlu1 %2645, %v1382_v47   ;;  %v165_v53 = vunpack.c.h.s8.bf16 %v93_v39  ;;  %v266_v57 = vunpack.c.l.s8.bf16 %v146_v50  ;;  %v1386_v60 = vld [vmem:[%s3746_s2 + $0x38] sm:$0xff]  ;;  %v270_v6 = vunpack.c.h.s8.bf16 %v146_v50 }
   0xe   :  { %1450 = vperm.xlu0 %2644, %v1380_v42   ;;  %v1384_v54 = vld [vmem:[%s3746_s2 + $0x28] sm:$0xff]  ;;  %v170_v58 = vunpack.c.l.s8.bf16 %v98_v51  ;;  %v2669_v59 = vld [vmem:[%s3744_s1 + $0x80] sm:$0xff]   ;;  %v174_v7 = vunpack.c.h.s8.bf16 %v98_v51  ;;  %v1394_v21 = vld [vmem:[%s3746_s2 + $0x78] sm:$0xff] }
   0xf   :  { %2629 = vmatpush1.bf16.msra.mxu1 %v2649_v4  ;;  %613 = vmatpush1.bf16.msra.mxu0 %v2649_v4  ;;  %v2668_v56 = vld [vmem:[%s3744_s1 + $0x88] sm:$0xff]   ;;  %v145_v61 = vld [vmem:[%s3745_s0 + $0x1c0] sm:$0xff]  ;;  %v1389_v4 = vld [vmem:[%s3746_s2 + $0x50] sm:$0xff] }
  0x10   :  { %2614 = vmatprep.subr.bf16.mxu1 %v2678_v0  ;;  %614 = vmatprep.subr.bf16.mxu0 %v2678_v0  ;;  %v97_v62 = vld [vmem:[%s3745_s0 + $0x40] sm:$0xff]  ;;  %v265_v1 = vunpack.c.l.s8.bf16 %v145_v61  ;;  %v1388_v3 = vld [vmem:[%s3746_s2 + $0x48] sm:$0xff]  ;;  %v269_v13 = vunpack.c.h.s8.bf16 %v145_v61  ;;  %v2674_v29 = vld [vmem:[%s3744_s1 + $0xd8] sm:$0xff]  }
  0x11   :  { %1470 = vperm.xlu1 %2645, %v1384_v54   ;;  %v1387_v63 = vld [vmem:[%s3746_s2 + $0x40] sm:$0xff]  ;;  %v169_v2 = vunpack.c.l.s8.bf16 %v97_v62  ;;  %v173_v14 = vunpack.c.h.s8.bf16 %v97_v62  ;;  %v106_v36 = vld [vmem:[%s3745_s0 + $0x88] sm:$0xff]  ;;  %v1409_v61 = vld [vmem:[%s3746_s2 + $0xf0] sm:$0xff] }
  0x12   :  { %1465 = vperm.xlu0 %2644, %v1383_v48   ;;  %v149_v22 = vld [vmem:[%s3745_s0 + $0x1e0] sm:$0xff]  ;;  %v1400_v39 = vld [vmem:[%s3746_s2 + $0xa8] sm:$0xff]  ;;  %v186_v43 = vunpack.c.l.s8.bf16 %v106_v36  ;;  %v190_v54 = vunpack.c.h.s8.bf16 %v106_v36 }
  0x13   :  { %2630 = vmatpush1.bf16.msra.mxu1 %v2650_v5  ;;  %615 = vmatpush1.bf16.msra.mxu0 %v2650_v5  ;;  %v2670_v5 = vld [vmem:[%s3744_s1 + $0xf8] sm:$0xff]   ;;  %v105_v47 = vld [vmem:[%s3745_s0 + $0x80] sm:$0xff]  ;;  %v1404_v51 = vld [vmem:[%s3746_s2 + $0xc8] sm:$0xff] }
  0x14   :  { %2615 = vmatprep.subr.bf16.mxu1 %v2678_v0  ;;  %616 = vmatprep.subr.bf16.mxu0 %v2678_v0  ;;  %v1403_v48 = vld [vmem:[%s3746_s2 + $0xc0] sm:$0xff]  ;;  %v185_v50 = vunpack.c.l.s8.bf16 %v105_v47 }
  0x15   :  { %1480 = vperm.xlu1 %2645, %v1386_v60   ;;  %v1408_v60 = vld [vmem:[%s3746_s2 + $0xe8] sm:$0xff]  ;;  %v1423_v36 = vld [vmem:[%s3746_s2 + $0x160] sm:$0xff] }
  0x16   :  { %1475 = vperm.xlu0 %2644, %v1385_v55   ;;  %v1407_v55 = vld [vmem:[%s3746_s2 + $0xe0] sm:$0xff] }
  0x17   :  { %2631 = vmatpush1.bf16.msra.mxu1 %v2651_v8  ;;  %617 = vmatpush1.bf16.msra.mxu0 %v2651_v8  ;;  %v1390_v8 = vld [vmem:[%s3746_s2 + $0x58] sm:$0xff] }
  0x18   :  { %2616 = vmatprep.subr.bf16.mxu1 %v2678_v0  ;;  %618 = vmatprep.subr.bf16.mxu0 %v2678_v0 }
  0x19   :  { %1490 = vperm.xlu1 %2645, %v1388_v3   ;;  %v95_v3 = vld [vmem:[%s3745_s0 + $0x30] sm:$0xff] }
  0x1a   :  { %1485 = vperm.xlu0 %2644, %v1387_v63  }
  0x1b   :  { %2632 = vmatpush1.bf16.msra.mxu1 %v2652_v9  ;;  %619 = vmatpush1.bf16.msra.mxu0 %v2652_v9  ;;  %v1391_v9 = vld [vmem:[%s3746_s2 + $0x60] sm:$0xff] }
  0x1c   :  { %2617 = vmatprep.subr.bf16.mxu1 %v2678_v0  ;;  %620 = vmatprep.subr.bf16.mxu0 %v2678_v0 }
  0x1d   :  { %1500 = vperm.xlu1 %2645, %v1390_v8  }
  0x1e   :  { %1495 = vperm.xlu0 %2644, %v1389_v4   ;;  %v109_v4 = vld [vmem:[%s3745_s0 + $0xa0] sm:$0xff] }
  0x1f   :  { %2633 = vmatpush1.bf16.msra.mxu1 %v2653_v10  ;;  %621 = vmatpush1.bf16.msra.mxu0 %v2653_v10  ;;  %v2671_v10 = vld [vmem:[%s3744_s1 + $0xf0] sm:$0xff]  }
  0x20   :  { %2618 = vmatprep.subr.bf16.mxu1 %v2678_v0  ;;  %622 = vmatprep.subr.bf16.mxu0 %v2678_v0 }
  0x22   :  { %1505 = vperm.xlu0 %2644, %v1391_v9  }
  0x23   :  { %2634 = vmatpush2.bf16.msra.mxu1 %v2654_v11  ;;  %623 = vmatpush2.bf16.msra.mxu0 %v2654_v11  ;;  %v150_v11 = vld [vmem:[%s3745_s0 + $0x1e8] sm:$0xff] }
  0x24   :  { %2619 = vmatprep.subr.bf16.mxu1 %v2678_v0  ;;  %624 = vmatprep.subr.bf16.mxu0 %v2678_v0  ;;  %v278_v30 = vunpack.c.h.s8.bf16 %v150_v11 }
  0x27   :  { %2635 = vmatpush2.bf16.msra.mxu1 %v2655_v12  ;;  %625 = vmatpush2.bf16.msra.mxu0 %v2655_v12  ;;  %v102_v12 = vld [vmem:[%s3745_s0 + $0x68] sm:$0xff] }
  0x28   :  { %2620 = vmatprep.subr.bf16.mxu1 %v2678_v0  ;;  %626 = vmatprep.subr.bf16.mxu0 %v2678_v0 }
  0x2b   :  { %2636 = vmatpush2.bf16.msra.mxu1 %v2656_v15  ;;  %627 = vmatpush2.bf16.msra.mxu0 %v2656_v15  ;;  %v1392_v15 = vld [vmem:[%s3746_s2 + $0x68] sm:$0xff] }
  0x2c   :  { %2621 = vmatprep.subr.bf16.mxu1 %v2678_v0  ;;  %628 = vmatprep.subr.bf16.mxu0 %v2678_v0 }
  0x2d   :  { %1510 = vperm.xlu1 %2645, %v1392_v15   ;;  %v114_v15 = vld [vmem:[%s3745_s0 + $0xc8] sm:$0xff] }
  0x2f   :  { %2637 = vmatpush2.bf16.msra.mxu1 %v2657_v16  ;;  %629 = vmatpush2.bf16.msra.mxu0 %v2657_v16  ;;  %v1393_v16 = vld [vmem:[%s3746_s2 + $0x70] sm:$0xff] }
  0x30   :  { %2622 = vmatprep.subr.bf16.mxu1 %v2678_v0  ;;  %630 = vmatprep.subr.bf16.mxu0 %v2678_v0 }
  0x31   :  { %1515 = vperm.xlu0 %2644, %v1393_v16   ;;  %1520 = vperm.xlu1 %2645, %v1394_v21   ;;  %v167_v16 = vunpack.c.h.s8.bf16 %v95_v3  ;;  %v1417_v21 = vld [vmem:[%s3746_s2 + $0x130] sm:$0xff] }
  0x33   :  { %2638 = vmatpush2.bf16.msra.mxu1 %v2658_v17  ;;  %631 = vmatpush2.bf16.msra.mxu0 %v2658_v17  ;;  %v2672_v17 = vld [vmem:[%s3744_s1 + $0xe8] sm:$0xff]  }
  0x34   :  { %2623 = vmatprep.subr.bf16.mxu1 %v2678_v0  ;;  %632 = vmatprep.subr.bf16.mxu0 %v2678_v0 }
  0x37   :  { %2639 = vmatpush2.bf16.msra.mxu1 %v2659_v18  ;;  %633 = vmatpush2.bf16.msra.mxu0 %v2659_v18  ;;  %v274_v18 = vunpack.c.l.s8.bf16 %v150_v11  ;;  %v1842_v11 = vld [vmem:[%s3747_s3 + $0x78] sm:$0xff] }
  0x38   :  { %2624 = vmatprep.subr.bf16.mxu1 %v2678_v0  ;;  %634 = vmatprep.subr.bf16.mxu0 %v2678_v0 }
  0x3b   :  { %2640 = vmatpush2.bf16.msra.mxu1 %v2660_v19  ;;  %635 = vmatpush2.bf16.msra.mxu0 %v2660_v19  ;;  %v178_v19 = vunpack.c.l.s8.bf16 %v102_v12 }
  0x3c   :  { %2625 = vmatprep.subr.bf16.mxu1 %v2678_v0  ;;  %636 = vmatprep.subr.bf16.mxu0 %v2678_v0 }
  0x3f   :  { %2641 = vmatpush2.bf16.msra.mxu1 %v2661_v20  ;;  %637 = vmatpush2.bf16.msra.mxu0 %v2661_v20  ;;  %v2673_v20 = vld [vmem:[%s3744_s1 + $0xe0] sm:$0xff]  }
  0x40   :  { %895 = vmatprep.subr.bf16.mxu1 %v2678_v0  ;;  %2482 = vmatprep.subr.mxu0 %v1842_v11 }
  0x42   :  { %831 = vmatmul.mubr.bf16.vlgmr.msra.gmra.mxu1 %v249_v23  ;;  %639 = vmatmul.mubr.bf16.vlgmr.msra.gmra.mxu0 %v153_v24  ;;  %v101_v23 = vld [vmem:[%s3745_s0 + $0x60] sm:$0xff] }
  0x43   :  { %896 = vmatpush1.bf16.msra.mxu1 %v2662_v26  ;;  %838 = vmatprep.mubr.bf16.mxu1 %v254_v25  ;;  %v1395_v24 = vld [vmem:[%s3746_s2 + $0x80] sm:$0xff]  ;;  %v273_v25 = vunpack.c.l.s8.bf16 %v149_v22  ;;  %v177_v26 = vunpack.c.l.s8.bf16 %v101_v23  ;;  %v181_v38 = vunpack.c.h.s8.bf16 %v101_v23  ;;  %v99_v23 = vld [vmem:[%s3745_s0 + $0x50] sm:$0xff] }
  0x44   :  { %897 = vmatprep.subr.bf16.mxu1 %v2678_v0  ;;  %646 = vmatprep.mubr.bf16.mxu0 %v158_v27  ;;  %v1396_v27 = vld [vmem:[%s3746_s2 + $0x88] sm:$0xff] }
  0x45   :  { %1525 = vperm.xlu0 %2644, %v1395_v24   ;;  %1530 = vperm.xlu1 %2645, %v1396_v27   ;;  %v113_v24 = vld [vmem:[%s3745_s0 + $0xc0] sm:$0xff]  ;;  %v171_v27 = vunpack.c.l.s8.bf16 %v99_v23 }
  0x46   :  { %2483 = vmatpush3.msra.mxu0 %v1842_v11 }
  0x47   :  { %898 = vmatpush1.bf16.msra.mxu1 %v2663_v28  ;;  %v1397_v28 = vld [vmem:[%s3746_s2 + $0x90] sm:$0xff] }
  0x48   :  { %899 = vmatprep.subr.bf16.mxu1 %v2678_v0 }
  0x49   :  { %1535 = vperm.xlu0 %2644, %v1397_v28   ;;  %v201_v28 = vunpack.c.l.s8.bf16 %v113_v24 }
  0x4a   :  { %839 = vmatmul.mubr.bf16.gmra.mxu1 %v253_v31  ;;  %647 = vmatmul.mubr.bf16.gmra.mxu0 %v157_v32  ;;  %v182_v31 = vunpack.c.h.s8.bf16 %v102_v12  ;;  %v1398_v32 = vld [vmem:[%s3746_s2 + $0x98] sm:$0xff] }
  0x4b   :  { %900 = vmatpush1.bf16.msra.mxu1 %v2664_v33  ;;  %846 = vmatprep.mubr.bf16.mxu1 %v258_v34  ;;  %v1399_v33 = vld [vmem:[%s3746_s2 + $0xa0] sm:$0xff]  ;;  %v2675_v34 = vld [vmem:[%s3744_s1 + $0xd0] sm:$0xff]   ;;  %v1414_v12 = vld [vmem:[%s3746_s2 + $0x118] sm:$0xff] }
  0x4c   :  { %901 = vmatprep.subr.bf16.mxu1 %v2678_v0  ;;  %654 = vmatprep.mubr.bf16.mxu0 %v162_v35  ;;  %v92_v35 = vld [vmem:[%s3745_s0 + $0x18] sm:$0xff] }
  0x4d   :  { %1540 = vperm.xlu1 %2645, %v1398_v32   ;;  %1545 = vperm.xlu0 %2644, %v1399_v33   ;;  %v156_v42 = vunpack.c.l.s8.bf16 %v92_v35  ;;  %v1421_v32 = vld [vmem:[%s3746_s2 + $0x150] sm:$0xff]  ;;  %v1422_v33 = vld [vmem:[%s3746_s2 + $0x158] sm:$0xff] }
  0x4f   :  { %902 = vmatpush1.bf16.msra.mxu1 %v2665_v37  ;;  %v277_v37 = vunpack.c.h.s8.bf16 %v149_v22  ;;  %v1418_v22 = vld [vmem:[%s3746_s2 + $0x138] sm:$0xff] }
  0x50   :  { %903 = vmatprep.subr.bf16.mxu1 %v2678_v0 }
  0x51   :  { %1550 = vperm.xlu1 %2645, %v1400_v39   ;;  %v1424_v39 = vld [vmem:[%s3746_s2 + $0x168] sm:$0xff] }
  0x52   :  { %847 = vmatmul.mubr.bf16.gmra.mxu1 %v257_v40  ;;  %655 = vmatmul.mubr.bf16.gmra.mxu0 %v161_v41  ;;  %v1401_v40 = vld [vmem:[%s3746_s2 + $0xb0] sm:$0xff]  ;;  %v2676_v41 = vld [vmem:[%s3744_s1 + $0xc8] sm:$0xff]  }
  0x53   :  { %904 = vmatpush1.bf16.msra.mxu1 %v2666_v44  ;;  %854 = vmatprep.mubr.bf16.mxu1 %v262_v45  ;;  %v2677_v44 = vld [vmem:[%s3744_s1 + $0xc0] sm:$0xff]   ;;  %v1402_v45 = vld [vmem:[%s3746_s2 + $0xb8] sm:$0xff] }
  0x54   :  { %905 = vmatprep.subr.bf16.mxu1 %v2678_v0  ;;  %662 = vmatprep.mubr.bf16.mxu0 %v166_v46  ;;  %v91_v46 = vld [vmem:[%s3745_s0 + $0x10] sm:$0xff] }
  0x55   :  { %1555 = vperm.xlu0 %2644, %v1401_v40   ;;  %1560 = vperm.xlu1 %2645, %v1402_v45   ;;  %v103_v45 = vld [vmem:[%s3745_s0 + $0x70] sm:$0xff] }
  0x57   :  { %906 = vmatpush1.bf16.msra.mxu1 %v2667_v49  ;;  %v155_v49 = vunpack.c.l.s8.bf16 %v91_v46 }
  0x58   :  { %907 = vmatprep.subr.bf16.mxu1 %v2678_v0 }
  0x59   :  { %1565 = vperm.xlu0 %2644, %v1403_v48   ;;  %1570 = vperm.xlu1 %2645, %v1404_v51   ;;  %v179_v48 = vunpack.c.l.s8.bf16 %v103_v45 }
  0x5a   :  { %855 = vmatmul.mubr.bf16.gmra.mxu1 %v261_v52  ;;  %663 = vmatmul.mubr.bf16.gmra.mxu0 %v165_v53  ;;  %v1405_v52 = vld [vmem:[%s3746_s2 + $0xd0] sm:$0xff]  ;;  %v160_v53 = vunpack.c.h.s8.bf16 %v92_v35  ;;  %v118_v35 = vld [vmem:[%s3745_s0 + $0xe8] sm:$0xff] }
  0x5b   :  { %908 = vmatpush1.bf16.msra.mxu1 %v2668_v56  ;;  %862 = vmatprep.mubr.bf16.mxu1 %v266_v57  ;;  %v96_v56 = vld [vmem:[%s3745_s0 + $0x38] sm:$0xff]  ;;  %v110_v57 = vld [vmem:[%s3745_s0 + $0xa8] sm:$0xff] }
  0x5c   :  { %909 = vmatprep.subr.bf16.mxu1 %v2678_v0  ;;  %670 = vmatprep.mubr.bf16.mxu0 %v170_v58  ;;  %v159_v58 = vunpack.c.h.s8.bf16 %v91_v46  ;;  %v164_v62 = vunpack.c.l.s8.bf16 %v96_v56  ;;  %v194_v63 = vunpack.c.l.s8.bf16 %v110_v57  ;;  %v168_v8 = vunpack.c.h.s8.bf16 %v96_v56  ;;  %v117_v46 = vld [vmem:[%s3745_s0 + $0xe0] sm:$0xff]  ;;  %v122_v56 = vld [vmem:[%s3745_s0 + $0x108] sm:$0xff] }
  0x5d   :  { %1575 = vperm.xlu0 %2644, %v1405_v52   ;;  %v198_v9 = vunpack.c.h.s8.bf16 %v110_v57  ;;  %v214_v52 = vunpack.c.h.s8.bf16 %v118_v35  ;;  %v1838_v57 = vld [vmem:[%s3747_s3 + $0x58] sm:$0xff] }
  0x5f   :  { %910 = vmatpush1.bf16.msra.mxu1 %v2669_v59  ;;  %v189_v59 = vunpack.c.h.s8.bf16 %v105_v47  ;;  %v1427_v47 = vld [vmem:[%s3746_s2 + $0x180] sm:$0xff] }
  0x60   :  { %911 = vmatprep.subr.bf16.mxu1 %v2678_v0 }
  0x61   :  { %1585 = vperm.xlu0 %2644, %v1407_v55   ;;  %v108_v55 = vld [vmem:[%s3745_s0 + $0x98] sm:$0xff] }
  0x62   :  { %863 = vmatmul.mubr.bf16.gmra.mxu1 %v265_v1  ;;  %671 = vmatmul.mubr.bf16.gmra.mxu0 %v169_v2  ;;  %v1410_v1 = vld [vmem:[%s3746_s2 + $0xf8] sm:$0xff]  ;;  %v1411_v2 = vld [vmem:[%s3746_s2 + $0x100] sm:$0xff] }
  0x63   :  { %912 = vmatpush2.bf16.msra.mxu1 %v2670_v5  ;;  %870 = vmatprep.mubr.bf16.mxu1 %v270_v6  ;;  %v163_v5 = vunpack.c.l.s8.bf16 %v95_v3  ;;  %v193_v6 = vunpack.c.l.s8.bf16 %v109_v4  ;;  %v1836_v3 = vld [vmem:[%s3747_s3 + $0x48] sm:$0xff] }
  0x64   :  { %913 = vmatprep.subr.bf16.mxu1 %v2678_v0  ;;  %678 = vmatprep.mubr.bf16.mxu0 %v174_v7  ;;  %v1412_v7 = vld [vmem:[%s3746_s2 + $0x108] sm:$0xff] }
  0x65   :  { %1595 = vperm.xlu0 %2644, %v1409_v61   ;;  %v1837_v61 = vld [vmem:[%s3747_s3 + $0x50] sm:$0xff] }
  0x67   :  { %914 = vmatpush2.bf16.msra.mxu1 %v2671_v10  ;;  %v1413_v10 = vld [vmem:[%s3746_s2 + $0x110] sm:$0xff] }
  0x68   :  { %915 = vmatprep.subr.bf16.mxu1 %v2678_v0 }
  0x69   :  { %1605 = vperm.xlu0 %2644, %v1411_v2   ;;  %v1433_v2 = vld [vmem:[%s3746_s2 + $0x1b0] sm:$0xff] }
  0x6a   :  { %871 = vmatmul.mubr.bf16.gmra.mxu1 %v269_v13  ;;  %679 = vmatmul.mubr.bf16.gmra.mxu0 %v173_v14  ;;  %v1415_v13 = vld [vmem:[%s3746_s2 + $0x120] sm:$0xff]  ;;  %v100_v14 = vld [vmem:[%s3745_s0 + $0x58] sm:$0xff] }
  0x6b   :  { %916 = vmatpush2.bf16.msra.mxu1 %v2672_v17  ;;  %878 = vmatprep.mubr.bf16.mxu1 %v274_v18  ;;  %v197_v17 = vunpack.c.h.s8.bf16 %v109_v4  ;;  %v1416_v18 = vld [vmem:[%s3746_s2 + $0x128] sm:$0xff]  ;;  %v1434_v4 = vld [vmem:[%s3746_s2 + $0x1b8] sm:$0xff] }
  0x6c   :  { %917 = vmatprep.subr.bf16.mxu1 %v2678_v0  ;;  %686 = vmatprep.mubr.bf16.mxu0 %v178_v19  ;;  %v172_v19 = vunpack.c.l.s8.bf16 %v100_v14 }
  0x6d   :  { %1615 = vperm.xlu0 %2644, %v1413_v10  }
  0x6f   :  { %918 = vmatpush2.bf16.msra.mxu1 %v2673_v20  ;;  %v202_v20 = vunpack.c.l.s8.bf16 %v114_v15 }
  0x70   :  { %919 = vmatprep.subr.bf16.mxu1 %v2678_v0 }
  0x71   :  { %1625 = vperm.xlu0 %2644, %v1415_v13   ;;  %v192_v13 = vunpack.c.h.s8.bf16 %v108_v55 }
  0x72   :  { %879 = vmatmul.mubr.bf16.gmra.mxu1 %v273_v25  ;;  %687 = vmatmul.mubr.bf16.gmra.mxu0 %v177_v26  ;;  %v1841_v25 = vld [vmem:[%s3747_s3 + $0x70] sm:$0xff]  ;;  %v1419_v26 = vld [vmem:[%s3746_s2 + $0x140] sm:$0xff] }
  0x73   :  { %920 = vmatpush2.bf16.msra.mxu1 %v2674_v29  ;;  %886 = vmatprep.mubr.bf16.mxu1 %v278_v30  ;;  %v1420_v29 = vld [vmem:[%s3746_s2 + $0x148] sm:$0xff]  ;;  %v176_v30 = vunpack.c.h.s8.bf16 %v100_v14  ;;  %v222_v14 = vunpack.c.h.s8.bf16 %v122_v56 }
  0x74   :  { %921 = vmatprep.subr.bf16.mxu1 %v2678_v0  ;;  %694 = vmatprep.mubr.bf16.mxu0 %v182_v31  ;;  %v206_v31 = vunpack.c.h.s8.bf16 %v114_v15  ;;  %v1833_v15 = vld [vmem:[%s3747_s3 + $0x30] sm:$0xff] }
  0x75   :  { %1635 = vperm.xlu0 %2644, %v1417_v21   ;;  %2484 = vmatprep.subr.mxu0 %v1841_v25  ;;  %v1831_v21 = vld [vmem:[%s3747_s3 + $0x20] sm:$0xff] }
  0x76   :  { %2485 = vmatpush3.msra.mxu0 %v1841_v25  ;;  %v1440_v25 = vld [vmem:[%s3746_s2 + $0x1e8] sm:$0xff] }
  0x77   :  { %922 = vmatpush2.bf16.msra.mxu1 %v2675_v34  ;;  %v104_v34 = vld [vmem:[%s3745_s0 + $0x78] sm:$0xff] }
  0x78   :  { %923 = vmatprep.subr.bf16.mxu1 %v2678_v0  ;;  %v180_v40 = vunpack.c.l.s8.bf16 %v104_v34  ;;  %v184_v51 = vunpack.c.h.s8.bf16 %v104_v34  ;;  %v1828_v34 = vld [vmem:[%s3747_s3 + $0x8] sm:$0xff] }
  0x79   :  { %1645 = vperm.xlu0 %2644, %v1419_v26  }
  0x7a   :  { %887 = vmatmul.mubr.bf16.gmra.mxu1 %v277_v37  ;;  %695 = vmatmul.mubr.bf16.gmra.mxu0 %v181_v38  ;;  %v175_v37 = vunpack.c.h.s8.bf16 %v99_v23  ;;  %v205_v38 = vunpack.c.h.s8.bf16 %v113_v24 }
  0x7b   :  { %924 = vmatpush2.bf16.msra.mxu1 %v2676_v41  ;;  %927 = vmatprep.mubr.bf16.mxu1 %v156_v42  ;;  %v210_v41 = vunpack.c.l.s8.bf16 %v118_v35  ;;  %v1840_v42 = vld [vmem:[%s3747_s3 + $0x68] sm:$0xff] }
  0x7c   :  { %925 = vmatprep.subr.bf16.mxu1 %v2678_v0  ;;  %702 = vmatprep.mubr.bf16.mxu0 %v186_v43  ;;  %v1406_v0 = vld [vmem:[%s3746_s2 + $0xd8] sm:$0xff]  ;;  %v1425_v43 = vld [vmem:[%s3746_s2 + $0x170] sm:$0xff] }
  0x7d   :  { %1580 = vperm.xlu1 %2645, %v1406_v0   ;;  %1655 = vperm.xlu0 %2644, %v1421_v32   ;;  %v1430_v0 = vld [vmem:[%s3746_s2 + $0x198] sm:$0xff]  ;;  %v125_v32 = vld [vmem:[%s3745_s0 + $0x120] sm:$0xff] }
  0x7e   :  { %2486 = vmatprep.subr.mxu0 %v1840_v42 }
  0x7f   :  { %926 = vmatpush2.bf16.msra.mxu1 %v2677_v44  ;;  %v1426_v44 = vld [vmem:[%s3746_s2 + $0x178] sm:$0xff]  ;;  %2487 = vmatpush3.msra.mxu0 %v1840_v42 }
  0x81   :  { %1590 = vperm.xlu1 %2645, %v1408_v60   ;;  %1665 = vperm.xlu0 %2644, %v1423_v36   ;;  %v213_v60 = vunpack.c.h.s8.bf16 %v117_v46  ;;  %v225_v36 = vunpack.c.l.s8.bf16 %v125_v32 }
  0x82   :  { %928 = vmatmul.mubr.bf16.vlgmr.msra.gmra.mxu1 %v155_v49  ;;  %703 = vmatmul.mubr.bf16.gmra.mxu0 %v185_v50  ;;  %v209_v49 = vunpack.c.l.s8.bf16 %v117_v46  ;;  %v1428_v50 = vld [vmem:[%s3746_s2 + $0x188] sm:$0xff]  ;;  %v115_v46 = vld [vmem:[%s3745_s0 + $0xd0] sm:$0xff] }
  0x83   :  { %935 = vmatprep.mubr.bf16.mxu1 %v160_v53  ;;  %710 = vmatprep.mubr.bf16.mxu0 %v190_v54  ;;  %v1429_v53 = vld [vmem:[%s3746_s2 + $0x190] sm:$0xff]  ;;  %v1839_v54 = vld [vmem:[%s3747_s3 + $0x60] sm:$0xff] }
  0x84   :  { %2488 = vmatprep.subr.mxu0 %v1839_v54 }
  0x85   :  { %1600 = vperm.xlu1 %2645, %v1410_v1   ;;  %1675 = vperm.xlu0 %2644, %v1425_v43   ;;  %v218_v1 = vunpack.c.l.s8.bf16 %v122_v56  ;;  %v229_v43 = vunpack.c.h.s8.bf16 %v125_v32  ;;  %v132_v32 = vld [vmem:[%s3745_s0 + $0x158] sm:$0xff] }
  0x86   :  { %2489 = vmatpush3.msra.mxu0 %v1839_v54  ;;  %v207_v54 = vunpack.c.h.s8.bf16 %v115_v46 }
  0x87   :  { %2490 = vmatprep.subr.mxu0 %v1838_v57 }
  0x88   :  { %2491 = vmatpush3.msra.mxu0 %v1838_v57  ;;  %v119_v57 = vld [vmem:[%s3745_s0 + $0xf0] sm:$0xff] }
  0x89   :  { %1610 = vperm.xlu1 %2645, %v1412_v7   ;;  %1685 = vperm.xlu0 %2644, %v1427_v47   ;;  %v1835_v7 = vld [vmem:[%s3747_s3 + $0x40] sm:$0xff] }
  0x8a   :  { %936 = vmatmul.mubr.bf16.gmra.mxu1 %v159_v58  ;;  %711 = vmatmul.mubr.bf16.gmra.mxu0 %v189_v59  ;;  %v1431_v58 = vld [vmem:[%s3746_s2 + $0x1a0] sm:$0xff]  ;;  %v183_v59 = vunpack.c.h.s8.bf16 %v103_v45 }
  0x8b   :  { %943 = vmatprep.mubr.bf16.mxu1 %v164_v62  ;;  %718 = vmatprep.mubr.bf16.mxu0 %v194_v63  ;;  %v1432_v62 = vld [vmem:[%s3746_s2 + $0x1a8] sm:$0xff]  ;;  %v188_v63 = vunpack.c.l.s8.bf16 %v108_v55  ;;  %v129_v47 = vld [vmem:[%s3745_s0 + $0x140] sm:$0xff] }
  0x8c   :  { %2492 = vmatprep.subr.mxu0 %v1837_v61 }
  0x8d   :  { %1620 = vperm.xlu1 %2645, %v1414_v12   ;;  %1695 = vperm.xlu0 %2644, %v1429_v53   ;;  %v1436_v12 = vld [vmem:[%s3746_s2 + $0x1c8] sm:$0xff] }
  0x8e   :  { %2493 = vmatpush3.msra.mxu0 %v1837_v61  ;;  %v134_v53 = vld [vmem:[%s3745_s0 + $0x168] sm:$0xff] }
  0x8f   :  { %2494 = vmatprep.subr.mxu0 %v1836_v3  ;;  %v242_v56 = vunpack.c.l.s8.bf16 %v134_v53 }
  0x90   :  { %2495 = vmatpush3.msra.mxu0 %v1836_v3 }
  0x91   :  { %1630 = vperm.xlu1 %2645, %v1416_v18   ;;  %1705 = vperm.xlu0 %2644, %v1431_v58   ;;  %v1832_v18 = vld [vmem:[%s3747_s3 + $0x28] sm:$0xff]  ;;  %v133_v58 = vld [vmem:[%s3745_s0 + $0x160] sm:$0xff] }
  0x92   :  { %944 = vmatmul.mubr.bf16.gmra.mxu1 %v163_v5  ;;  %719 = vmatmul.mubr.bf16.gmra.mxu0 %v193_v6  ;;  %v107_v5 = vld [vmem:[%s3745_s0 + $0x90] sm:$0xff]  ;;  %v121_v6 = vld [vmem:[%s3745_s0 + $0x100] sm:$0xff] }
  0x93   :  { %951 = vmatprep.mubr.bf16.mxu1 %v168_v8  ;;  %726 = vmatprep.mubr.bf16.mxu0 %v198_v9  ;;  %v1435_v8 = vld [vmem:[%s3746_s2 + $0x1c0] sm:$0xff]  ;;  %v1834_v9 = vld [vmem:[%s3747_s3 + $0x38] sm:$0xff]  ;;  %v187_v10 = vunpack.c.l.s8.bf16 %v107_v5  ;;  %v217_v11 = vunpack.c.l.s8.bf16 %v121_v6  ;;  %v191_v23 = vunpack.c.h.s8.bf16 %v107_v5  ;;  %v221_v24 = vunpack.c.h.s8.bf16 %v121_v6 }
  0x94   :  { %2496 = vmatprep.subr.mxu0 %v1835_v7 }
  0x95   :  { %1640 = vperm.xlu1 %2645, %v1418_v22   ;;  %1715 = vperm.xlu0 %2644, %v1433_v2   ;;  %v1439_v22 = vld [vmem:[%s3746_s2 + $0x1e0] sm:$0xff]  ;;  %v245_v2 = vunpack.c.h.s8.bf16 %v133_v58 }
  0x96   :  { %2497 = vmatpush3.msra.mxu0 %v1835_v7 }
  0x97   :  { %2498 = vmatprep.subr.mxu0 %v1834_v9 }
  0x98   :  { %2499 = vmatpush3.msra.mxu0 %v1834_v9 }
  0x99   :  { %1650 = vperm.xlu1 %2645, %v1420_v29   ;;  %1725 = vperm.xlu0 %2644, %v1435_v8   ;;  %v1441_v29 = vld [vmem:[%s3746_s2 + $0x1f0] sm:$0xff] }
  0x9a   :  { %952 = vmatmul.mubr.bf16.gmra.mxu1 %v167_v16  ;;  %727 = vmatmul.mubr.bf16.gmra.mxu0 %v197_v17  ;;  %v1437_v16 = vld [vmem:[%s3746_s2 + $0x1d0] sm:$0xff]  ;;  %v1438_v17 = vld [vmem:[%s3746_s2 + $0x1d8] sm:$0xff] }
  0x9b   :  { %959 = vmatprep.mubr.bf16.mxu1 %v172_v19  ;;  %734 = vmatprep.mubr.bf16.mxu0 %v202_v20  ;;  %v112_v19 = vld [vmem:[%s3745_s0 + $0xb8] sm:$0xff]  ;;  %v126_v20 = vld [vmem:[%s3745_s0 + $0x128] sm:$0xff] }
  0x9c   :  { %2500 = vmatprep.subr.mxu0 %v1833_v15  ;;  %v196_v26 = vunpack.c.l.s8.bf16 %v112_v19 }
  0x9d   :  { %1660 = vperm.xlu1 %2645, %v1422_v33   ;;  %1735 = vperm.xlu0 %2644, %v1437_v16   ;;  %v1829_v33 = vld [vmem:[%s3747_s3 + $0x10] sm:$0xff] }
  0x9e   :  { %2501 = vmatpush3.msra.mxu0 %v1833_v15 }
  0x9f   :  { %2502 = vmatprep.subr.mxu0 %v1832_v18 }
  0xa0   :  { %2503 = vmatpush3.msra.mxu0 %v1832_v18 }
  0xa1   :  { %1670 = vperm.xlu1 %2645, %v1424_v39   ;;  %2504 = vmatprep.subr.mxu0 %v1831_v21  ;;  %v1827_v39 = vld [vmem:[%s3747_s3] sm:$0xff] }
  0xa2   :  { %960 = vmatmul.mubr.bf16.gmra.mxu1 %v171_v27  ;;  %735 = vmatmul.mubr.bf16.gmra.mxu0 %v201_v28  ;;  %v226_v27 = vunpack.c.l.s8.bf16 %v126_v20  ;;  %v1830_v28 = vld [vmem:[%s3747_s3 + $0x18] sm:$0xff] }
  0xa3   :  { %967 = vmatprep.mubr.bf16.mxu1 %v176_v30  ;;  %742 = vmatprep.mubr.bf16.mxu0 %v206_v31  ;;  %v1442_v30 = vld [vmem:[%s3746_s2 + $0x1f8] sm:$0xff]  ;;  %v111_v31 = vld [vmem:[%s3745_s0 + $0xb0] sm:$0xff] }
  0xa4   :  { %1745 = vperm.xlu0 %2644, %v1439_v22   ;;  %2505 = vmatpush3.msra.mxu0 %v1831_v21  ;;  %v195_v35 = vunpack.c.l.s8.bf16 %v111_v31  ;;  %v199_v42 = vunpack.c.h.s8.bf16 %v111_v31 }
  0xa5   :  { %1680 = vperm.xlu1 %2645, %v1426_v44   ;;  %2506 = vmatprep.subr.mxu0 %v1830_v28 }
  0xa6   :  { %2507 = vmatpush3.msra.mxu0 %v1830_v28 }
  0xa7   :  { %2508 = vmatprep.subr.mxu0 %v1829_v33 }
  0xa8   :  { %1755 = vperm.xlu0 %2644, %v1441_v29   ;;  %2509 = vmatpush3.msra.mxu0 %v1829_v33 }
  0xa9   :  { %1690 = vperm.xlu1 %2645, %v1428_v50   ;;  %2510 = vmatprep.subr.mxu0 %v1828_v34 }
  0xaa   :  { %968 = vmatmul.mubr.bf16.gmra.mxu1 %v175_v37  ;;  %743 = vmatmul.mubr.bf16.gmra.mxu0 %v205_v38  ;;  %v200_v37 = vunpack.c.h.s8.bf16 %v112_v19  ;;  %v230_v38 = vunpack.c.h.s8.bf16 %v126_v20  ;;  %v127_v20 = vld [vmem:[%s3745_s0 + $0x130] sm:$0xff] }
  0xab   :  { %975 = vmatprep.mubr.bf16.mxu1 %v180_v40  ;;  %750 = vmatprep.mubr.bf16.mxu0 %v210_v41  ;;  %v116_v40 = vld [vmem:[%s3745_s0 + $0xd8] sm:$0xff]  ;;  %v130_v41 = vld [vmem:[%s3745_s0 + $0x148] sm:$0xff] }
  0xac   :  { %2511 = vmatpush3.msra.mxu0 %v1828_v34  ;;  %v204_v44 = vunpack.c.l.s8.bf16 %v116_v40  ;;  %v234_v45 = vunpack.c.l.s8.bf16 %v130_v41  ;;  %v208_v50 = vunpack.c.h.s8.bf16 %v116_v40 }
  0xad   :  { %1700 = vperm.xlu1 %2645, %v1430_v0   ;;  %2512 = vmatprep.subr.mxu0 %v1827_v39  ;;  %v237_v0 = vunpack.c.h.s8.bf16 %v129_v47 }
  0xae   :  { %2513 = vmatpush3.msra.mxu0 %v1827_v39 }
  0xb1   :  { %1710 = vperm.xlu1 %2645, %v1432_v62   ;;  %v246_v62 = vunpack.c.h.s8.bf16 %v134_v53 }
  0xb2   :  { %976 = vmatmul.mubr.bf16.gmra.mxu1 %v179_v48  ;;  %751 = vmatmul.mubr.bf16.gmra.mxu0 %v209_v49  ;;  %v203_v48 = vunpack.c.l.s8.bf16 %v115_v46  ;;  %v233_v49 = vunpack.c.l.s8.bf16 %v129_v47 }
  0xb3   :  { %983 = vmatprep.mubr.bf16.mxu1 %v184_v51  ;;  %758 = vmatprep.mubr.bf16.mxu0 %v214_v52  ;;  %v238_v51 = vunpack.c.h.s8.bf16 %v130_v41  ;;  %v120_v52 = vld [vmem:[%s3745_s0 + $0xf8] sm:$0xff] }
  0xb4   :  { %v212_v55 = vunpack.c.l.s8.bf16 %v120_v52  ;;  %v216_v61 = vunpack.c.h.s8.bf16 %v120_v52 }
  0xb5   :  { %1720 = vperm.xlu1 %2645, %v1434_v4   ;;  %v123_v4 = vld [vmem:[%s3745_s0 + $0x110] sm:$0xff] }
  0xb6   :  { %v219_v5 = vunpack.c.l.s8.bf16 %v123_v4 }
  0xb9   :  { %1730 = vperm.xlu1 %2645, %v1436_v12  }
  0xba   :  { %984 = vmatmul.mubr.bf16.gmra.mxu1 %v183_v59  ;;  %759 = vmatmul.mubr.bf16.gmra.mxu0 %v213_v60  ;;  %v211_v59 = vunpack.c.l.s8.bf16 %v119_v57  ;;  %v241_v60 = vunpack.c.l.s8.bf16 %v133_v58 }
  0xbb   :  { %991 = vmatprep.mubr.bf16.mxu1 %v188_v63  ;;  %766 = vmatprep.mubr.bf16.mxu0 %v218_v1  ;;  %v124_v63 = vld [vmem:[%s3745_s0 + $0x118] sm:$0xff]  ;;  %v215_v1 = vunpack.c.h.s8.bf16 %v119_v57 }
  0xbc   :  { %v220_v3 = vunpack.c.l.s8.bf16 %v124_v63  ;;  %v224_v6 = vunpack.c.h.s8.bf16 %v124_v63  ;;  %v135_v63 = vld [vmem:[%s3745_s0 + $0x170] sm:$0xff] }
  0xbd   :  { %1740 = vperm.xlu1 %2645, %v1438_v17  }
  0xc1   :  { %1750 = vperm.xlu1 %2645, %v1440_v25  }
  0xc2   :  { %992 = vmatmul.mubr.bf16.gmra.mxu1 %v187_v10  ;;  %767 = vmatmul.mubr.bf16.gmra.mxu0 %v217_v11  ;;  %v128_v10 = vld [vmem:[%s3745_s0 + $0x138] sm:$0xff] }
  0xc3   :  { %999 = vmatprep.mubr.bf16.mxu1 %v192_v13  ;;  %774 = vmatprep.mubr.bf16.mxu0 %v222_v14  ;;  %v223_v13 = vunpack.c.h.s8.bf16 %v123_v4  ;;  %v228_v15 = vunpack.c.l.s8.bf16 %v128_v10  ;;  %v243_v4 = vunpack.c.l.s8.bf16 %v135_v63 }
  0xc5   :  { %1760 = vperm.xlu1 %2645, %v1442_v30  }
  0xca   :  { %1000 = vmatmul.mubr.bf16.gmra.mxu1 %v191_v23  ;;  %775 = vmatmul.mubr.bf16.gmra.mxu0 %v221_v24  ;;  %v227_v24 = vunpack.c.l.s8.bf16 %v127_v20 }
  0xcb   :  { %1007 = vmatprep.mubr.bf16.mxu1 %v196_v26  ;;  %782 = vmatprep.mubr.bf16.mxu0 %v226_v27  ;;  %v232_v26 = vunpack.c.h.s8.bf16 %v128_v10 }
  0xd2   :  { %1008 = vmatmul.mubr.bf16.gmra.mxu1 %v195_v35  ;;  %783 = vmatmul.mubr.bf16.gmra.mxu0 %v225_v36  ;;  %v231_v35 = vunpack.c.h.s8.bf16 %v127_v20 }
  0xd3   :  { %1015 = vmatprep.mubr.bf16.mxu1 %v200_v37  ;;  %790 = vmatprep.mubr.bf16.mxu0 %v230_v38  ;;  %v236_v37 = vunpack.c.l.s8.bf16 %v132_v32 }
  0xda   :  { %1016 = vmatmul.mubr.bf16.gmra.mxu1 %v199_v42  ;;  %791 = vmatmul.mubr.bf16.gmra.mxu0 %v229_v43  ;;  %v131_v42 = vld [vmem:[%s3745_s0 + $0x150] sm:$0xff] }
  0xdb   :  { %1023 = vmatprep.mubr.bf16.mxu1 %v204_v44  ;;  %798 = vmatprep.mubr.bf16.mxu0 %v234_v45  ;;  %v235_v46 = vunpack.c.l.s8.bf16 %v131_v42 }
  0xe2   :  { %1024 = vmatmul.mubr.bf16.gmra.mxu1 %v203_v48  ;;  %799 = vmatmul.mubr.bf16.gmra.mxu0 %v233_v49  ;;  %v240_v48 = vunpack.c.h.s8.bf16 %v132_v32  ;;  %v139_v32 = vld [vmem:[%s3745_s0 + $0x190] sm:$0xff] }
  0xe3   :  { %1031 = vmatprep.mubr.bf16.mxu1 %v208_v50  ;;  %806 = vmatprep.mubr.bf16.mxu0 %v238_v51 }
  0xea   :  { %1032 = vmatmul.mubr.bf16.gmra.mxu1 %v207_v54  ;;  %807 = vmatmul.mubr.bf16.gmra.mxu0 %v237_v0  ;;  %v136_v54 = vld [vmem:[%s3745_s0 + $0x178] sm:$0xff] }
  0xeb   :  { %1039 = vmatprep.mubr.bf16.mxu1 %v212_v55  ;;  %814 = vmatprep.mubr.bf16.mxu0 %v242_v56  ;;  %v239_v56 = vunpack.c.h.s8.bf16 %v131_v42  ;;  %v244_v58 = vunpack.c.l.s8.bf16 %v136_v54 }
  0xf2   :  { %1040 = vmatmul.mubr.bf16.gmra.mxu1 %v211_v59  ;;  %815 = vmatmul.mubr.bf16.gmra.mxu0 %v241_v60 }
  0xf3   :  { %1047 = vmatprep.mubr.bf16.mxu1 %v216_v61  ;;  %822 = vmatprep.mubr.bf16.mxu0 %v246_v62 }
  0xfa   :  { %1048 = vmatmul.mubr.bf16.gmra.mxu1 %v215_v1  ;;  %823 = vmatmul.mubr.bf16.gmra.mxu0 %v245_v2 }
  0xfb   :  { %1055 = vmatprep.mubr.bf16.mxu1 %v220_v3 }
 0x102   :  { %v3249_v7 = vpop.f32.mrf.mxu1  ;;  %1056 = vmatmul.mubr.bf16.gmra.mxu1 %v219_v5  ;;  %v3251_v8 = vpop.f32.mrf.mxu0 }
 0x103   :  { %1063 = vmatprep.mubr.bf16.mxu1 %v224_v6  ;;  %v248_v6 = vunpack.c.h.s8.bf16 %v136_v54  ;;  %v144_v54 = vld [vmem:[%s3745_s0 + $0x1b8] sm:$0xff] }
 0x104   :  { %v834_v9 = vpop.f32.mrf.mxu1  ;;  %v642_v11 = vpop.f32.mrf.mxu0 }
 0x106   :  { %v3256_v12 = vpop.f32.mrf.mxu1  ;;  %v3258_v14 = vpop.f32.mrf.mxu0 }
 0x108   :  { %v837_v16 = vpop.f32.mrf.mxu1  ;;  %v645_v17 = vpop.f32.mrf.mxu0 }
 0x109   :  { %v140_v16 = vld [vmem:[%s3745_s0 + $0x198] sm:$0xff] }
 0x10a   :  { %v3260_v18 = vpop.f32.mrf.mxu1  ;;  %1064 = vmatmul.mubr.bf16.gmra.mxu1 %v223_v13  ;;  %v3262_v19 = vpop.f32.mrf.mxu0  ;;  %v256_v42 = vunpack.c.h.s8.bf16 %v140_v16 }
 0x10b   :  { %1071 = vmatprep.mubr.bf16.mxu1 %v228_v15 }
 0x10c   :  { %v842_v21 = vpop.f32.mrf.mxu1  ;;  %v650_v22 = vpop.f32.mrf.mxu0 }
 0x10d   :  { %v247_v21 = vunpack.c.h.s8.bf16 %v135_v63 }
 0x10e   :  { %v3267_v23 = vpop.f32.mrf.mxu1  ;;  %v3269_v25 = vpop.f32.mrf.mxu0 }
 0x110   :  { %v845_v27 = vpop.f32.mrf.mxu1  ;;  %v653_v28 = vpop.f32.mrf.mxu0 }
 0x112   :  { %v3271_v29 = vpop.f32.mrf.mxu1  ;;  %1072 = vmatmul.mubr.bf16.gmra.mxu1 %v227_v24  ;;  %v3273_v30 = vpop.f32.mrf.mxu0  ;;  %v252_v24 = vunpack.c.l.s8.bf16 %v140_v16  ;;  %v143_v16 = vld [vmem:[%s3745_s0 + $0x1b0] sm:$0xff] }
 0x113   :  { %1079 = vmatprep.mubr.bf16.mxu1 %v232_v26 }
 0x114   :  { %v850_v31 = vpop.f32.mrf.mxu1  ;;  %v658_v33 = vpop.f32.mrf.mxu0 }
 0x116   :  { %v3278_v34 = vpop.f32.mrf.mxu1  ;;  %v3280_v36 = vpop.f32.mrf.mxu0 }
 0x118   :  { %v853_v38 = vpop.f32.mrf.mxu1  ;;  %v661_v39 = vpop.f32.mrf.mxu0 }
 0x119   :  { %v251_v38 = vunpack.c.l.s8.bf16 %v139_v32 }
 0x11a   :  { %v3282_v40 = vpop.f32.mrf.mxu1  ;;  %1080 = vmatmul.mubr.bf16.gmra.mxu1 %v231_v35  ;;  %v3284_v41 = vpop.f32.mrf.mxu0 }
 0x11b   :  { %1087 = vmatprep.mubr.bf16.mxu1 %v236_v37 }
 0x11c   :  { %v858_v43 = vpop.f32.mrf.mxu1  ;;  %v666_v44 = vpop.f32.mrf.mxu0 }
 0x11e   :  { %v3289_v45 = vpop.f32.mrf.mxu1  ;;  %v3291_v47 = vpop.f32.mrf.mxu0 }
 0x120   :  { %v861_v49 = vpop.f32.mrf.mxu1  ;;  %v669_v50 = vpop.f32.mrf.mxu0 }
 0x122   :  { %v3293_v51 = vpop.f32.mrf.mxu1  ;;  %1088 = vmatmul.mubr.bf16.gmra.mxu1 %v235_v46  ;;  %v3295_v52 = vpop.f32.mrf.mxu0 }
 0x123   :  { %1095 = vmatprep.mubr.bf16.mxu1 %v240_v48  ;;  %v1446_v46 = vpop.permute.xlu0 %1445 }
 0x124   :  { %v866_v53 = vpop.f32.mrf.mxu1  ;;  %v674_v0 = vpop.f32.mrf.mxu0 }
 0x126   :  { %v3300_v55 = vpop.f32.mrf.mxu1  ;;  %v3302_v57 = vpop.f32.mrf.mxu0 }
 0x128   :  { %v869_v59 = vpop.f32.mrf.mxu1  ;;  %v677_v60 = vpop.f32.mrf.mxu0 }
 0x12a   :  { %v3304_v61 = vpop.f32.mrf.mxu1  ;;  %1096 = vmatmul.mubr.bf16.gmra.mxu1 %v239_v56  ;;  %v3306_v62 = vpop.f32.mrf.mxu0 }
 0x12b   :  { %1103 = vmatprep.mubr.bf16.mxu1 %v244_v58  ;;  %v255_v58 = vunpack.c.h.s8.bf16 %v139_v32 }
 0x12c   :  { %v874_v1 = vpop.f32.mrf.mxu1  ;;  %v682_v2 = vpop.f32.mrf.mxu0 }
 0x12d   :  { %v260_v1 = vunpack.c.l.s8.bf16 %v144_v54  ;;  %v1451_v2 = vpop.permute.xlu0 %1450 }
 0x12e   :  { %v3311_v3 = vpop.f32.mrf.mxu1  ;;  %v3313_v5 = vpop.f32.mrf.mxu0 }
 0x130   :  { %v877_v9 = vpop.f32.mrf.mxu1  ;;  %v685_v10 = vpop.f32.mrf.mxu0 }
 0x132   :  { %v3315_v11 = vpop.f32.mrf.mxu1  ;;  %1104 = vmatmul.mubr.bf16.gmra.mxu1 %v243_v4  ;;  %v3317_v13 = vpop.f32.mrf.mxu0 }
 0x133   :  { %1111 = vmatprep.mubr.bf16.mxu1 %v248_v6 }
 0x134   :  { %v882_v15 = vpop.f32.mrf.mxu1  ;;  %v690_v17 = vpop.f32.mrf.mxu0 }
 0x135   :  { %v1456_v17 = vpop.permute.xlu1 %1455 }
 0x136   :  { %v3322_v20 = vpop.f32.mrf.mxu1  ;;  %v3324_v22 = vpop.f32.mrf.mxu0 }
 0x138   :  { %v885_v26 = vpop.f32.mrf.mxu1  ;;  %v693_v27 = vpop.f32.mrf.mxu0 }
 0x139   :  { %v259_v26 = vunpack.c.l.s8.bf16 %v143_v16 }
 0x13a   :  { %v3326_v28 = vpop.f32.mrf.mxu1  ;;  %1112 = vmatmul.mubr.bf16.gmra.mxu1 %v247_v21  ;;  %v3328_v31 = vpop.f32.mrf.mxu0 }
 0x13b   :  { %1119 = vmatprep.mubr.bf16.mxu1 %v252_v24 }
 0x13c   :  { %v890_v33 = vpop.f32.mrf.mxu1  ;;  %v698_v35 = vpop.f32.mrf.mxu0 }
 0x13d   :  { %v264_v35 = vunpack.c.h.s8.bf16 %v144_v54 }
 0x13e   :  { %v3333_v37 = vpop.f32.mrf.mxu1  ;;  %v3335_v39 = vpop.f32.mrf.mxu0 }
 0x140   :  { %v893_v43 = vpop.f32.mrf.mxu1  ;;  %v701_v44 = vpop.f32.mrf.mxu0 }
 0x142   :  { %v929_v48 = vpop.f32.mrf.mxu1  ;;  %1120 = vmatmul.mubr.bf16.gmra.mxu1 %v251_v38  ;;  %v3337_v49 = vpop.f32.mrf.mxu0 }
 0x143   :  { %v930_v50 = vadd.f32 %v929_v48, %v3251_v8  ;;  %1127 = vmatprep.mubr.bf16.mxu1 %v256_v42  ;;  %v1461_v42 = vpop.permute.xlu1 %1460 }
 0x144   :  { %v931_v53 = vpop.f32.mrf.mxu1  ;;  %v706_v0 = vpop.f32.mrf.mxu0 }
 0x145   :  { %v1763_v63 = vmul.f32 %v1446_v46, %v930_v50  ;;  %v148_v53 = vld [vmem:[%s3745_s0 + $0x1d8] sm:$0xff]  ;;  %v1466_v0 = vpop.permute.xlu0 %1465 }
 0x146   :  { %v932_v56 = vpop.f32.mrf.mxu1  ;;  %v3343_v59 = vpop.f32.mrf.mxu0 }
 0x147   :  { %v933_v60 = vadd.f32 %v932_v56, %v3258_v14  ;;  %2514 = vmatprep.mubr.f32.mxu0 %v1763_v63  ;;  %v263_v56 = vunpack.c.h.s8.bf16 %v143_v16  ;;  %v147_v16 = vld [vmem:[%s3745_s0 + $0x1d0] sm:$0xff] }
 0x148   :  { %v934_v4 = vpop.f32.mrf.mxu1  ;;  %v709_v6 = vpop.f32.mrf.mxu0 }
 0x149   :  { %v1764_v15 = vmul.f32 %v1451_v2, %v933_v60  ;;  %v1471_v4 = vpop.permute.xlu1 %1470 }
 0x14a   :  { %v937_v8 = vpop.f32.mrf.mxu1  ;;  %1128 = vmatmul.mubr.bf16.gmra.mxu1 %v255_v58  ;;  %v3346_v9 = vpop.f32.mrf.mxu0 }
 0x14b   :  { %v938_v10 = vadd.f32 %v937_v8, %v3262_v19  ;;  %1135 = vmatprep.mubr.bf16.mxu1 %v260_v1  ;;  %2515 = vmatmul.mubr.f32.vlgmr.msra.gmra.mxu0 %v1764_v15  ;;  %v268_v1 = vunpack.c.l.s8.bf16 %v148_v53 }
 0x14c   :  { %v939_v14 = vpop.f32.mrf.mxu1  ;;  %v714_v21 = vpop.f32.mrf.mxu0 }
 0x14d   :  { %v1765_v33 = vmul.f32 %v1456_v17, %v938_v10  ;;  %v1476_v14 = vpop.permute.xlu0 %1475 }
 0x14e   :  { %v940_v24 = vpop.f32.mrf.mxu1  ;;  %v3352_v27 = vpop.f32.mrf.mxu0 }
 0x14f   :  { %v941_v32 = vadd.f32 %v940_v24, %v3269_v25  ;;  %2517 = vmatprep.mubr.f32.mxu0 %v1765_v33  ;;  %v267_v24 = vunpack.c.l.s8.bf16 %v147_v16 }
 0x150   :  { %v942_v38 = vpop.f32.mrf.mxu1  ;;  %v717_v19 = vpop.f32.mrf.mxu0 }
 0x151   :  { %v1766_v48 = vmul.f32 %v1461_v42, %v941_v32  ;;  %v1481_v19 = vpop.permute.xlu1 %1480 }
 0x152   :  { %v945_v43 = vpop.f32.mrf.mxu1  ;;  %1136 = vmatmul.mubr.bf16.gmra.mxu1 %v259_v26  ;;  %v3355_v44 = vpop.f32.mrf.mxu0 }
 0x153   :  { %v946_v46 = vadd.f32 %v945_v43, %v3273_v30  ;;  %1143 = vmatprep.mubr.bf16.mxu1 %v264_v35  ;;  %2518 = vmatmul.mubr.f32.gmra.mxu0 %v1766_v48  ;;  %v272_v35 = vunpack.c.h.s8.bf16 %v148_v53 }
 0x154   :  { %v947_v50 = vpop.f32.mrf.mxu1  ;;  %v722_v25 = vpop.f32.mrf.mxu0 }
 0x155   :  { %v1767_v63 = vmul.f32 %v1466_v0, %v946_v46  ;;  %v152_v25 = vld [vmem:[%s3745_s0 + $0x1f8] sm:$0xff] }
 0x156   :  { %v948_v54 = vpop.f32.mrf.mxu1  ;;  %v3361_v58 = vpop.f32.mrf.mxu0 }
 0x157   :  { %v949_v60 = vadd.f32 %v948_v54, %v3280_v36  ;;  %2520 = vmatprep.mubr.f32.mxu0 %v1767_v63  ;;  %v271_v54 = vunpack.c.h.s8.bf16 %v147_v16  ;;  %v276_v63 = vunpack.c.l.s8.bf16 %v152_v25 }
 0x158   :  { %v950_v2 = vpop.f32.mrf.mxu1  ;;  %v725_v30 = vpop.f32.mrf.mxu0 }
 0x159   :  { %v1768_v15 = vmul.f32 %v1471_v4, %v949_v60 }
 0x15a   :  { %v953_v6 = vpop.f32.mrf.mxu1  ;;  %1144 = vmatmul.mubr.bf16.gmra.mxu1 %v263_v56  ;;  %v3364_v8 = vpop.f32.mrf.mxu0 }
 0x15b   :  { %v954_v10 = vadd.f32 %v953_v6, %v3284_v41  ;;  %1151 = vmatprep.mubr.bf16.mxu1 %v268_v1  ;;  %2521 = vmatmul.mubr.f32.gmra.mxu0 %v1768_v15  ;;  %v151_v15 = vld [vmem:[%s3745_s0 + $0x1f0] sm:$0xff] }
 0x15c   :  { %v955_v17 = vpop.f32.mrf.mxu1  ;;  %v730_v36 = vpop.f32.mrf.mxu0 }
 0x15d   :  { %v1769_v32 = vmul.f32 %v1476_v14, %v954_v10 }
 0x15e   :  { %v956_v21 = vpop.f32.mrf.mxu1  ;;  %v3370_v26 = vpop.f32.mrf.mxu0 }
 0x15f   :  { %v957_v33 = vadd.f32 %v956_v21, %v3291_v47  ;;  %2523 = vmatprep.mubr.f32.mxu0 %v1769_v32  ;;  %v1486_v47 = vpop.permute.xlu0 %1485  ;;  %v275_v21 = vunpack.c.l.s8.bf16 %v151_v15 }
 0x160   :  { %v958_v38 = vpop.f32.mrf.mxu1  ;;  %v733_v41 = vpop.f32.mrf.mxu0 }
 0x161   :  { %v1770_v46 = vmul.f32 %v1481_v19, %v957_v33  ;;  %v280_v33 = vunpack.c.h.s8.bf16 %v152_v25 }
 0x162   :  { %v961_v42 = vpop.f32.mrf.mxu1  ;;  %1152 = vmatmul.mubr.bf16.gmra.mxu1 %v267_v24  ;;  %v3373_v43 = vpop.f32.mrf.mxu0 }
 0x163   :  { %v962_v48 = vadd.f32 %v961_v42, %v3295_v52  ;;  %1159 = vmatprep.mubr.bf16.mxu1 %v272_v35  ;;  %2524 = vmatmul.mubr.f32.gmra.mxu0 %v1770_v46  ;;  %v1491_v52 = vpop.permute.xlu1 %1490  ;;  %v1496_v36 = vpop.permute.xlu0 %1495 }
 0x164   :  { %v963_v50 = vpop.f32.mrf.mxu1  ;;  %v738_v0 = vpop.f32.mrf.mxu0 }
 0x165   :  { %v1771_v1 = vmul.f32 %v1486_v47, %v962_v48 }
 0x166   :  { %v964_v53 = vpop.f32.mrf.mxu1  ;;  %v3379_v56 = vpop.f32.mrf.mxu0 }
 0x167   :  { %v965_v60 = vadd.f32 %v964_v53, %v3302_v57  ;;  %2526 = vmatprep.mubr.f32.mxu0 %v1771_v1  ;;  %v1501_v41 = vpop.permute.xlu1 %1500  ;;  %v1506_v47 = vpop.permute.xlu0 %1505 }
 0x168   :  { %v966_v2 = vpop.f32.mrf.mxu1  ;;  %v741_v30 = vpop.f32.mrf.mxu0 }
 0x169   :  { %v1772_v16 = vmul.f32 %v1491_v52, %v965_v60 }
 0x16a   :  { %v969_v4 = vpop.f32.mrf.mxu1  ;;  %1160 = vmatmul.mubr.bf16.gmra.mxu1 %v271_v54  ;;  %v3382_v6 = vpop.f32.mrf.mxu0 }
 0x16b   :  { %v970_v10 = vadd.f32 %v969_v4, %v3306_v62  ;;  %1167 = vmatprep.mubr.bf16.mxu1 %v276_v63  ;;  %2527 = vmatmul.mubr.f32.gmra.mxu0 %v1772_v16  ;;  %v1511_v2 = vpop.permute.xlu1 %1510 }
 0x16c   :  { %v971_v17 = vpop.f32.mrf.mxu1  ;;  %v746_v57 = vpop.f32.mrf.mxu0 }
 0x16d   :  { %v1773_v35 = vmul.f32 %v1496_v36, %v970_v10  ;;  %v1516_v17 = vpop.permute.xlu0 %1515 }
 0x16e   :  { %v972_v14 = vpop.f32.mrf.mxu1  ;;  %v3388_v24 = vpop.f32.mrf.mxu0 }
 0x16f   :  { %v973_v32 = vadd.f32 %v972_v14, %v3313_v5  ;;  %2529 = vmatprep.mubr.f32.mxu0 %v1773_v35  ;;  %v279_v5 = vunpack.c.h.s8.bf16 %v151_v15 }
 0x170   :  { %v974_v38 = vpop.f32.mrf.mxu1  ;;  %v749_v62 = vpop.f32.mrf.mxu0 }
 0x171   :  { %v1774_v48 = vmul.f32 %v1501_v41, %v973_v32  ;;  %v1521_v32 = vpop.permute.xlu1 %1520 }
 0x172   :  { %v977_v19 = vpop.f32.mrf.mxu1  ;;  %1168 = vmatmul.mubr.bf16.gmra.mxu1 %v275_v21  ;;  %v3391_v42 = vpop.f32.mrf.mxu0 }
 0x173   :  { %v978_v46 = vadd.f32 %v977_v19, %v3317_v13  ;;  %1175 = vmatprep.mubr.bf16.mxu1 %v280_v33  ;;  %2530 = vmatmul.mubr.f32.gmra.mxu0 %v1774_v48  ;;  %v1526_v19 = vpop.permute.xlu0 %1525 }
 0x174   :  { %v979_v50 = vpop.f32.mrf.mxu1  ;;  %v754_v0 = vpop.f32.mrf.mxu0 }
 0x175   :  { %v1775_v60 = vmul.f32 %v1506_v47, %v978_v46 }
 0x176   :  { %v980_v53 = vpop.f32.mrf.mxu1  ;;  %v3394_v25 = vpop.f32.mrf.mxu0 }
 0x177   :  { %v981_v54 = vadd.f32 %v980_v53, %v3324_v22  ;;  %2532 = vmatprep.mubr.f32.mxu0 %v1775_v60  ;;  %v1531_v53 = vpop.permute.xlu1 %1530 }
 0x178   :  { %v982_v63 = vpop.f32.mrf.mxu1  ;;  %v757_v1 = vpop.f32.mrf.mxu0 }
 0x179   :  { %v1776_v4 = vmul.f32 %v1511_v2, %v981_v54  ;;  %v1536_v2 = vpop.permute.xlu0 %1535 }
 0x17a   :  { %v985_v30 = vpop.f32.mrf.mxu1  ;;  %1176 = vmatmul.mubr.bf16.gmra.mxu1 %v279_v5  ;;  %v3397_v13 = vpop.f32.mrf.mxu0 }
 0x17b   :  { %v986_v52 = vadd.f32 %v985_v30, %v3328_v31  ;;  %2533 = vmatmul.mubr.f32.gmra.mxu0 %v1776_v4 }
 0x17c   :  { %v987_v10 = vpop.f32.mrf.mxu1  ;;  %v762_v16 = vpop.f32.mrf.mxu0 }
 0x17d   :  { %v1777_v36 = vmul.f32 %v1516_v17, %v986_v52  ;;  %v1541_v17 = vpop.permute.xlu1 %1540 }
 0x17e   :  { %v988_v15 = vpop.f32.mrf.mxu1  ;;  %v3400_v57 = vpop.f32.mrf.mxu0 }
 0x17f   :  { %v989_v22 = vadd.f32 %v988_v15, %v3335_v39  ;;  %2535 = vmatprep.mubr.f32.mxu0 %v1777_v36 }
 0x180   :  { %v990_v14 = vpop.f32.mrf.mxu1  ;;  %v765_v21 = vpop.f32.mrf.mxu0 }
 0x181   :  { %v1778_v38 = vmul.f32 %v1521_v32, %v989_v22  ;;  %v1546_v32 = vpop.permute.xlu0 %1545 }
 0x182   :  { %v993_v33 = vpop.f32.mrf.mxu1  ;;  %v3403_v35 = vpop.f32.mrf.mxu0 }
 0x183   :  { %v994_v31 = vadd.f32 %v993_v33, %v3337_v49  ;;  %2536 = vmatmul.mubr.f32.gmra.mxu0 %v1778_v38 }
 0x184   :  { %v995_v62 = vpop.f32.mrf.mxu1  ;;  %v770_v41 = vpop.f32.mrf.mxu0 }
 0x185   :  { %v1779_v50 = vmul.f32 %v1526_v19, %v994_v31  ;;  %v1551_v19 = vpop.permute.xlu1 %1550 }
 0x186   :  { %v996_v46 = vpop.f32.mrf.mxu1  ;;  %v3406_v48 = vpop.f32.mrf.mxu0 }
 0x187   :  { %v997_v39 = vadd.f32 %v996_v46, %v3343_v59  ;;  %2538 = vmatprep.mubr.f32.mxu0 %v1779_v50 }
 0x188   :  { %v998_v0 = vpop.f32.mrf.mxu1  ;;  %v773_v47 = vpop.f32.mrf.mxu0 }
 0x189   :  { %v1780_v60 = vmul.f32 %v1531_v53, %v997_v39  ;;  %v1556_v53 = vpop.permute.xlu0 %1555 }
 0x18a   :  { %v1001_v5 = vpop.f32.mrf.mxu1  ;;  %v3409_v54 = vpop.f32.mrf.mxu0 }
 0x18b   :  { %v1002_v49 = vadd.f32 %v1001_v5, %v3346_v9  ;;  %2539 = vmatmul.mubr.f32.gmra.mxu0 %v1780_v60 }
 0x18c   :  { %v1003_v63 = vpop.f32.mrf.mxu1  ;;  %v778_v1 = vpop.f32.mrf.mxu0 }
 0x18d   :  { %v1781_v4 = vmul.f32 %v1536_v2, %v1002_v49  ;;  %v1561_v2 = vpop.permute.xlu1 %1560 }
 0x18e   :  { %v1004_v30 = vpop.f32.mrf.mxu1  ;;  %v3412_v52 = vpop.f32.mrf.mxu0 }
 0x18f   :  { %v1005_v59 = vadd.f32 %v1004_v30, %v3352_v27  ;;  %2541 = vmatprep.mubr.f32.mxu0 %v1781_v4 }
 0x190   :  { %v1006_v10 = vpop.f32.mrf.mxu1  ;;  %v781_v16 = vpop.f32.mrf.mxu0 }
 0x191   :  { %v1782_v36 = vmul.f32 %v1541_v17, %v1005_v59  ;;  %v1566_v17 = vpop.permute.xlu0 %1565 }
 0x192   :  { %v1009_v15 = vpop.f32.mrf.mxu1  ;;  %v3415_v22 = vpop.f32.mrf.mxu0 }
 0x193   :  { %v1010_v9 = vadd.f32 %v1009_v15, %v3355_v44  ;;  %2542 = vmatmul.mubr.f32.gmra.mxu0 %v1782_v36 }
 0x194   :  { %v1011_v14 = vpop.f32.mrf.mxu1  ;;  %v786_v21 = vpop.f32.mrf.mxu0 }
 0x195   :  { %v1783_v38 = vmul.f32 %v1546_v32, %v1010_v9  ;;  %v1571_v32 = vpop.permute.xlu1 %1570 }
 0x196   :  { %v1012_v33 = vpop.f32.mrf.mxu1  ;;  %v3418_v31 = vpop.f32.mrf.mxu0 }
 0x197   :  { %v1013_v27 = vadd.f32 %v1012_v33, %v3361_v58  ;;  %2544 = vmatprep.mubr.f32.mxu0 %v1783_v38 }
 0x198   :  { %v1014_v62 = vpop.f32.mrf.mxu1  ;;  %v789_v41 = vpop.f32.mrf.mxu0 }
 0x199   :  { %v1784_v50 = vmul.f32 %v1551_v19, %v1013_v27  ;;  %v1576_v19 = vpop.permute.xlu0 %1575 }
 0x19a   :  { %v1017_v46 = vpop.f32.mrf.mxu1  ;;  %v3421_v39 = vpop.f32.mrf.mxu0 }
 0x19b   :  { %v1018_v44 = vadd.f32 %v1017_v46, %v3364_v8  ;;  %2545 = vmatmul.mubr.f32.gmra.mxu0 %v1784_v50 }
 0x19c   :  { %v1019_v0 = vpop.f32.mrf.mxu1  ;;  %v794_v47 = vpop.f32.mrf.mxu0 }
 0x19d   :  { %v1785_v60 = vmul.f32 %v1556_v53, %v1018_v44  ;;  %v1581_v53 = vpop.permute.xlu1 %1580 }
 0x19e   :  { %v1020_v5 = vpop.f32.mrf.mxu1  ;;  %v3424_v49 = vpop.f32.mrf.mxu0 }
 0x19f   :  { %v1021_v58 = vadd.f32 %v1020_v5, %v3370_v26  ;;  %2547 = vmatprep.mubr.f32.mxu0 %v1785_v60 }
 0x1a0   :  { %v1022_v63 = vpop.f32.mrf.mxu1  ;;  %v797_v1 = vpop.f32.mrf.mxu0 }
 0x1a1   :  { %v1786_v4 = vmul.f32 %v1561_v2, %v1021_v58  ;;  %v1586_v2 = vpop.permute.xlu0 %1585 }
 0x1a2   :  { %v1025_v30 = vpop.f32.mrf.mxu1  ;;  %v3427_v59 = vpop.f32.mrf.mxu0 }
 0x1a3   :  { %v1026_v8 = vadd.f32 %v1025_v30, %v3373_v43  ;;  %2548 = vmatmul.mubr.f32.gmra.mxu0 %v1786_v4 }
 0x1a4   :  { %v1027_v10 = vpop.f32.mrf.mxu1  ;;  %v802_v16 = vpop.f32.mrf.mxu0 }
 0x1a5   :  { %v1787_v36 = vmul.f32 %v1566_v17, %v1026_v8  ;;  %v1591_v17 = vpop.permute.xlu1 %1590 }
 0x1a6   :  { %v1028_v15 = vpop.f32.mrf.mxu1  ;;  %v3430_v9 = vpop.f32.mrf.mxu0 }
 0x1a7   :  { %v1029_v26 = vadd.f32 %v1028_v15, %v3379_v56  ;;  %2550 = vmatprep.mubr.f32.mxu0 %v1787_v36 }
 0x1a8   :  { %v1030_v14 = vpop.f32.mrf.mxu1  ;;  %v805_v21 = vpop.f32.mrf.mxu0 }
 0x1a9   :  { %v1788_v38 = vmul.f32 %v1571_v32, %v1029_v26  ;;  %v1596_v32 = vpop.permute.xlu0 %1595 }
 0x1aa   :  { %v1033_v33 = vpop.f32.mrf.mxu1  ;;  %v3433_v27 = vpop.f32.mrf.mxu0 }
 0x1ab   :  { %v1034_v43 = vadd.f32 %v1033_v33, %v3382_v6  ;;  %2551 = vmatmul.mubr.f32.gmra.mxu0 %v1788_v38 }
 0x1ac   :  { %v1035_v62 = vpop.f32.mrf.mxu1  ;;  %v810_v41 = vpop.f32.mrf.mxu0 }
 0x1ad   :  { %v1789_v50 = vmul.f32 %v1576_v19, %v1034_v43  ;;  %v1601_v19 = vpop.permute.xlu1 %1600 }
 0x1ae   :  { %v1036_v46 = vpop.f32.mrf.mxu1  ;;  %v3436_v44 = vpop.f32.mrf.mxu0 }
 0x1af   :  { %v1037_v56 = vadd.f32 %v1036_v46, %v3388_v24  ;;  %2553 = vmatprep.mubr.f32.mxu0 %v1789_v50 }
 0x1b0   :  { %v1038_v0 = vpop.f32.mrf.mxu1  ;;  %v813_v47 = vpop.f32.mrf.mxu0 }
 0x1b1   :  { %v1790_v60 = vmul.f32 %v1581_v53, %v1037_v56  ;;  %v1606_v0 = vpop.permute.xlu0 %1605 }
 0x1b2   :  { %v1041_v5 = vpop.f32.mrf.mxu1  ;;  %v3439_v58 = vpop.f32.mrf.mxu0 }
 0x1b3   :  { %v1042_v6 = vadd.f32 %v1041_v5, %v3391_v42  ;;  %2554 = vmatmul.mubr.f32.gmra.mxu0 %v1790_v60  ;;  %v1611_v60 = vpop.permute.xlu1 %1610 }
 0x1b4   :  { %v1043_v63 = vpop.f32.mrf.mxu1  ;;  %v818_v1 = vpop.f32.mrf.mxu0 }
 0x1b5   :  { %v1791_v4 = vmul.f32 %v1586_v2, %v1042_v6 }
 0x1b6   :  { %v1044_v30 = vpop.f32.mrf.mxu1  ;;  %v3442_v8 = vpop.f32.mrf.mxu0 }
 0x1b7   :  { %v1045_v24 = vadd.f32 %v1044_v30, %v3394_v25  ;;  %2556 = vmatprep.mubr.f32.mxu0 %v1791_v4  ;;  %v1616_v30 = vpop.permute.xlu0 %1615 }
 0x1b8   :  { %v1046_v10 = vpop.f32.mrf.mxu1  ;;  %v821_v16 = vpop.f32.mrf.mxu0 }
 0x1b9   :  { %v1792_v36 = vmul.f32 %v1591_v17, %v1045_v24  ;;  %v1621_v16 = vpop.permute.xlu1 %1620 }
 0x1ba   :  { %v1049_v15 = vpop.f32.mrf.mxu1  ;;  %v3445_v26 = vpop.f32.mrf.mxu0 }
 0x1bb   :  { %v1050_v42 = vadd.f32 %v1049_v15, %v3397_v13  ;;  %2557 = vmatmul.mubr.f32.gmra.mxu0 %v1792_v36  ;;  %v1626_v36 = vpop.permute.xlu0 %1625 }
 0x1bc   :  { %v1051_v14 = vpop.f32.mrf.mxu1  ;;  %v826_v21 = vpop.f32.mrf.mxu0 }
 0x1bd   :  { %v1793_v38 = vmul.f32 %v1596_v32, %v1050_v42 }
 0x1be   :  { %v1052_v33 = vpop.f32.mrf.mxu1  ;;  %v3448_v43 = vpop.f32.mrf.mxu0 }
 0x1bf   :  { %v1053_v25 = vadd.f32 %v1052_v33, %v3400_v57  ;;  %2559 = vmatprep.mubr.f32.mxu0 %v1793_v38  ;;  %v1631_v33 = vpop.permute.xlu1 %1630 }
 0x1c0   :  { %v1054_v62 = vpop.f32.mrf.mxu1  ;;  %v829_v41 = vpop.f32.mrf.mxu0 }
 0x1c1   :  { %v1794_v50 = vmul.f32 %v1601_v19, %v1053_v25  ;;  %v1636_v41 = vpop.permute.xlu0 %1635 }
 0x1c2   :  { %v1057_v46 = vpop.f32.mrf.mxu1 }
 0x1c3   :  { %v1058_v56 = vadd.f32 %v1057_v46, %v3403_v35  ;;  %2560 = vmatmul.mubr.f32.gmra.mxu0 %v1794_v50  ;;  %v1641_v50 = vpop.permute.xlu1 %1640 }
 0x1c4   :  { %v1059_v13 = vpop.f32.mrf.mxu1 }
 0x1c5   :  { %v1795_v5 = vmul.f32 %v1606_v0, %v1058_v56 }
 0x1c6   :  { %v1060_v47 = vpop.f32.mrf.mxu1 }
 0x1c7   :  { %v1061_v53 = vadd.f32 %v1060_v47, %v3406_v48  ;;  %2562 = vmatprep.mubr.f32.mxu0 %v1795_v5 }
 0x1c8   :  { %v1062_v6 = vpop.f32.mrf.mxu1 }
 0x1c9   :  { %v1796_v1 = vmul.f32 %v1611_v60, %v1061_v53  ;;  %v1646_v53 = vpop.permute.xlu0 %1645 }
 0x1ca   :  { %v1065_v57 = vpop.f32.mrf.mxu1 }
 0x1cb   :  { %v1066_v63 = vadd.f32 %v1065_v57, %v3409_v54  ;;  %2563 = vmatmul.mubr.f32.gmra.mxu0 %v1796_v1  ;;  %v1651_v57 = vpop.permute.xlu1 %1650 }
 0x1cc   :  { %v1067_v2 = vpop.f32.mrf.mxu1 }
 0x1cd   :  { %v1797_v4 = vmul.f32 %v1616_v30, %v1066_v63  ;;  %v1656_v30 = vpop.permute.xlu0 %1655 }
 0x1ce   :  { %v1068_v24 = vpop.f32.mrf.mxu1 }
 0x1cf   :  { %v1069_v35 = vadd.f32 %v1068_v24, %v3412_v52  ;;  %2565 = vmatprep.mubr.f32.mxu0 %v1797_v4 }
 0x1d0   :  { %v1070_v10 = vpop.f32.mrf.mxu1 }
 0x1d1   :  { %v1798_v15 = vmul.f32 %v1621_v16, %v1069_v35  ;;  %v1661_v10 = vpop.permute.xlu1 %1660 }
 0x1d2   :  { %v1073_v17 = vpop.f32.mrf.mxu1 }
 0x1d3   :  { %v1074_v48 = vadd.f32 %v1073_v17, %v3415_v22  ;;  %2566 = vmatmul.mubr.f32.gmra.mxu0 %v1798_v15  ;;  %v1666_v15 = vpop.permute.xlu0 %1665 }
 0x1d4   :  { %v1075_v42 = vpop.f32.mrf.mxu1 }
 0x1d5   :  { %v1799_v21 = vmul.f32 %v1626_v36, %v1074_v48 }
 0x1d6   :  { %v1076_v14 = vpop.f32.mrf.mxu1 }
 0x1d7   :  { %v1077_v54 = vadd.f32 %v1076_v14, %v3418_v31  ;;  %2568 = vmatprep.mubr.f32.mxu0 %v1799_v21 }
 0x1d8   :  { %v1078_v32 = vpop.f32.mrf.mxu1 }
 0x1d9   :  { %v1800_v38 = vmul.f32 %v1631_v33, %v1077_v54  ;;  %v1671_v54 = vpop.permute.xlu1 %1670 }
 0x1da   :  { %v1081_v25 = vpop.f32.mrf.mxu1 }
 0x1db   :  { %v1082_v52 = vadd.f32 %v1081_v25, %v3421_v39  ;;  %2569 = vmatmul.mubr.f32.gmra.mxu0 %v1800_v38  ;;  %v1676_v25 = vpop.permute.xlu0 %1675 }
 0x1dc   :  { %v1083_v62 = vpop.f32.mrf.mxu1 }
 0x1dd   :  { %v1801_v46 = vmul.f32 %v1636_v41, %v1082_v52  ;;  %v1681_v41 = vpop.permute.xlu1 %1680 }
 0x1de   :  { %v1084_v19 = vpop.f32.mrf.mxu1 }
 0x1df   :  { %v1085_v22 = vadd.f32 %v1084_v19, %v3424_v49  ;;  %2571 = vmatprep.mubr.f32.mxu0 %v1801_v46 }
 0x1e0   :  { %v1086_v56 = vpop.f32.mrf.mxu1 }
 0x1e1   :  { %v1802_v0 = vmul.f32 %v1641_v50, %v1085_v22  ;;  %v1686_v56 = vpop.permute.xlu0 %1685 }
 0x1e2   :  { %v1089_v13 = vpop.f32.mrf.mxu1 }
 0x1e3   :  { %v1090_v31 = vadd.f32 %v1089_v13, %v3427_v59  ;;  %2572 = vmatmul.mubr.f32.gmra.mxu0 %v1802_v0  ;;  %v1691_v0 = vpop.permute.xlu1 %1690 }
 0x1e4   :  { %v1091_v47 = vpop.f32.mrf.mxu1 }
 0x1e5   :  { %v1803_v6 = vmul.f32 %v1646_v53, %v1090_v31  ;;  %v3473_v53 = vld [vmem:[%s3748_s4] ss:$0 sm:$0xff] }
 0x1e6   :  { %v1092_v5 = vpop.f32.mrf.mxu1 }
 0x1e7   :  { %v1093_v39 = vadd.f32 %v1092_v5, %v3430_v9  ;;  %2574 = vmatprep.mubr.f32.mxu0 %v1803_v6  ;;  %v1696_v6 = vpop.permute.xlu0 %1695 }
 0x1e8   :  { %v1094_v60 = vpop.f32.mrf.mxu1 }
 0x1e9   :  { %v1804_v1 = vmul.f32 %v1651_v57, %v1093_v39 }
 0x1ea   :  { %v1097_v63 = vpop.f32.mrf.mxu1 }
 0x1eb   :  { %v1098_v49 = vadd.f32 %v1097_v63, %v3433_v27  ;;  %2575 = vmatmul.mubr.f32.gmra.mxu0 %v1804_v1 }
 0x1ec   :  { %v1099_v2 = vpop.f32.mrf.mxu1 }
 0x1ed   :  { %v1805_v35 = vmul.f32 %v1656_v30, %v1098_v49  ;;  %v1701_v30 = vpop.permute.xlu1 %1700 }
 0x1ee   :  { %v1100_v24 = vpop.f32.mrf.mxu1 }
 0x1ef   :  { %v1101_v59 = vadd.f32 %v1100_v24, %v3436_v44  ;;  %2577 = vmatprep.mubr.f32.mxu0 %v1805_v35 }
 0x1f0   :  { %v1102_v4 = vpop.f32.mrf.mxu1 }
 0x1f1   :  { %v1806_v17 = vmul.f32 %v1661_v10, %v1101_v59 }
 0x1f2   :  { %v1105_v16 = vpop.f32.mrf.mxu1 }
 0x1f3   :  { %v1106_v9 = vadd.f32 %v1105_v16, %v3439_v58  ;;  %2578 = vmatmul.mubr.f32.gmra.mxu0 %v1806_v17  ;;  %v1706_v16 = vpop.permute.xlu0 %1705 }
 0x1f4   :  { %v1107_v48 = vpop.f32.mrf.mxu1 }
 0x1f5   :  { %v1807_v36 = vmul.f32 %v1666_v15, %v1106_v9 }
 0x1f6   :  { %v1108_v42 = vpop.f32.mrf.mxu1 }
 0x1f7   :  { %v1109_v27 = vadd.f32 %v1108_v42, %v3442_v8  ;;  %2580 = vmatprep.mubr.f32.mxu0 %v1807_v36 }
 0x1f8   :  { %v1110_v14 = vpop.f32.mrf.mxu1 }
 0x1f9   :  { %v1808_v32 = vmul.f32 %v1671_v54, %v1109_v27  ;;  %v1711_v14 = vpop.permute.xlu1 %1710 }
 0x1fa   :  { %v1113_v21 = vpop.f32.mrf.mxu1 }
 0x1fb   :  { %v1114_v44 = vadd.f32 %v1113_v21, %v3445_v26  ;;  %2581 = vmatmul.mubr.f32.gmra.mxu0 %v1808_v32 }
 0x1fc   :  { %v1115_v33 = vpop.f32.mrf.mxu1 }
 0x1fd   :  { %v1809_v38 = vmul.f32 %v1676_v25, %v1114_v44  ;;  %v1716_v25 = vpop.permute.xlu0 %1715 }
 0x1fe   :  { %v1116_v52 = vpop.f32.mrf.mxu1 }
 0x1ff   :  { %v1117_v58 = vadd.f32 %v1116_v52, %v3448_v43  ;;  %2583 = vmatprep.mubr.f32.mxu0 %v1809_v38 }
 0x200   :  { %v1118_v62 = vpop.f32.mrf.mxu1 }
 0x201   :  { %v1810_v22 = vmul.f32 %v1681_v41, %v1117_v58 }
 0x202   :  { %v1121_v19 = vpop.f32.mrf.mxu1 }
 0x203   :  { %v1122_v8 = vadd.f32 %v1121_v19, %v3249_v7  ;;  %2584 = vmatmul.mubr.f32.gmra.mxu0 %v1810_v22  ;;  %v1721_v22 = vpop.permute.xlu1 %1720 }
 0x204   :  { %v1123_v46 = vpop.f32.mrf.mxu1 }
 0x205   :  { %v1811_v13 = vmul.f32 %v1686_v56, %v1122_v8 }
 0x206   :  { %v1124_v50 = vpop.f32.mrf.mxu1 }
 0x207   :  { %v1125_v26 = vadd.f32 %v1124_v50, %v3256_v12  ;;  %2586 = vmatprep.mubr.f32.mxu0 %v1811_v13 }
 0x208   :  { %v1126_v31 = vpop.f32.mrf.mxu1 }
 0x209   :  { %v1812_v7 = vmul.f32 %v1691_v0, %v1125_v26  ;;  %v1726_v31 = vpop.permute.xlu0 %1725 }
 0x20a   :  { %v1129_v47 = vpop.f32.mrf.mxu1 }
 0x20b   :  { %v1130_v43 = vadd.f32 %v1129_v47, %v3260_v18  ;;  %v2516_v39 = vpop.f32.mrf.mxu0  ;;  %2587 = vmatmul.mubr.f32.gmra.mxu0 %v1812_v7 }
 0x20c   :  { %v1131_v5 = vpop.f32.mrf.mxu1  ;;  %v1922_v12 = vadd.f32 %v2516_v39, %v3473_v53 }
 0x20d   :  { %v1916_v63 = vpop.f32.mrf.mxu0  ;;  %v1813_v49 = vmul.f32 %v1696_v6, %v1130_v43 }
 0x20e   :  { %v1132_v60 = vpop.f32.mrf.mxu1  ;;  %v2236_v2 = vmax.f32 %v1922_v12, 0.0  ;;  %v1917_v18 = vadd.f32 %v3473_v53, %v1916_v63 }
 0x20f   :  { %v1133_v57 = vadd.f32 %v1132_v60, %v3267_v23  ;;  %2589 = vmatprep.mubr.f32.mxu0 %v1813_v49  ;;  %v1731_v60 = vpop.permute.xlu1 %1730 }
 0x210   :  { %v1134_v1 = vpop.f32.mrf.mxu1  ;;  %2300 = vst [vmem:[%s3749_s5 + $0x8] sm:$0xff] %v2236_v2  ;;  %v2235_v59 = vmax.f32 %v1917_v18, 0.0  ;;  %v1736_v2 = vpop.permute.xlu0 %1735 }
 0x211   :  { %v1814_v4 = vmul.f32 %v1701_v30, %v1133_v57 }
 0x212   :  { %v1137_v24 = vpop.f32.mrf.mxu1  ;;  %2299 = vst [vmem:[%s3749_s5] sm:$0xff] %v2235_v59 }
 0x213   :  { %v1138_v35 = vadd.f32 %v1137_v24, %v3271_v29  ;;  %v2519_v23 = vpop.f32.mrf.mxu0  ;;  %2590 = vmatmul.mubr.f32.gmra.mxu0 %v1814_v4 }
 0x214   :  { %v1139_v10 = vpop.f32.mrf.mxu1  ;;  %v1932_v17 = vadd.f32 %v2519_v23, %v3473_v53  ;;  %v1741_v23 = vpop.permute.xlu1 %1740 }
 0x215   :  { %v1926_v15 = vpop.f32.mrf.mxu0  ;;  %v1815_v42 = vmul.f32 %v1706_v16, %v1138_v35 }
 0x216   :  { %v1140_v9 = vpop.f32.mrf.mxu1  ;;  %v2238_v36 = vmax.f32 %v1932_v17, 0.0  ;;  %v1927_v29 = vadd.f32 %v3473_v53, %v1926_v15 }
 0x217   :  { %v1141_v48 = vadd.f32 %v1140_v9, %v3278_v34  ;;  %2592 = vmatprep.mubr.f32.mxu0 %v1815_v42  ;;  %v1746_v42 = vpop.permute.xlu0 %1745 }
 0x218   :  { %v1142_v27 = vpop.f32.mrf.mxu1  ;;  %2302 = vst [vmem:[%s3749_s5 + $0x18] sm:$0xff] %v2238_v36  ;;  %v2237_v21 = vmax.f32 %v1927_v29, 0.0 }
 0x219   :  { %v1816_v32 = vmul.f32 %v1711_v14, %v1141_v48 }
 0x21a   :  { %v1145_v54 = vpop.f32.mrf.mxu1  ;;  %2301 = vst [vmem:[%s3749_s5 + $0x10] sm:$0xff] %v2237_v21 }
 0x21b   :  { %v1146_v44 = vadd.f32 %v1145_v54, %v3282_v40  ;;  %v2522_v34 = vpop.f32.mrf.mxu0  ;;  %2593 = vmatmul.mubr.f32.gmra.mxu0 %v1816_v32  ;;  %v1751_v32 = vpop.permute.xlu1 %1750 }
 0x21c   :  { %v1147_v33 = vpop.f32.mrf.mxu1  ;;  %v1942_v58 = vadd.f32 %v2522_v34, %v3473_v53 }
 0x21d   :  { %v1936_v62 = vpop.f32.mrf.mxu0  ;;  %v1817_v41 = vmul.f32 %v1716_v25, %v1146_v44 }
 0x21e   :  { %v1148_v52 = vpop.f32.mrf.mxu1  ;;  %v2240_v8 = vmax.f32 %v1942_v58, 0.0  ;;  %v1937_v40 = vadd.f32 %v3473_v53, %v1936_v62 }
 0x21f   :  { %v1149_v38 = vadd.f32 %v1148_v52, %v3289_v45  ;;  %2595 = vmatprep.mubr.f32.mxu0 %v1817_v41 }
 0x220   :  { %v1150_v19 = vpop.f32.mrf.mxu1  ;;  %2304 = vst [vmem:[%s3749_s5 + $0x28] sm:$0xff] %v2240_v8  ;;  %v2239_v56 = vmax.f32 %v1937_v40, 0.0 }
 0x221   :  { %v1818_v26 = vmul.f32 %v1721_v22, %v1149_v38  ;;  %v1756_v38 = vpop.permute.xlu0 %1755 }
 0x222   :  { %v1153_v46 = vpop.f32.mrf.mxu1  ;;  %2303 = vst [vmem:[%s3749_s5 + $0x20] sm:$0xff] %v2239_v56  ;;  %v1761_v56 = vpop.permute.xlu1 %1760 }
 0x223   :  { %v1154_v50 = vadd.f32 %v1153_v46, %v3293_v51  ;;  %v2525_v45 = vpop.f32.mrf.mxu0  ;;  %2596 = vmatmul.mubr.f32.gmra.mxu0 %v1818_v26 }
 0x224   :  { %v1155_v13 = vpop.f32.mrf.mxu1  ;;  %v1952_v47 = vadd.f32 %v2525_v45, %v3473_v53 }
 0x225   :  { %v1946_v7 = vpop.f32.mrf.mxu0  ;;  %v1819_v5 = vmul.f32 %v1726_v31, %v1154_v50 }
 0x226   :  { %v1156_v0 = vpop.f32.mrf.mxu1  ;;  %v2242_v6 = vmax.f32 %v1952_v47, 0.0  ;;  %v1947_v51 = vadd.f32 %v3473_v53, %v1946_v7 }
 0x227   :  { %v1157_v43 = vadd.f32 %v1156_v0, %v3300_v55  ;;  %2598 = vmatprep.mubr.f32.mxu0 %v1819_v5 }
 0x228   :  { %v1158_v39 = vpop.f32.mrf.mxu1  ;;  %2306 = vst [vmem:[%s3749_s5 + $0x38] sm:$0xff] %v2242_v6  ;;  %v2241_v57 = vmax.f32 %v1947_v51, 0.0 }
 0x229   :  { %v1820_v49 = vmul.f32 %v1731_v60, %v1157_v43 }
 0x22a   :  { %v1161_v12 = vpop.f32.mrf.mxu1  ;;  %2305 = vst [vmem:[%s3749_s5 + $0x30] sm:$0xff] %v2241_v57 }
 0x22b   :  { %v1162_v63 = vadd.f32 %v1161_v12, %v3304_v61  ;;  %v2528_v55 = vpop.f32.mrf.mxu0  ;;  %2599 = vmatmul.mubr.f32.gmra.mxu0 %v1820_v49 }
 0x22c   :  { %v1163_v1 = vpop.f32.mrf.mxu1  ;;  %v1962_v30 = vadd.f32 %v2528_v55, %v3473_v53 }
 0x22d   :  { %v1956_v59 = vpop.f32.mrf.mxu0  ;;  %v1821_v35 = vmul.f32 %v1736_v2, %v1162_v63 }
 0x22e   :  { %v1164_v18 = vpop.f32.mrf.mxu1  ;;  %v2244_v10 = vmax.f32 %v1962_v30, 0.0  ;;  %v1957_v61 = vadd.f32 %v3473_v53, %v1956_v59 }
 0x22f   :  { %v1165_v24 = vadd.f32 %v1164_v18, %v3311_v3  ;;  %2601 = vmatprep.mubr.f32.mxu0 %v1821_v35 }
 0x230   :  { %v1166_v4 = vpop.f32.mrf.mxu1  ;;  %2308 = vst [vmem:[%s3749_s5 + $0x48] sm:$0xff] %v2244_v10  ;;  %v2243_v9 = vmax.f32 %v1957_v61, 0.0 }
 0x231   :  { %v1822_v48 = vmul.f32 %v1741_v23, %v1165_v24 }
 0x232   :  { %v1169_v16 = vpop.f32.mrf.mxu1  ;;  %2307 = vst [vmem:[%s3749_s5 + $0x40] sm:$0xff] %v2243_v9 }
 0x233   :  { %v1170_v17 = vadd.f32 %v1169_v16, %v3315_v11  ;;  %v2531_v3 = vpop.f32.mrf.mxu0  ;;  %2602 = vmatmul.mubr.f32.gmra.mxu0 %v1822_v48 }
 0x234   :  { %v1171_v15 = vpop.f32.mrf.mxu1  ;;  %v1972_v36 = vadd.f32 %v2531_v3, %v3473_v53 }
 0x235   :  { %v1966_v14 = vpop.f32.mrf.mxu0  ;;  %v1823_v54 = vmul.f32 %v1746_v42, %v1170_v17 }
 0x236   :  { %v1172_v27 = vpop.f32.mrf.mxu1  ;;  %v2246_v44 = vmax.f32 %v1972_v36, 0.0  ;;  %v1967_v11 = vadd.f32 %v3473_v53, %v1966_v14 }
 0x237   :  { %v1173_v29 = vadd.f32 %v1172_v27, %v3322_v20  ;;  %2604 = vmatprep.mubr.f32.mxu0 %v1823_v54 }
 0x238   :  { %v1174_v21 = vpop.f32.mrf.mxu1  ;;  %2310 = vst [vmem:[%s3749_s5 + $0x58] sm:$0xff] %v2246_v44  ;;  %v2245_v34 = vmax.f32 %v1967_v11, 0.0 }
 0x239   :  { %v1824_v52 = vmul.f32 %v1751_v32, %v1173_v29 }
 0x23a   :  { %v1177_v33 = vpop.f32.mrf.mxu1  ;;  %2309 = vst [vmem:[%s3749_s5 + $0x50] sm:$0xff] %v2245_v34 }
 0x23b   :  { %v1178_v25 = vadd.f32 %v1177_v33, %v3326_v28  ;;  %v2534_v20 = vpop.f32.mrf.mxu0  ;;  %2605 = vmatmul.mubr.f32.gmra.mxu0 %v1824_v52 }
 0x23c   :  { %v1179_v58 = vpop.f32.mrf.mxu1  ;;  %v1982_v41 = vadd.f32 %v2534_v20, %v3473_v53 }
 0x23d   :  { %v1976_v8 = vpop.f32.mrf.mxu0  ;;  %v1825_v40 = vmul.f32 %v1756_v38, %v1178_v25 }
 0x23e   :  { %v1180_v62 = vpop.f32.mrf.mxu1  ;;  %v2248_v46 = vmax.f32 %v1982_v41, 0.0  ;;  %v1977_v28 = vadd.f32 %v3473_v53, %v1976_v8 }
 0x23f   :  { %v1181_v19 = vadd.f32 %v1180_v62, %v3333_v37  ;;  %2607 = vmatprep.mubr.f32.mxu0 %v1825_v40 }
 0x240   :  { %v1182_v22 = vpop.f32.mrf.mxu1  ;;  %2312 = vst [vmem:[%s3749_s5 + $0x68] sm:$0xff] %v2248_v46  ;;  %v2247_v50 = vmax.f32 %v1977_v28, 0.0 }
 0x241   :  { %v1826_v26 = vmul.f32 %v1761_v56, %v1181_v19 }
 0x242   :  { %2311 = vst [vmem:[%s3749_s5 + $0x60] sm:$0xff] %v2247_v50 }
 0x243   :  { %v2537_v13 = vpop.f32.mrf.mxu0  ;;  %2608 = vmatmul.mubr.f32.gmra.mxu0 %v1826_v26 }
 0x244   :  { %v1992_v37 = vadd.f32 %v2537_v13, %v3473_v53 }
 0x245   :  { %v1986_v45 = vpop.f32.mrf.mxu0 }
 0x246   :  { %v2250_v31 = vmax.f32 %v1992_v37, 0.0  ;;  %v1987_v0 = vadd.f32 %v3473_v53, %v1986_v45 }
 0x248   :  { %2314 = vst [vmem:[%s3749_s5 + $0x78] sm:$0xff] %v2250_v31  ;;  %v2249_v47 = vmax.f32 %v1987_v0, 0.0 }
 0x24a   :  { %2313 = vst [vmem:[%s3749_s5 + $0x70] sm:$0xff] %v2249_v47 }
 0x24b   :  { %v2540_v43 = vpop.f32.mrf.mxu0 }
 0x24c   :  { %v2002_v7 = vadd.f32 %v2540_v43, %v3473_v53 }
 0x24d   :  { %v1996_v5 = vpop.f32.mrf.mxu0 }
 0x24e   :  { %v2252_v39 = vmax.f32 %v2002_v7, 0.0  ;;  %v1997_v6 = vadd.f32 %v3473_v53, %v1996_v5 }
 0x250   :  { %2316 = vst [vmem:[%s3749_s5 + $0x88] sm:$0xff] %v2252_v39  ;;  %v2251_v51 = vmax.f32 %v1997_v6, 0.0 }
 0x252   :  { %2315 = vst [vmem:[%s3749_s5 + $0x80] sm:$0xff] %v2251_v51 }
 0x253   :  { %v2543_v60 = vpop.f32.mrf.mxu0 }
 0x254   :  { %v2012_v12 = vadd.f32 %v2543_v60, %v3473_v53 }
 0x255   :  { %v2006_v57 = vpop.f32.mrf.mxu0 }
 0x256   :  { %v2254_v63 = vmax.f32 %v2012_v12, 0.0  ;;  %v2007_v49 = vadd.f32 %v3473_v53, %v2006_v57 }
 0x258   :  { %2318 = vst [vmem:[%s3749_s5 + $0x98] sm:$0xff] %v2254_v63  ;;  %v2253_v1 = vmax.f32 %v2007_v49, 0.0 }
 0x25a   :  { %2317 = vst [vmem:[%s3749_s5 + $0x90] sm:$0xff] %v2253_v1 }
 0x25b   :  { %v2546_v55 = vpop.f32.mrf.mxu0 }
 0x25c   :  { %v2022_v2 = vadd.f32 %v2546_v55, %v3473_v53 }
 0x25d   :  { %v2016_v18 = vpop.f32.mrf.mxu0 }
 0x25e   :  { %v2256_v30 = vmax.f32 %v2022_v2, 0.0  ;;  %v2017_v24 = vadd.f32 %v3473_v53, %v2016_v18 }
 0x260   :  { %2320 = vst [vmem:[%s3749_s5 + $0xa8] sm:$0xff] %v2256_v30  ;;  %v2255_v59 = vmax.f32 %v2017_v24, 0.0 }
 0x262   :  { %2319 = vst [vmem:[%s3749_s5 + $0xa0] sm:$0xff] %v2255_v59 }
 0x263   :  { %v2549_v35 = vpop.f32.mrf.mxu0 }
 0x264   :  { %v2032_v4 = vadd.f32 %v2549_v35, %v3473_v53 }
 0x265   :  { %v2026_v10 = vpop.f32.mrf.mxu0 }
 0x266   :  { %v2258_v61 = vmax.f32 %v2032_v4, 0.0  ;;  %v2027_v23 = vadd.f32 %v3473_v53, %v2026_v10 }
 0x268   :  { %2322 = vst [vmem:[%s3749_s5 + $0xb8] sm:$0xff] %v2258_v61  ;;  %v2257_v16 = vmax.f32 %v2027_v23, 0.0 }
 0x26a   :  { %2321 = vst [vmem:[%s3749_s5 + $0xb0] sm:$0xff] %v2257_v16 }
 0x26b   :  { %v2552_v9 = vpop.f32.mrf.mxu0 }
 0x26c   :  { %v2042_v17 = vadd.f32 %v2552_v9, %v3473_v53 }
 0x26d   :  { %v2036_v48 = vpop.f32.mrf.mxu0 }
 0x26e   :  { %v2260_v15 = vmax.f32 %v2042_v17, 0.0  ;;  %v2037_v3 = vadd.f32 %v3473_v53, %v2036_v48 }
 0x270   :  { %2324 = vst [vmem:[%s3749_s5 + $0xc8] sm:$0xff] %v2260_v15  ;;  %v2259_v42 = vmax.f32 %v2037_v3, 0.0 }
 0x272   :  { %2323 = vst [vmem:[%s3749_s5 + $0xc0] sm:$0xff] %v2259_v42 }
 0x273   :  { %v2555_v27 = vpop.f32.mrf.mxu0 }
 0x274   :  { %v2052_v36 = vadd.f32 %v2555_v27, %v3473_v53 }
 0x275   :  { %v2046_v29 = vpop.f32.mrf.mxu0 }
 0x276   :  { %v2262_v14 = vmax.f32 %v2052_v36, 0.0  ;;  %v2047_v54 = vadd.f32 %v3473_v53, %v2046_v29 }
 0x278   :  { %2326 = vst [vmem:[%s3749_s5 + $0xd8] sm:$0xff] %v2262_v14  ;;  %v2261_v21 = vmax.f32 %v2047_v54, 0.0 }
 0x27a   :  { %2325 = vst [vmem:[%s3749_s5 + $0xd0] sm:$0xff] %v2261_v21 }
 0x27b   :  { %v2558_v44 = vpop.f32.mrf.mxu0 }
 0x27c   :  { %v2062_v11 = vadd.f32 %v2558_v44, %v3473_v53 }
 0x27d   :  { %v2056_v32 = vpop.f32.mrf.mxu0 }
 0x27e   :  { %v2264_v33 = vmax.f32 %v2062_v11, 0.0  ;;  %v2057_v34 = vadd.f32 %v3473_v53, %v2056_v32 }
 0x280   :  { %2328 = vst [vmem:[%s3749_s5 + $0xe8] sm:$0xff] %v2264_v33  ;;  %v2263_v25 = vmax.f32 %v2057_v34, 0.0 }
 0x282   :  { %2327 = vst [vmem:[%s3749_s5 + $0xe0] sm:$0xff] %v2263_v25 }
 0x283   :  { %v2561_v52 = vpop.f32.mrf.mxu0 }
 0x284   :  { %v2072_v58 = vadd.f32 %v2561_v52, %v3473_v53 }
 0x285   :  { %v2066_v20 = vpop.f32.mrf.mxu0 }
 0x286   :  { %v2266_v38 = vmax.f32 %v2072_v58, 0.0  ;;  %v2067_v62 = vadd.f32 %v3473_v53, %v2066_v20 }
 0x288   :  { %2330 = vst [vmem:[%s3749_s5 + $0xf8] sm:$0xff] %v2266_v38  ;;  %v2265_v41 = vmax.f32 %v2067_v62, 0.0 }
 0x28a   :  { %2329 = vst [vmem:[%s3749_s5 + $0xf0] sm:$0xff] %v2265_v41 }
 0x28b   :  { %v2564_v19 = vpop.f32.mrf.mxu0 }
 0x28c   :  { %v2082_v8 = vadd.f32 %v2564_v19, %v3473_v53 }
 0x28d   :  { %v2076_v40 = vpop.f32.mrf.mxu0 }
 0x28e   :  { %v2268_v22 = vmax.f32 %v2082_v8, 0.0  ;;  %v2077_v46 = vadd.f32 %v3473_v53, %v2076_v40 }
 0x290   :  { %2332 = vst [vmem:[%s3749_s5 + $0x108] sm:$0xff] %v2268_v22  ;;  %v2267_v28 = vmax.f32 %v2077_v46, 0.0 }
 0x292   :  { %2331 = vst [vmem:[%s3749_s5 + $0x100] sm:$0xff] %v2267_v28 }
 0x293   :  { %v2567_v56 = vpop.f32.mrf.mxu0 }
 0x294   :  { %v2092_v50 = vadd.f32 %v2567_v56, %v3473_v53 }
 0x295   :  { %v2086_v26 = vpop.f32.mrf.mxu0 }
 0x296   :  { %v2270_v13 = vmax.f32 %v2092_v50, 0.0  ;;  %v2087_v37 = vadd.f32 %v3473_v53, %v2086_v26 }
 0x298   :  { %2334 = vst [vmem:[%s3749_s5 + $0x118] sm:$0xff] %v2270_v13  ;;  %v2269_v45 = vmax.f32 %v2087_v37, 0.0 }
 0x29a   :  { %2333 = vst [vmem:[%s3749_s5 + $0x110] sm:$0xff] %v2269_v45 }
 0x29b   :  { %v2570_v31 = vpop.f32.mrf.mxu0 }
 0x29c   :  { %v2102_v0 = vadd.f32 %v2570_v31, %v3473_v53 }
 0x29d   :  { %v2096_v47 = vpop.f32.mrf.mxu0 }
 0x29e   :  { %v2272_v43 = vmax.f32 %v2102_v0, 0.0  ;;  %v2097_v7 = vadd.f32 %v3473_v53, %v2096_v47 }
 0x2a0   :  { %2336 = vst [vmem:[%s3749_s5 + $0x128] sm:$0xff] %v2272_v43  ;;  %v2271_v5 = vmax.f32 %v2097_v7, 0.0 }
 0x2a2   :  { %2335 = vst [vmem:[%s3749_s5 + $0x120] sm:$0xff] %v2271_v5 }
 0x2a3   :  { %v2573_v39 = vpop.f32.mrf.mxu0 }
 0x2a4   :  { %v2112_v6 = vadd.f32 %v2573_v39, %v3473_v53 }
 0x2a5   :  { %v2106_v51 = vpop.f32.mrf.mxu0 }
 0x2a6   :  { %v2274_v60 = vmax.f32 %v2112_v6, 0.0  ;;  %v2107_v12 = vadd.f32 %v3473_v53, %v2106_v51 }
 0x2a8   :  { %2338 = vst [vmem:[%s3749_s5 + $0x138] sm:$0xff] %v2274_v60  ;;  %v2273_v57 = vmax.f32 %v2107_v12, 0.0 }
 0x2aa   :  { %2337 = vst [vmem:[%s3749_s5 + $0x130] sm:$0xff] %v2273_v57 }
 0x2ab   :  { %v2576_v63 = vpop.f32.mrf.mxu0 }
 0x2ac   :  { %v2122_v49 = vadd.f32 %v2576_v63, %v3473_v53 }
 0x2ad   :  { %v2116_v1 = vpop.f32.mrf.mxu0 }
 0x2ae   :  { %v2276_v55 = vmax.f32 %v2122_v49, 0.0  ;;  %v2117_v2 = vadd.f32 %v3473_v53, %v2116_v1 }
 0x2b0   :  { %2340 = vst [vmem:[%s3749_s5 + $0x148] sm:$0xff] %v2276_v55  ;;  %v2275_v18 = vmax.f32 %v2117_v2, 0.0 }
 0x2b2   :  { %2339 = vst [vmem:[%s3749_s5 + $0x140] sm:$0xff] %v2275_v18 }
 0x2b3   :  { %v2579_v30 = vpop.f32.mrf.mxu0 }
 0x2b4   :  { %v2132_v24 = vadd.f32 %v2579_v30, %v3473_v53 }
 0x2b5   :  { %v2126_v59 = vpop.f32.mrf.mxu0 }
 0x2b6   :  { %v2278_v35 = vmax.f32 %v2132_v24, 0.0  ;;  %v2127_v4 = vadd.f32 %v3473_v53, %v2126_v59 }
 0x2b8   :  { %2342 = vst [vmem:[%s3749_s5 + $0x158] sm:$0xff] %v2278_v35  ;;  %v2277_v10 = vmax.f32 %v2127_v4, 0.0 }
 0x2ba   :  { %2341 = vst [vmem:[%s3749_s5 + $0x150] sm:$0xff] %v2277_v10 }
 0x2bb   :  { %v2582_v61 = vpop.f32.mrf.mxu0 }
 0x2bc   :  { %v2142_v23 = vadd.f32 %v2582_v61, %v3473_v53 }
 0x2bd   :  { %v2136_v16 = vpop.f32.mrf.mxu0 }
 0x2be   :  { %v2280_v9 = vmax.f32 %v2142_v23, 0.0  ;;  %v2137_v17 = vadd.f32 %v3473_v53, %v2136_v16 }
 0x2c0   :  { %2344 = vst [vmem:[%s3749_s5 + $0x168] sm:$0xff] %v2280_v9  ;;  %v2279_v48 = vmax.f32 %v2137_v17, 0.0 }
 0x2c2   :  { %2343 = vst [vmem:[%s3749_s5 + $0x160] sm:$0xff] %v2279_v48 }
 0x2c3   :  { %v2585_v15 = vpop.f32.mrf.mxu0 }
 0x2c4   :  { %v2152_v3 = vadd.f32 %v2585_v15, %v3473_v53 }
 0x2c5   :  { %v2146_v42 = vpop.f32.mrf.mxu0 }
 0x2c6   :  { %v2282_v27 = vmax.f32 %v2152_v3, 0.0  ;;  %v2147_v36 = vadd.f32 %v3473_v53, %v2146_v42 }
 0x2c8   :  { %2346 = vst [vmem:[%s3749_s5 + $0x178] sm:$0xff] %v2282_v27  ;;  %v2281_v29 = vmax.f32 %v2147_v36, 0.0 }
 0x2ca   :  { %2345 = vst [vmem:[%s3749_s5 + $0x170] sm:$0xff] %v2281_v29 }
 0x2cb   :  { %v2588_v14 = vpop.f32.mrf.mxu0 }
 0x2cc   :  { %v2162_v54 = vadd.f32 %v2588_v14, %v3473_v53 }
 0x2cd   :  { %v2156_v21 = vpop.f32.mrf.mxu0 }
 0x2ce   :  { %v2284_v44 = vmax.f32 %v2162_v54, 0.0  ;;  %v2157_v11 = vadd.f32 %v3473_v53, %v2156_v21 }
 0x2d0   :  { %2348 = vst [vmem:[%s3749_s5 + $0x188] sm:$0xff] %v2284_v44  ;;  %v2283_v32 = vmax.f32 %v2157_v11, 0.0 }
 0x2d2   :  { %2347 = vst [vmem:[%s3749_s5 + $0x180] sm:$0xff] %v2283_v32 }
 0x2d3   :  { %v2591_v33 = vpop.f32.mrf.mxu0 }
 0x2d4   :  { %v2172_v34 = vadd.f32 %v2591_v33, %v3473_v53 }
 0x2d5   :  { %v2166_v25 = vpop.f32.mrf.mxu0 }
 0x2d6   :  { %v2286_v52 = vmax.f32 %v2172_v34, 0.0  ;;  %v2167_v58 = vadd.f32 %v3473_v53, %v2166_v25 }
 0x2d8   :  { %2350 = vst [vmem:[%s3749_s5 + $0x198] sm:$0xff] %v2286_v52  ;;  %v2285_v20 = vmax.f32 %v2167_v58, 0.0 }
 0x2da   :  { %2349 = vst [vmem:[%s3749_s5 + $0x190] sm:$0xff] %v2285_v20 }
 0x2db   :  { %v2594_v38 = vpop.f32.mrf.mxu0 }
 0x2dc   :  { %v2182_v62 = vadd.f32 %v2594_v38, %v3473_v53 }
 0x2dd   :  { %v2176_v41 = vpop.f32.mrf.mxu0 }
 0x2de   :  { %v2288_v19 = vmax.f32 %v2182_v62, 0.0  ;;  %v2177_v8 = vadd.f32 %v3473_v53, %v2176_v41 }
 0x2e0   :  { %2352 = vst [vmem:[%s3749_s5 + $0x1a8] sm:$0xff] %v2288_v19  ;;  %v2287_v40 = vmax.f32 %v2177_v8, 0.0 }
 0x2e2   :  { %2351 = vst [vmem:[%s3749_s5 + $0x1a0] sm:$0xff] %v2287_v40 }
 0x2e3   :  { %v2597_v22 = vpop.f32.mrf.mxu0 }
 0x2e4   :  { %v2192_v46 = vadd.f32 %v2597_v22, %v3473_v53 }
 0x2e5   :  { %v2186_v28 = vpop.f32.mrf.mxu0 }
 0x2e6   :  { %v2290_v56 = vmax.f32 %v2192_v46, 0.0  ;;  %v2187_v50 = vadd.f32 %v3473_v53, %v2186_v28 }
 0x2e8   :  { %2354 = vst [vmem:[%s3749_s5 + $0x1b8] sm:$0xff] %v2290_v56  ;;  %v2289_v26 = vmax.f32 %v2187_v50, 0.0 }
 0x2ea   :  { %2353 = vst [vmem:[%s3749_s5 + $0x1b0] sm:$0xff] %v2289_v26 }
 0x2eb   :  { %v2600_v13 = vpop.f32.mrf.mxu0 }
 0x2ec   :  { %v2202_v37 = vadd.f32 %v2600_v13, %v3473_v53 }
 0x2ed   :  { %v2196_v45 = vpop.f32.mrf.mxu0 }
 0x2ee   :  { %v2292_v31 = vmax.f32 %v2202_v37, 0.0  ;;  %v2197_v0 = vadd.f32 %v3473_v53, %v2196_v45 }
 0x2f0   :  { %2356 = vst [vmem:[%s3749_s5 + $0x1c8] sm:$0xff] %v2292_v31  ;;  %v2291_v47 = vmax.f32 %v2197_v0, 0.0 }
 0x2f2   :  { %2355 = vst [vmem:[%s3749_s5 + $0x1c0] sm:$0xff] %v2291_v47 }
 0x2f3   :  { %v2603_v43 = vpop.f32.mrf.mxu0 }
 0x2f4   :  { %v2212_v7 = vadd.f32 %v2603_v43, %v3473_v53 }
 0x2f5   :  { %v2206_v5 = vpop.f32.mrf.mxu0 }
 0x2f6   :  { %v2294_v39 = vmax.f32 %v2212_v7, 0.0  ;;  %v2207_v6 = vadd.f32 %v3473_v53, %v2206_v5 }
 0x2f8   :  { %2358 = vst [vmem:[%s3749_s5 + $0x1d8] sm:$0xff] %v2294_v39  ;;  %v2293_v51 = vmax.f32 %v2207_v6, 0.0 }
 0x2fa   :  { %2357 = vst [vmem:[%s3749_s5 + $0x1d0] sm:$0xff] %v2293_v51 }
 0x2fb   :  { %v2606_v60 = vpop.f32.mrf.mxu0 }
 0x2fc   :  { %v2222_v12 = vadd.f32 %v2606_v60, %v3473_v53 }
 0x2fd   :  { %v2216_v57 = vpop.f32.mrf.mxu0 }
 0x2fe   :  { %v2296_v63 = vmax.f32 %v2222_v12, 0.0  ;;  %v2217_v49 = vadd.f32 %v3473_v53, %v2216_v57 }
 0x300   :  { %2360 = vst [vmem:[%s3749_s5 + $0x1e8] sm:$0xff] %v2296_v63  ;;  %v2295_v1 = vmax.f32 %v2217_v49, 0.0 }
 0x302   :  { %2359 = vst [vmem:[%s3749_s5 + $0x1e0] sm:$0xff] %v2295_v1 }
 0x303   :  { %v2609_v55 = vpop.f32.mrf.mxu0 }
 0x304   :  { %v2232_v2 = vadd.f32 %v2609_v55, %v3473_v53 }
 0x305   :  { %v2226_v18 = vpop.f32.mrf.mxu0 }
 0x306   :  { %v2298_v30 = vmax.f32 %v2232_v2, 0.0  ;;  %v2227_v24 = vadd.f32 %v3473_v53, %v2226_v18 }
 0x308   :  { %2362 = vst [vmem:[%s3749_s5 + $0x1f8] sm:$0xff] %v2298_v30  ;;  %v2297_v59 = vmax.f32 %v2227_v24, 0.0 }
 0x30a   :  { %2361 = vst [vmem:[%s3749_s5 + $0x1f0] sm:$0xff] %v2297_v59 }

</bundles_post_ra>
